<compile_context>
chip_gen: v7x
topology: tpu7x:2x2x1
jax: 0.10.0
libtpu: 0.0.40
codegen_flags: <defaults>
</compile_context>

<pallas_src>
import functools

import jax
import jax.numpy as jnp
from jax.experimental import pallas as pl
from jax.experimental.pallas import tpu as pltpu

EPS = 1e-5                       # PyTorch BatchNorm default eps
VMEM_LIMIT = 32 * 1024 * 1024    # explicit scoped-VMEM cap (safe on v5e/v6e/v7x)
MXU_DTYPE = jnp.bfloat16         # matmul operand dtype (accumulation stays f32)


def _pick_tile(n, cap):
    """Largest tile t <= cap with n % t == 0 and (t % 8 == 0 or t == n)."""
    if n <= cap:
        return n
    best = 0
    t = 8
    while t <= cap:
        if n % t == 0:
            best = t
        t += 8
    return best if best > 0 else n


def _mosaic(*sems):
    return pltpu.CompilerParams(dimension_semantics=sems,
                                vmem_limit_bytes=VMEM_LIMIT)


# ---------------------------------------------------------------------------
# kNN graph: negative pairwise squared distance, tiled over query rows
# ---------------------------------------------------------------------------
def _pdist_kernel(q_ref, x_ref, o_ref):
    q = q_ref[0]                                                  # (TM, C) f32
    x = x_ref[0]                                                  # (N,  C) f32
    # q @ x.T without an explicit transpose (trans_b matmul on the MXU).
    g = jax.lax.dot_general(q, x, (((1,), (1,)), ((), ())),
                            preferred_element_type=jnp.float32)   # (TM, N)
    qq = jnp.sum(q * q, axis=-1, keepdims=True)                   # (TM, 1)
    xx = jnp.sum(x * x, axis=-1, keepdims=True)                   # (N, 1)
    o_ref[0] = 2.0 * g - qq - xx.T                                # -||qi - xj||^2


def knn_indices(x_bnc, k, *, tm_cap=256):
    """x:(B,N,C) -> idx:(B,N,k), k nearest neighbors (self included)."""
    B, N, C = x_bnc.shape
    TM = _pick_tile(N, tm_cap)
    neg_d = pl.pallas_call(
        _pdist_kernel,
        out_shape=jax.ShapeDtypeStruct((B, N, N), jnp.float32),
        grid=(B, N // TM),
        in_specs=[
            pl.BlockSpec((1, TM, C), lambda b, m: (b, m, 0)),
            pl.BlockSpec((1, N, C), lambda b, m: (b, 0, 0)),
        ],
        out_specs=pl.BlockSpec((1, TM, N), lambda b, m: (b, m, 0)),
        compiler_params=_mosaic("parallel", "parallel"),
    )(x_bnc, x_bnc)
    # TODO(synk): top-k selection has no clean Pallas equivalent here; it stays
    # in XLA (self-inclusion / tie behavior follows lax.top_k on -distance).
    _, idx = jax.lax.top_k(neg_d, k)                              # (B, N, k) int32
    return idx


# ---------------------------------------------------------------------------
# Fused EdgeConv block:
#   keep_feature (kNN gather) -> 1x1 Conv2d -> BN2d -> ReLU -> max over points
#   (torch dim=2 on (B,C,N,K)), producing (B, K, Cout).
# ---------------------------------------------------------------------------
# TODO(synk): `keep_feature` is not defined in src/DGCNN.py; assumed to be the
# plain kNN feature gather WITHOUT the (neighbor - center, center) concat,
# since edge_cov1 expects `input_channel` channels, and torch.max(..., dim=2)
# is taken literally (reduction over the point axis of a (B,C,N,K) tensor).
def _edge_block_kernel(x_ref, idx_ref, w_ref, scale_ref, shift_ref, o_ref,
                       z_ref, acc_ref):
    nt = pl.program_id(1)

    # Per-point conv+BN+ReLU computed ONCE per batch (commutes with the gather).
    @pl.when(nt == 0)
    def _():
        x = x_ref[0].astype(MXU_DTYPE)                            # (N, Cin)
        z = jnp.dot(x, w_ref[...], preferred_element_type=jnp.float32)
        z = jnp.maximum(z * scale_ref[...] + shift_ref[...], 0.0)  # f32 elementwise
        z_ref[...] = z.astype(MXU_DTYPE)                          # (N, Cout) scratch

    idx = idx_ref[0]                                              # (TN, K) int32
    tn, kk = idx.shape
    n_pts = z_ref.shape[0]
    z = z_ref[...]                                                # (N, Cout) bf16
    cols = jax.lax.broadcasted_iota(jnp.int32, (tn, n_pts), 1)    # hoisted

    # Gather neighbor rows with one-hot MXU matmuls (one per neighbor slot j),
    # then take the partial max over the TN points of this tile.
    parts = []
    for j in range(kk):
        idx_j = idx[:, j:j + 1]                                   # (TN, 1)
        oh = jnp.where(cols == idx_j, 1.0, 0.0).astype(MXU_DTYPE)  # (TN, N)
        g_j = jnp.dot(oh, z, preferred_element_type=jnp.float32)   # (TN, Cout)
        parts.append(jnp.max(g_j, axis=0, keepdims=True))          # (1, Cout)
    part = jnp.concatenate(parts, axis=0)                          # (K, Cout)

    @pl.when(nt == 0)
    def _():
        acc_ref[...] = part

    @pl.when(nt > 0)
    def _():
        acc_ref[...] = jnp.maximum(acc_ref[...], part)

    @pl.when(nt == pl.num_programs(1) - 1)
    def _():
        o_ref[0] = acc_ref[...]


def edge_conv_block(x_bnc, idx, w_bf16, scale, shift, *, tn_cap=256):
    """x:(B,N,Cin), idx:(B,N,K) -> (B, K, Cout)."""
    B, N, Cin = x_bnc.shape
    K = idx.shape[2]
    Cout = w_bf16.shape[1]
    TN = _pick_tile(N, tn_cap)
    return pl.pallas_call(
        _edge_block_kernel,
        out_shape=jax.ShapeDtypeStruct((B, K, Cout), jnp.float32),
        grid=(B, N // TN),
        in_specs=[
            pl.BlockSpec((1, N, Cin), lambda b, nt: (b, 0, 0)),    # points (resident)
            pl.BlockSpec((1, TN, K), lambda b, nt: (b, nt, 0)),    # kNN index tile
            pl.BlockSpec((Cin, Cout), lambda b, nt: (0, 0)),
            pl.BlockSpec((1, Cout), lambda b, nt: (0, 0)),
            pl.BlockSpec((1, Cout), lambda b, nt: (0, 0)),
        ],
        out_specs=pl.BlockSpec((1, K, Cout), lambda b, nt: (b, 0, 0)),
        scratch_shapes=[
            pltpu.VMEM((N, Cout), MXU_DTYPE),      # per-batch z = relu(bn(x @ W))
            pltpu.VMEM((K, Cout), jnp.float32),    # running max accumulator
        ],
        compiler_params=_mosaic("parallel", "arbitrary"),
    )(x_bnc, idx, w_bf16, scale, shift)


# ---------------------------------------------------------------------------
# Row-tiled dense + BN + ReLU (used for edge_cov5, batched over B*K rows)
# ---------------------------------------------------------------------------
def _dense_bn_relu_kernel(x_ref, w_ref, scale_ref, shift_ref, o_ref):
    y = jnp.dot(x_ref[...].astype(MXU_DTYPE), w_ref[...],
                preferred_element_type=jnp.float32)
    o_ref[...] = jnp.maximum(y * scale_ref[...] + shift_ref[...], 0.0)


def dense_bn_relu(x2d, w_bf16, scale, shift, *, tr_cap=512):
    R, Cin = x2d.shape
    Cout = w_bf16.shape[1]
    TR = _pick_tile(R, tr_cap)
    return pl.pallas_call(
        _dense_bn_relu_kernel,
        out_shape=jax.ShapeDtypeStruct((R, Cout), jnp.float32),
        grid=(R // TR,),
        in_specs=[
            pl.BlockSpec((TR, Cin), lambda r: (r, 0)),
            pl.BlockSpec((Cin, Cout), lambda r: (0, 0)),
            pl.BlockSpec((1, Cout), lambda r: (0, 0)),
            pl.BlockSpec((1, Cout), lambda r: (0, 0)),
        ],
        out_specs=pl.BlockSpec((TR, Cout), lambda r: (r, 0)),
        compiler_params=_mosaic("parallel"),
    )(x2d, w_bf16, scale, shift)


# ---------------------------------------------------------------------------
# Max over the point axis (torch.max(x, dim=2) after edge_cov5)
# ---------------------------------------------------------------------------
def _rowmax_kernel(x_ref, o_ref):
    o_ref[0] = jnp.max(x_ref[0], axis=0, keepdims=True)


def max_over_points(x_bkc):
    B, K, C = x_bkc.shape
    out = pl.pallas_call(
        _rowmax_kernel,
        out_shape=jax.ShapeDtypeStruct((B, 1, C), jnp.float32),
        grid=(B,),
        in_specs=[pl.BlockSpec((1, K, C), lambda b: (b, 0, 0))],
        out_specs=pl.BlockSpec((1, 1, C), lambda b: (b, 0, 0)),
        compiler_params=_mosaic("parallel"),
    )(x_bkc)
    return out[:, 0, :]


# ---------------------------------------------------------------------------
# MLP head: Linear->BN->ReLU, Linear->BN->ReLU, Linear->ReLU (one fused kernel)
# ---------------------------------------------------------------------------
def _head_kernel(x_ref, w6_ref, b6_ref, s6_ref, t6_ref,
                 w7_ref, b7_ref, s7_ref, t7_ref,
                 w8_ref, b8_ref, o_ref):
    h = jnp.dot(x_ref[...].astype(MXU_DTYPE), w6_ref[...],
                preferred_element_type=jnp.float32) + b6_ref[...]
    h = jnp.maximum(h * s6_ref[...] + t6_ref[...], 0.0)
    h = jnp.dot(h.astype(MXU_DTYPE), w7_ref[...],
                preferred_element_type=jnp.float32) + b7_ref[...]
    h = jnp.maximum(h * s7_ref[...] + t7_ref[...], 0.0)
    h = jnp.dot(h.astype(MXU_DTYPE), w8_ref[...],
                preferred_element_type=jnp.float32) + b8_ref[...]
    o_ref[...] = jnp.maximum(h, 0.0)


def head(g, p):
    B = g.shape[0]
    Cout = p["w8"].shape[1]
    return pl.pallas_call(
        _head_kernel,
        out_shape=jax.ShapeDtypeStruct((B, Cout), jnp.float32),
    )(g, p["w6"], p["b6"], p["s6"], p["t6"],
      p["w7"], p["b7"], p["s7"], p["t7"],
      p["w8"], p["b8"])


# ---------------------------------------------------------------------------
# Parameter init (deterministic, synthetic) & BN folding
# ---------------------------------------------------------------------------
def _bn_fold(gamma, beta, rm, rv):
    scale = gamma / jnp.sqrt(rv + EPS)
    shift = beta - rm * scale
    return scale[None, :].astype(jnp.float32), shift[None, :].astype(jnp.float32)


def init_params(key, input_channel, output_channel):
    ks = jax.random.split(key, 20)

    def conv_w(kk, cin, cout):
        w = jax.random.normal(kk, (cin, cout), jnp.float32) / jnp.sqrt(float(cin))
        return w.astype(MXU_DTYPE)      # matmul operands kept in bf16

    def bn(kk, c):
        k1, k2, k3, k4 = jax.random.split(kk, 4)
        gamma = 1.0 + 0.1 * jax.random.normal(k1, (c,), jnp.float32)
        beta = 0.1 * jax.random.normal(k2, (c,), jnp.float32)
        rm = 0.1 * jax.random.normal(k3, (c,), jnp.float32)
        rv = 1.0 + 0.1 * jnp.abs(jax.random.normal(k4, (c,), jnp.float32))
        return _bn_fold(gamma, beta, rm, rv)

    p = {}
    p["w1"] = conv_w(ks[0], input_channel, 64); p["s1"], p["t1"] = bn(ks[1], 64)
    p["w2"] = conv_w(ks[2], 64, 64);            p["s2"], p["t2"] = bn(ks[3], 64)
    p["w3"] = conv_w(ks[4], 64, 64);            p["s3"], p["t3"] = bn(ks[5], 64)
    p["w4"] = conv_w(ks[6], 64, 64);            p["s4"], p["t4"] = bn(ks[7], 64)
    p["w5"] = conv_w(ks[8], 64, 1024);          p["s5"], p["t5"] = bn(ks[9], 1024)
    p["w6"] = conv_w(ks[10], 1024, 512)
    p["b6"] = 0.1 * jax.random.normal(ks[11], (1, 512), jnp.float32)
    p["s6"], p["t6"] = bn(ks[12], 512)
    p["w7"] = conv_w(ks[13], 512, 128)
    p["b7"] = 0.1 * jax.random.normal(ks[14], (1, 128), jnp.float32)
    p["s7"], p["t7"] = bn(ks[15], 128)
    p["w8"] = conv_w(ks[16], 128, output_channel)
    p["b8"] = 0.1 * jax.random.normal(ks[17], (1, output_channel), jnp.float32)
    return p


# ---------------------------------------------------------------------------
# Full forward (mirrors DGCNN_cls.forward)
# ---------------------------------------------------------------------------
@functools.partial(jax.jit, static_argnames=("k",))
def dgcnn_cls_forward(x_bcn, params, k=8):
    # x_bcn: (B, C, N) exactly as the PyTorch forward input.
    h = jnp.transpose(x_bcn, (0, 2, 1)).astype(jnp.float32)       # (B, N, C)

    # Four fused EdgeConv blocks:
    #   keep_feature -> conv2d(1x1)+BN+ReLU -> max over torch dim=2 (point axis)
    for i in (1, 2, 3, 4):
        idx = knn_indices(h, k)                                   # (B, Np, k)
        h = edge_conv_block(h, idx, params[f"w{i}"],
                            params[f"s{i}"], params[f"t{i}"])     # (B, k, 64)

    # edge_cov5 (Conv1d+BN+ReLU) batched over all B*k rows, then max over points.
    B, Kp, C64 = h.shape
    z5 = dense_bn_relu(h.reshape(B * Kp, C64),
                       params["w5"], params["s5"], params["t5"])  # (B*k, 1024)
    g = max_over_points(z5.reshape(B, Kp, 1024))                  # (B, 1024)

    return head(g, params)                                        # (B, out)


if __name__ == "__main__":
    key = jax.random.PRNGKey(0)
    kp, kx = jax.random.split(key)

    B, C, N, K_NN, OUT = 2, 4, 16, 8, 16   # small shapes; module default k=20
    params = init_params(kp, C, OUT)
    x = jax.random.normal(kx, (B, C, N), jnp.float32)

    out = dgcnn_cls_forward(x, params, k=K_NN)
    out = jax.block_until_ready(out)

    assert out.shape == (B, OUT), out.shape
    assert bool(jnp.all(jnp.isfinite(out)))
    assert bool(jnp.all(out >= 0.0))       # final ReLU
    print("KERNEL_OK")
</pallas_src>

<mosaic_0001>
module attributes {stable_mosaic.version = 11 : i64} {
  func.func @_pdist_kernel(%arg0: i32, %arg1: i32, %arg2: memref<1x16x4xf32, #tpu.memory_space<vmem>>, %arg3: memref<1x16x4xf32, #tpu.memory_space<vmem>>, %arg4: memref<1x16x16xf32, #tpu.memory_space<vmem>>) attributes {dimension_semantics = [#tpu.dimension_semantics<parallel>, #tpu.dimension_semantics<parallel>], iteration_bounds = array<i64: 2, 1>, scalar_prefetch = 0 : i64, scratch_operands = 0 : i64, tpu.core_type = #tpu.core_type<tc>, window_params = [{transform_indices = @transform_0, window_bounds = array<i64: 1, 16, 4>}, {transform_indices = @transform_1, window_bounds = array<i64: 1, 16, 4>}, {transform_indices = @transform_2, window_bounds = array<i64: 1, 16, 16>}]} {
    %c0 = arith.constant 0 : index
    %c0_0 = arith.constant 0 : index
    %c0_1 = arith.constant 0 : index
    %0 = vector.load %arg2[%c0, %c0_0, %c0_1] : memref<1x16x4xf32, #tpu.memory_space<vmem>>, vector<1x16x4xf32>
    %1 = vector.shape_cast %0 : vector<1x16x4xf32> to vector<16x4xf32>
    %c0_2 = arith.constant 0 : index
    %c0_3 = arith.constant 0 : index
    %c0_4 = arith.constant 0 : index
    %2 = vector.load %arg3[%c0_2, %c0_3, %c0_4] : memref<1x16x4xf32, #tpu.memory_space<vmem>>, vector<1x16x4xf32>
    %3 = vector.shape_cast %2 : vector<1x16x4xf32> to vector<16x4xf32>
    %cst = arith.constant dense<0.000000e+00> : vector<16x16xf32>
    %4 = tpu.matmul %1, %3, %cst {dimension_numbers = #tpu.dot_dimension_numbers<[1], [1], [0], [0], [0, 0, 1, 0], [], []>} : vector<16x4xf32>, vector<16x4xf32>, vector<16x16xf32> -> vector<16x16xf32>
    %5 = arith.mulf %1, %1 : vector<16x4xf32>
    %cst_5 = arith.constant dense<0.000000e+00> : vector<16xf32>
    %6 = vector.multi_reduction <add>, %5, %cst_5 [1] : vector<16x4xf32> to vector<16xf32>
    %7 = vector.shape_cast %6 : vector<16xf32> to vector<16x1xf32>
    %8 = arith.mulf %3, %3 : vector<16x4xf32>
    %cst_6 = arith.constant dense<0.000000e+00> : vector<16xf32>
    %9 = vector.multi_reduction <add>, %8, %cst_6 [1] : vector<16x4xf32> to vector<16xf32>
    %10 = vector.shape_cast %9 : vector<16xf32> to vector<16x1xf32>
    %cst_7 = arith.constant 2.000000e+00 : f32
    %11 = vector.broadcast %cst_7 : f32 to vector<16x16xf32>
    %12 = arith.mulf %11, %4 : vector<16x16xf32>
    %13 = vector.broadcast %7 : vector<16x1xf32> to vector<16x16xf32>
    %14 = arith.subf %12, %13 : vector<16x16xf32>
    %15 = tpu.transpose %10, [1, 0] : vector<16x1xf32> -> vector<1x16xf32>
    %16 = vector.broadcast %15 : vector<1x16xf32> to vector<16x16xf32>
    %17 = arith.subf %14, %16 : vector<16x16xf32>
    %c0_8 = arith.constant 0 : index
    %c0_9 = arith.constant 0 : index
    %c0_10 = arith.constant 0 : index
    %18 = vector.load %arg4[%c0_8, %c0_9, %c0_10] : memref<1x16x16xf32, #tpu.memory_space<vmem>>, vector<1x16x16xf32>
    %19 = vector.shape_cast %18 : vector<1x16x16xf32> to vector<16x16xf32>
    %20 = vector.shape_cast %17 : vector<16x16xf32> to vector<1x16x16xf32>
    tpu.vector_store %arg4[%c0_8, %c0_9, %c0_10], %20 {strides = array<i32>} : memref<1x16x16xf32, #tpu.memory_space<vmem>>, vector<1x16x16xf32>,
    return
  }
  func.func @transform_0(%arg0: i32, %arg1: i32) -> (i32, i32, i32) {
    %c0_i32 = arith.constant 0 : i32
    %c0_i32_0 = arith.constant 0 : i32
    return %arg0, %arg1, %c0_i32 : i32, i32, i32
  }
  func.func @transform_1(%arg0: i32, %arg1: i32) -> (i32, i32, i32) {
    %c0_i32 = arith.constant 0 : i32
    %c0_i32_0 = arith.constant 0 : i32
    %c0_i32_1 = arith.constant 0 : i32
    return %arg0, %c0_i32, %c0_i32_0 : i32, i32, i32
  }
  func.func @transform_2(%arg0: i32, %arg1: i32) -> (i32, i32, i32) {
    %c0_i32 = arith.constant 0 : i32
    %c0_i32_0 = arith.constant 0 : i32
    return %arg0, %arg1, %c0_i32 : i32, i32, i32
  }
}

module attributes {stable_mosaic.version = 11 : i64} {
  func.func @_edge_block_kernel(%arg0: i32, %arg1: i32, %arg2: memref<1x16x4xf32, #tpu.memory_space<vmem>>, %arg3: memref<1x16x8xi32, #tpu.memory_space<vmem>>, %arg4: memref<4x64xbf16, #tpu.memory_space<vmem>>, %arg5: memref<1x64xf32, #tpu.memory_space<vmem>>, %arg6: memref<1x64xf32, #tpu.memory_space<vmem>>, %arg7: memref<1x8x64xf32, #tpu.memory_space<vmem>>, %arg8: memref<16x64xbf16, #tpu.memory_space<vmem>>, %arg9: memref<8x64xf32, #tpu.memory_space<vmem>>) attributes {dimension_semantics = [#tpu.dimension_semantics<parallel>, #tpu.dimension_semantics<arbitrary>], iteration_bounds = array<i64: 2, 1>, scalar_prefetch = 0 : i64, scratch_operands = 2 : i64, tpu.core_type = #tpu.core_type<tc>, window_params = [{transform_indices = @transform_0, window_bounds = array<i64: 1, 16, 4>}, {transform_indices = @transform_1, window_bounds = array<i64: 1, 16, 8>}, {pipeline_mode = #tpu.pipeline_mode<synchronous>, transform_indices = @transform_2, window_bounds = array<i64: 4, 64>}, {pipeline_mode = #tpu.pipeline_mode<synchronous>, transform_indices = @transform_3, window_bounds = array<i64: 1, 64>}, {pipeline_mode = #tpu.pipeline_mode<synchronous>, transform_indices = @transform_4, window_bounds = array<i64: 1, 64>}, {transform_indices = @transform_5, window_bounds = array<i64: 1, 8, 64>}]} {
    %c0_i32 = arith.constant 0 : i32
    %0 = arith.cmpi eq, %arg1, %c0_i32 : i32
    %1 = arith.extui %0 : i1 to i32
    %c0_i32_0 = arith.constant 0 : i32
    %2 = arith.cmpi ne, %1, %c0_i32_0 : i32
    scf.if %2 {
      %c0_42 = arith.constant 0 : index
      %c0_43 = arith.constant 0 : index
      %c0_44 = arith.constant 0 : index
      %97 = vector.load %arg2[%c0_42, %c0_43, %c0_44] : memref<1x16x4xf32, #tpu.memory_space<vmem>>, vector<1x16x4xf32>
      %98 = vector.shape_cast %97 : vector<1x16x4xf32> to vector<16x4xf32>
      %99 = arith.truncf %98 : vector<16x4xf32> to vector<16x4xbf16>
      %c0_45 = arith.constant 0 : index
      %c0_46 = arith.constant 0 : index
      %100 = vector.load %arg4[%c0_45, %c0_46] : memref<4x64xbf16, #tpu.memory_space<vmem>>, vector<4x64xbf16>
      %cst_47 = arith.constant dense<0.000000e+00> : vector<16x64xf32>
      %101 = tpu.matmul %99, %100, %cst_47 {dimension_numbers = #tpu.dot_dimension_numbers<[1], [0], [0], [1], [0, 0, 1, 1], [], []>} : vector<16x4xbf16>, vector<4x64xbf16>, vector<16x64xf32> -> vector<16x64xf32>
      %c0_48 = arith.constant 0 : index
      %c0_49 = arith.constant 0 : index
      %102 = vector.load %arg5[%c0_48, %c0_49] : memref<1x64xf32, #tpu.memory_space<vmem>>, vector<1x64xf32>
      %103 = vector.broadcast %102 : vector<1x64xf32> to vector<16x64xf32>
      %104 = arith.mulf %101, %103 : vector<16x64xf32>
      %c0_50 = arith.constant 0 : index
      %c0_51 = arith.constant 0 : index
      %105 = vector.load %arg6[%c0_50, %c0_51] : memref<1x64xf32, #tpu.memory_space<vmem>>, vector<1x64xf32>
      %106 = vector.broadcast %105 : vector<1x64xf32> to vector<16x64xf32>
      %107 = arith.addf %104, %106 : vector<16x64xf32>
      %cst_52 = arith.constant 0.000000e+00 : f32
      %108 = vector.broadcast %cst_52 : f32 to vector<16x64xf32>
      %109 = arith.maximumf %107, %108 : vector<16x64xf32>
      %110 = arith.truncf %109 : vector<16x64xf32> to vector<16x64xbf16>
      %c0_53 = arith.constant 0 : index
      %c0_54 = arith.constant 0 : index
      %111 = vector.load %arg8[%c0_53, %c0_54] : memref<16x64xbf16, #tpu.memory_space<vmem>>, vector<16x64xbf16>
      tpu.vector_store %arg8[%c0_53, %c0_54], %110 {strides = array<i32>} : memref<16x64xbf16, #tpu.memory_space<vmem>>, vector<16x64xbf16>,
    } else {
    }
    %c0 = arith.constant 0 : index
    %c0_1 = arith.constant 0 : index
    %c0_2 = arith.constant 0 : index
    %3 = vector.load %arg3[%c0, %c0_1, %c0_2] : memref<1x16x8xi32, #tpu.memory_space<vmem>>, vector<1x16x8xi32>
    %4 = vector.shape_cast %3 : vector<1x16x8xi32> to vector<16x8xi32>
    %c0_3 = arith.constant 0 : index
    %c0_4 = arith.constant 0 : index
    %5 = vector.load %arg8[%c0_3, %c0_4] : memref<16x64xbf16, #tpu.memory_space<vmem>>, vector<16x64xbf16>
    %6 = tpu.iota {dimensions = array<i32: 1>} : vector<16x16xi32>
    %7 = vector.extract_strided_slice %4 {offsets = [0, 0], sizes = [16, 1], strides = [1, 1]} : vector<16x8xi32> to vector<16x1xi32>
    %8 = vector.broadcast %7 : vector<16x1xi32> to vector<16x16xi32>
    %9 = arith.cmpi eq, %6, %8 : vector<16x16xi32>
    %cst = arith.constant 1.000000e+00 : f32
    %cst_5 = arith.constant 0.000000e+00 : f32
    %10 = vector.broadcast %cst : f32 to vector<16x16xf32>
    %11 = vector.broadcast %cst_5 : f32 to vector<16x16xf32>
    %12 = arith.select %9, %10, %11 : vector<16x16xi1>, vector<16x16xf32>
    %13 = arith.truncf %12 : vector<16x16xf32> to vector<16x16xbf16>
    %cst_6 = arith.constant dense<0.000000e+00> : vector<16x64xf32>
    %14 = tpu.matmul %13, %5, %cst_6 {dimension_numbers = #tpu.dot_dimension_numbers<[1], [0], [0], [1], [0, 0, 1, 1], [], []>} : vector<16x16xbf16>, vector<16x64xbf16>, vector<16x64xf32> -> vector<16x64xf32>
    %cst_7 = arith.constant dense<0xFF800000> : vector<64xf32>
    %15 = vector.multi_reduction <maximumf>, %14, %cst_7 [0] : vector<16x64xf32> to vector<64xf32>
    %16 = vector.shape_cast %15 : vector<64xf32> to vector<1x64xf32>
    %17 = vector.extract_strided_slice %4 {offsets = [0, 1], sizes = [16, 1], strides = [1, 1]} : vector<16x8xi32> to vector<16x1xi32>
    %18 = vector.broadcast %17 : vector<16x1xi32> to vector<16x16xi32>
    %19 = arith.cmpi eq, %6, %18 : vector<16x16xi32>
    %cst_8 = arith.constant 1.000000e+00 : f32
    %cst_9 = arith.constant 0.000000e+00 : f32
    %20 = vector.broadcast %cst_8 : f32 to vector<16x16xf32>
    %21 = vector.broadcast %cst_9 : f32 to vector<16x16xf32>
    %22 = arith.select %19, %20, %21 : vector<16x16xi1>, vector<16x16xf32>
    %23 = arith.truncf %22 : vector<16x16xf32> to vector<16x16xbf16>
    %cst_10 = arith.constant dense<0.000000e+00> : vector<16x64xf32>
    %24 = tpu.matmul %23, %5, %cst_10 {dimension_numbers = #tpu.dot_dimension_numbers<[1], [0], [0], [1], [0, 0, 1, 1], [], []>} : vector<16x16xbf16>, vector<16x64xbf16>, vector<16x64xf32> -> vector<16x64xf32>
    %cst_11 = arith.constant dense<0xFF800000> : vector<64xf32>
    %25 = vector.multi_reduction <maximumf>, %24, %cst_11 [0] : vector<16x64xf32> to vector<64xf32>
    %26 = vector.shape_cast %25 : vector<64xf32> to vector<1x64xf32>
    %27 = vector.extract_strided_slice %4 {offsets = [0, 2], sizes = [16, 1], strides = [1, 1]} : vector<16x8xi32> to vector<16x1xi32>
    %28 = vector.broadcast %27 : vector<16x1xi32> to vector<16x16xi32>
    %29 = arith.cmpi eq, %6, %28 : vector<16x16xi32>
    %cst_12 = arith.constant 1.000000e+00 : f32
    %cst_13 = arith.constant 0.000000e+00 : f32
    %30 = vector.broadcast %cst_12 : f32 to vector<16x16xf32>
    %31 = vector.broadcast %cst_13 : f32 to vector<16x16xf32>
    %32 = arith.select %29, %30, %31 : vector<16x16xi1>, vector<16x16xf32>
    %33 = arith.truncf %32 : vector<16x16xf32> to vector<16x16xbf16>
    %cst_14 = arith.constant dense<0.000000e+00> : vector<16x64xf32>
    %34 = tpu.matmul %33, %5, %cst_14 {dimension_numbers = #tpu.dot_dimension_numbers<[1], [0], [0], [1], [0, 0, 1, 1], [], []>} : vector<16x16xbf16>, vector<16x64xbf16>, vector<16x64xf32> -> vector<16x64xf32>
    %cst_15 = arith.constant dense<0xFF800000> : vector<64xf32>
    %35 = vector.multi_reduction <maximumf>, %34, %cst_15 [0] : vector<16x64xf32> to vector<64xf32>
    %36 = vector.shape_cast %35 : vector<64xf32> to vector<1x64xf32>
    %37 = vector.extract_strided_slice %4 {offsets = [0, 3], sizes = [16, 1], strides = [1, 1]} : vector<16x8xi32> to vector<16x1xi32>
    %38 = vector.broadcast %37 : vector<16x1xi32> to vector<16x16xi32>
    %39 = arith.cmpi eq, %6, %38 : vector<16x16xi32>
    %cst_16 = arith.constant 1.000000e+00 : f32
    %cst_17 = arith.constant 0.000000e+00 : f32
    %40 = vector.broadcast %cst_16 : f32 to vector<16x16xf32>
    %41 = vector.broadcast %cst_17 : f32 to vector<16x16xf32>
    %42 = arith.select %39, %40, %41 : vector<16x16xi1>, vector<16x16xf32>
    %43 = arith.truncf %42 : vector<16x16xf32> to vector<16x16xbf16>
    %cst_18 = arith.constant dense<0.000000e+00> : vector<16x64xf32>
    %44 = tpu.matmul %43, %5, %cst_18 {dimension_numbers = #tpu.dot_dimension_numbers<[1], [0], [0], [1], [0, 0, 1, 1], [], []>} : vector<16x16xbf16>, vector<16x64xbf16>, vector<16x64xf32> -> vector<16x64xf32>
    %cst_19 = arith.constant dense<0xFF800000> : vector<64xf32>
    %45 = vector.multi_reduction <maximumf>, %44, %cst_19 [0] : vector<16x64xf32> to vector<64xf32>
    %46 = vector.shape_cast %45 : vector<64xf32> to vector<1x64xf32>
    %47 = vector.extract_strided_slice %4 {offsets = [0, 4], sizes = [16, 1], strides = [1, 1]} : vector<16x8xi32> to vector<16x1xi32>
    %48 = vector.broadcast %47 : vector<16x1xi32> to vector<16x16xi32>
    %49 = arith.cmpi eq, %6, %48 : vector<16x16xi32>
    %cst_20 = arith.constant 1.000000e+00 : f32
    %cst_21 = arith.constant 0.000000e+00 : f32
    %50 = vector.broadcast %cst_20 : f32 to vector<16x16xf32>
    %51 = vector.broadcast %cst_21 : f32 to vector<16x16xf32>
    %52 = arith.select %49, %50, %51 : vector<16x16xi1>, vector<16x16xf32>
    %53 = arith.truncf %52 : vector<16x16xf32> to vector<16x16xbf16>
    %cst_22 = arith.constant dense<0.000000e+00> : vector<16x64xf32>
    %54 = tpu.matmul %53, %5, %cst_22 {dimension_numbers = #tpu.dot_dimension_numbers<[1], [0], [0], [1], [0, 0, 1, 1], [], []>} : vector<16x16xbf16>, vector<16x64xbf16>, vector<16x64xf32> -> vector<16x64xf32>
    %cst_23 = arith.constant dense<0xFF800000> : vector<64xf32>
    %55 = vector.multi_reduction <maximumf>, %54, %cst_23 [0] : vector<16x64xf32> to vector<64xf32>
    %56 = vector.shape_cast %55 : vector<64xf32> to vector<1x64xf32>
    %57 = vector.extract_strided_slice %4 {offsets = [0, 5], sizes = [16, 1], strides = [1, 1]} : vector<16x8xi32> to vector<16x1xi32>
    %58 = vector.broadcast %57 : vector<16x1xi32> to vector<16x16xi32>
    %59 = arith.cmpi eq, %6, %58 : vector<16x16xi32>
    %cst_24 = arith.constant 1.000000e+00 : f32
    %cst_25 = arith.constant 0.000000e+00 : f32
    %60 = vector.broadcast %cst_24 : f32 to vector<16x16xf32>
    %61 = vector.broadcast %cst_25 : f32 to vector<16x16xf32>
    %62 = arith.select %59, %60, %61 : vector<16x16xi1>, vector<16x16xf32>
    %63 = arith.truncf %62 : vector<16x16xf32> to vector<16x16xbf16>
    %cst_26 = arith.constant dense<0.000000e+00> : vector<16x64xf32>
    %64 = tpu.matmul %63, %5, %cst_26 {dimension_numbers = #tpu.dot_dimension_numbers<[1], [0], [0], [1], [0, 0, 1, 1], [], []>} : vector<16x16xbf16>, vector<16x64xbf16>, vector<16x64xf32> -> vector<16x64xf32>
    %cst_27 = arith.constant dense<0xFF800000> : vector<64xf32>
    %65 = vector.multi_reduction <maximumf>, %64, %cst_27 [0] : vector<16x64xf32> to vector<64xf32>
    %66 = vector.shape_cast %65 : vector<64xf32> to vector<1x64xf32>
    %67 = vector.extract_strided_slice %4 {offsets = [0, 6], sizes = [16, 1], strides = [1, 1]} : vector<16x8xi32> to vector<16x1xi32>
    %68 = vector.broadcast %67 : vector<16x1xi32> to vector<16x16xi32>
    %69 = arith.cmpi eq, %6, %68 : vector<16x16xi32>
    %cst_28 = arith.constant 1.000000e+00 : f32
    %cst_29 = arith.constant 0.000000e+00 : f32
    %70 = vector.broadcast %cst_28 : f32 to vector<16x16xf32>
    %71 = vector.broadcast %cst_29 : f32 to vector<16x16xf32>
    %72 = arith.select %69, %70, %71 : vector<16x16xi1>, vector<16x16xf32>
    %73 = arith.truncf %72 : vector<16x16xf32> to vector<16x16xbf16>
    %cst_30 = arith.constant dense<0.000000e+00> : vector<16x64xf32>
    %74 = tpu.matmul %73, %5, %cst_30 {dimension_numbers = #tpu.dot_dimension_numbers<[1], [0], [0], [1], [0, 0, 1, 1], [], []>} : vector<16x16xbf16>, vector<16x64xbf16>, vector<16x64xf32> -> vector<16x64xf32>
    %cst_31 = arith.constant dense<0xFF800000> : vector<64xf32>
    %75 = vector.multi_reduction <maximumf>, %74, %cst_31 [0] : vector<16x64xf32> to vector<64xf32>
    %76 = vector.shape_cast %75 : vector<64xf32> to vector<1x64xf32>
    %77 = vector.extract_strided_slice %4 {offsets = [0, 7], sizes = [16, 1], strides = [1, 1]} : vector<16x8xi32> to vector<16x1xi32>
    %78 = vector.broadcast %77 : vector<16x1xi32> to vector<16x16xi32>
    %79 = arith.cmpi eq, %6, %78 : vector<16x16xi32>
    %cst_32 = arith.constant 1.000000e+00 : f32
    %cst_33 = arith.constant 0.000000e+00 : f32
    %80 = vector.broadcast %cst_32 : f32 to vector<16x16xf32>
    %81 = vector.broadcast %cst_33 : f32 to vector<16x16xf32>
    %82 = arith.select %79, %80, %81 : vector<16x16xi1>, vector<16x16xf32>
    %83 = arith.truncf %82 : vector<16x16xf32> to vector<16x16xbf16>
    %cst_34 = arith.constant dense<0.000000e+00> : vector<16x64xf32>
    %84 = tpu.matmul %83, %5, %cst_34 {dimension_numbers = #tpu.dot_dimension_numbers<[1], [0], [0], [1], [0, 0, 1, 1], [], []>} : vector<16x16xbf16>, vector<16x64xbf16>, vector<16x64xf32> -> vector<16x64xf32>
    %cst_35 = arith.constant dense<0xFF800000> : vector<64xf32>
    %85 = vector.multi_reduction <maximumf>, %84, %cst_35 [0] : vector<16x64xf32> to vector<64xf32>
    %86 = vector.shape_cast %85 : vector<64xf32> to vector<1x64xf32>
    %87 = tpu.concatenate %16, %26, %36, %46, %56, %66, %76, %86 in 0 : vector<1x64xf32>, vector<1x64xf32>, vector<1x64xf32>, vector<1x64xf32>, vector<1x64xf32>, vector<1x64xf32>, vector<1x64xf32>, vector<1x64xf32> -> vector<8x64xf32>
    %c0_i32_36 = arith.constant 0 : i32
    %88 = arith.cmpi eq, %arg1, %c0_i32_36 : i32
    %89 = arith.extui %88 : i1 to i32
    %c0_i32_37 = arith.constant 0 : i32
    %90 = arith.cmpi ne, %89, %c0_i32_37 : i32
    scf.if %90 {
      %c0_42 = arith.constant 0 : index
      %c0_43 = arith.constant 0 : index
      %97 = vector.load %arg9[%c0_42, %c0_43] : memref<8x64xf32, #tpu.memory_space<vmem>>, vector<8x64xf32>
      tpu.vector_store %arg9[%c0_42, %c0_43], %87 {strides = array<i32>} : memref<8x64xf32, #tpu.memory_space<vmem>>, vector<8x64xf32>,
    } else {
    }
    %c0_i32_38 = arith.constant 0 : i32
    %91 = arith.cmpi sgt, %arg1, %c0_i32_38 : i32
    %92 = arith.extui %91 : i1 to i32
    %c0_i32_39 = arith.constant 0 : i32
    %93 = arith.cmpi ne, %92, %c0_i32_39 : i32
    scf.if %93 {
      %c0_42 = arith.constant 0 : index
      %c0_43 = arith.constant 0 : index
      %97 = vector.load %arg9[%c0_42, %c0_43] : memref<8x64xf32, #tpu.memory_space<vmem>>, vector<8x64xf32>
      %98 = arith.maximumf %97, %87 : vector<8x64xf32>
      %c0_44 = arith.constant 0 : index
      %c0_45 = arith.constant 0 : index
      %99 = vector.load %arg9[%c0_44, %c0_45] : memref<8x64xf32, #tpu.memory_space<vmem>>, vector<8x64xf32>
      tpu.vector_store %arg9[%c0_44, %c0_45], %98 {strides = array<i32>} : memref<8x64xf32, #tpu.memory_space<vmem>>, vector<8x64xf32>,
    } else {
    }
    %c0_i32_40 = arith.constant 0 : i32
    %94 = arith.cmpi eq, %arg1, %c0_i32_40 : i32
    %95 = arith.extui %94 : i1 to i32
    %c0_i32_41 = arith.constant 0 : i32
    %96 = arith.cmpi ne, %95, %c0_i32_41 : i32
    scf.if %96 {
      %c0_42 = arith.constant 0 : index
      %c0_43 = arith.constant 0 : index
      %97 = vector.load %arg9[%c0_42, %c0_43] : memref<8x64xf32, #tpu.memory_space<vmem>>, vector<8x64xf32>
      %c0_44 = arith.constant 0 : index
      %c0_45 = arith.constant 0 : index
      %c0_46 = arith.constant 0 : index
      %98 = vector.load %arg7[%c0_44, %c0_45, %c0_46] : memref<1x8x64xf32, #tpu.memory_space<vmem>>, vector<1x8x64xf32>
      %99 = vector.shape_cast %98 : vector<1x8x64xf32> to vector<8x64xf32>
      %100 = vector.shape_cast %97 : vector<8x64xf32> to vector<1x8x64xf32>
      tpu.vector_store %arg7[%c0_44, %c0_45, %c0_46], %100 {strides = array<i32>} : memref<1x8x64xf32, #tpu.memory_space<vmem>>, vector<1x8x64xf32>,
    } else {
    }
    return
  }
  func.func @transform_0(%arg0: i32, %arg1: i32) -> (i32, i32, i32) {
    %c0_i32 = arith.constant 0 : i32
    %c0_i32_0 = arith.constant 0 : i32
    %c0_i32_1 = arith.constant 0 : i32
    return %arg0, %c0_i32, %c0_i32_0 : i32, i32, i32
  }
  func.func @transform_1(%arg0: i32, %arg1: i32) -> (i32, i32, i32) {
    %c0_i32 = arith.constant 0 : i32
    %c0_i32_0 = arith.constant 0 : i32
    return %arg0, %arg1, %c0_i32 : i32, i32, i32
  }
  func.func @transform_2(%arg0: i32, %arg1: i32) -> (i32, i32) {
    %c0_i32 = arith.constant 0 : i32
    %c0_i32_0 = arith.constant 0 : i32
    %c0_i32_1 = arith.constant 0 : i32
    return %c0_i32, %c0_i32_0 : i32, i32
  }
  func.func @transform_3(%arg0: i32, %arg1: i32) -> (i32, i32) {
    %c0_i32 = arith.constant 0 : i32
    %c0_i32_0 = arith.constant 0 : i32
    %c0_i32_1 = arith.constant 0 : i32
    return %c0_i32, %c0_i32_0 : i32, i32
  }
  func.func @transform_4(%arg0: i32, %arg1: i32) -> (i32, i32) {
    %c0_i32 = arith.constant 0 : i32
    %c0_i32_0 = arith.constant 0 : i32
    %c0_i32_1 = arith.constant 0 : i32
    return %c0_i32, %c0_i32_0 : i32, i32
  }
  func.func @transform_5(%arg0: i32, %arg1: i32) -> (i32, i32, i32) {
    %c0_i32 = arith.constant 0 : i32
    %c0_i32_0 = arith.constant 0 : i32
    %c0_i32_1 = arith.constant 0 : i32
    return %arg0, %c0_i32, %c0_i32_0 : i32, i32, i32
  }
}

module attributes {stable_mosaic.version = 11 : i64} {
  func.func @_pdist_kernel(%arg0: i32, %arg1: i32, %arg2: memref<1x8x64xf32, #tpu.memory_space<vmem>>, %arg3: memref<1x8x64xf32, #tpu.memory_space<vmem>>, %arg4: memref<1x8x8xf32, #tpu.memory_space<vmem>>) attributes {dimension_semantics = [#tpu.dimension_semantics<parallel>, #tpu.dimension_semantics<parallel>], iteration_bounds = array<i64: 2, 1>, scalar_prefetch = 0 : i64, scratch_operands = 0 : i64, tpu.core_type = #tpu.core_type<tc>, window_params = [{transform_indices = @transform_0, window_bounds = array<i64: 1, 8, 64>}, {transform_indices = @transform_1, window_bounds = array<i64: 1, 8, 64>}, {transform_indices = @transform_2, window_bounds = array<i64: 1, 8, 8>}]} {
    %c0 = arith.constant 0 : index
    %c0_0 = arith.constant 0 : index
    %c0_1 = arith.constant 0 : index
    %0 = vector.load %arg2[%c0, %c0_0, %c0_1] : memref<1x8x64xf32, #tpu.memory_space<vmem>>, vector<1x8x64xf32>
    %1 = vector.shape_cast %0 : vector<1x8x64xf32> to vector<8x64xf32>
    %c0_2 = arith.constant 0 : index
    %c0_3 = arith.constant 0 : index
    %c0_4 = arith.constant 0 : index
    %2 = vector.load %arg3[%c0_2, %c0_3, %c0_4] : memref<1x8x64xf32, #tpu.memory_space<vmem>>, vector<1x8x64xf32>
    %3 = vector.shape_cast %2 : vector<1x8x64xf32> to vector<8x64xf32>
    %cst = arith.constant dense<0.000000e+00> : vector<8x8xf32>
    %4 = tpu.matmul %1, %3, %cst {dimension_numbers = #tpu.dot_dimension_numbers<[1], [1], [0], [0], [0, 0, 1, 0], [], []>} : vector<8x64xf32>, vector<8x64xf32>, vector<8x8xf32> -> vector<8x8xf32>
    %5 = arith.mulf %1, %1 : vector<8x64xf32>
    %cst_5 = arith.constant dense<0.000000e+00> : vector<8xf32>
    %6 = vector.multi_reduction <add>, %5, %cst_5 [1] : vector<8x64xf32> to vector<8xf32>
    %7 = vector.shape_cast %6 : vector<8xf32> to vector<8x1xf32>
    %8 = arith.mulf %3, %3 : vector<8x64xf32>
    %cst_6 = arith.constant dense<0.000000e+00> : vector<8xf32>
    %9 = vector.multi_reduction <add>, %8, %cst_6 [1] : vector<8x64xf32> to vector<8xf32>
    %10 = vector.shape_cast %9 : vector<8xf32> to vector<8x1xf32>
    %cst_7 = arith.constant 2.000000e+00 : f32
    %11 = vector.broadcast %cst_7 : f32 to vector<8x8xf32>
    %12 = arith.mulf %11, %4 : vector<8x8xf32>
    %13 = vector.broadcast %7 : vector<8x1xf32> to vector<8x8xf32>
    %14 = arith.subf %12, %13 : vector<8x8xf32>
    %15 = tpu.transpose %10, [1, 0] : vector<8x1xf32> -> vector<1x8xf32>
    %16 = vector.broadcast %15 : vector<1x8xf32> to vector<8x8xf32>
    %17 = arith.subf %14, %16 : vector<8x8xf32>
    %c0_8 = arith.constant 0 : index
    %c0_9 = arith.constant 0 : index
    %c0_10 = arith.constant 0 : index
    %18 = vector.load %arg4[%c0_8, %c0_9, %c0_10] : memref<1x8x8xf32, #tpu.memory_space<vmem>>, vector<1x8x8xf32>
    %19 = vector.shape_cast %18 : vector<1x8x8xf32> to vector<8x8xf32>
    %20 = vector.shape_cast %17 : vector<8x8xf32> to vector<1x8x8xf32>
    tpu.vector_store %arg4[%c0_8, %c0_9, %c0_10], %20 {strides = array<i32>} : memref<1x8x8xf32, #tpu.memory_space<vmem>>, vector<1x8x8xf32>,
    return
  }
  func.func @transform_0(%arg0: i32, %arg1: i32) -> (i32, i32, i32) {
    %c0_i32 = arith.constant 0 : i32
    %c0_i32_0 = arith.constant 0 : i32
    return %arg0, %arg1, %c0_i32 : i32, i32, i32
  }
  func.func @transform_1(%arg0: i32, %arg1: i32) -> (i32, i32, i32) {
    %c0_i32 = arith.constant 0 : i32
    %c0_i32_0 = arith.constant 0 : i32
    %c0_i32_1 = arith.constant 0 : i32
    return %arg0, %c0_i32, %c0_i32_0 : i32, i32, i32
  }
  func.func @transform_2(%arg0: i32, %arg1: i32) -> (i32, i32, i32) {
    %c0_i32 = arith.constant 0 : i32
    %c0_i32_0 = arith.constant 0 : i32
    return %arg0, %arg1, %c0_i32 : i32, i32, i32
  }
}

module attributes {stable_mosaic.version = 11 : i64} {
  func.func @_edge_block_kernel(%arg0: i32, %arg1: i32, %arg2: memref<1x8x64xf32, #tpu.memory_space<vmem>>, %arg3: memref<1x8x8xi32, #tpu.memory_space<vmem>>, %arg4: memref<64x64xbf16, #tpu.memory_space<vmem>>, %arg5: memref<1x64xf32, #tpu.memory_space<vmem>>, %arg6: memref<1x64xf32, #tpu.memory_space<vmem>>, %arg7: memref<1x8x64xf32, #tpu.memory_space<vmem>>, %arg8: memref<8x64xbf16, #tpu.memory_space<vmem>>, %arg9: memref<8x64xf32, #tpu.memory_space<vmem>>) attributes {dimension_semantics = [#tpu.dimension_semantics<parallel>, #tpu.dimension_semantics<arbitrary>], iteration_bounds = array<i64: 2, 1>, scalar_prefetch = 0 : i64, scratch_operands = 2 : i64, tpu.core_type = #tpu.core_type<tc>, window_params = [{transform_indices = @transform_0, window_bounds = array<i64: 1, 8, 64>}, {transform_indices = @transform_1, window_bounds = array<i64: 1, 8, 8>}, {pipeline_mode = #tpu.pipeline_mode<synchronous>, transform_indices = @transform_2, window_bounds = array<i64: 64, 64>}, {pipeline_mode = #tpu.pipeline_mode<synchronous>, transform_indices = @transform_3, window_bounds = array<i64: 1, 64>}, {pipeline_mode = #tpu.pipeline_mode<synchronous>, transform_indices = @transform_4, window_bounds = array<i64: 1, 64>}, {transform_indices = @transform_5, window_bounds = array<i64: 1, 8, 64>}]} {
    %c0_i32 = arith.constant 0 : i32
    %0 = arith.cmpi eq, %arg1, %c0_i32 : i32
    %1 = arith.extui %0 : i1 to i32
    %c0_i32_0 = arith.constant 0 : i32
    %2 = arith.cmpi ne, %1, %c0_i32_0 : i32
    scf.if %2 {
      %c0_42 = arith.constant 0 : index
      %c0_43 = arith.constant 0 : index
      %c0_44 = arith.constant 0 : index
      %97 = vector.load %arg2[%c0_42, %c0_43, %c0_44] : memref<1x8x64xf32, #tpu.memory_space<vmem>>, vector<1x8x64xf32>
      %98 = vector.shape_cast %97 : vector<1x8x64xf32> to vector<8x64xf32>
      %99 = arith.truncf %98 : vector<8x64xf32> to vector<8x64xbf16>
      %c0_45 = arith.constant 0 : index
      %c0_46 = arith.constant 0 : index
      %100 = vector.load %arg4[%c0_45, %c0_46] : memref<64x64xbf16, #tpu.memory_space<vmem>>, vector<64x64xbf16>
      %cst_47 = arith.constant dense<0.000000e+00> : vector<8x64xf32>
      %101 = tpu.matmul %99, %100, %cst_47 {dimension_numbers = #tpu.dot_dimension_numbers<[1], [0], [0], [1], [0, 0, 1, 1], [], []>} : vector<8x64xbf16>, vector<64x64xbf16>, vector<8x64xf32> -> vector<8x64xf32>
      %c0_48 = arith.constant 0 : index
      %c0_49 = arith.constant 0 : index
      %102 = vector.load %arg5[%c0_48, %c0_49] : memref<1x64xf32, #tpu.memory_space<vmem>>, vector<1x64xf32>
      %103 = vector.broadcast %102 : vector<1x64xf32> to vector<8x64xf32>
      %104 = arith.mulf %101, %103 : vector<8x64xf32>
      %c0_50 = arith.constant 0 : index
      %c0_51 = arith.constant 0 : index
      %105 = vector.load %arg6[%c0_50, %c0_51] : memref<1x64xf32, #tpu.memory_space<vmem>>, vector<1x64xf32>
      %106 = vector.broadcast %105 : vector<1x64xf32> to vector<8x64xf32>
      %107 = arith.addf %104, %106 : vector<8x64xf32>
      %cst_52 = arith.constant 0.000000e+00 : f32
      %108 = vector.broadcast %cst_52 : f32 to vector<8x64xf32>
      %109 = arith.maximumf %107, %108 : vector<8x64xf32>
      %110 = arith.truncf %109 : vector<8x64xf32> to vector<8x64xbf16>
      %c0_53 = arith.constant 0 : index
      %c0_54 = arith.constant 0 : index
      %111 = vector.load %arg8[%c0_53, %c0_54] : memref<8x64xbf16, #tpu.memory_space<vmem>>, vector<8x64xbf16>
      tpu.vector_store %arg8[%c0_53, %c0_54], %110 {strides = array<i32>} : memref<8x64xbf16, #tpu.memory_space<vmem>>, vector<8x64xbf16>,
    } else {
    }
    %c0 = arith.constant 0 : index
    %c0_1 = arith.constant 0 : index
    %c0_2 = arith.constant 0 : index
    %3 = vector.load %arg3[%c0, %c0_1, %c0_2] : memref<1x8x8xi32, #tpu.memory_space<vmem>>, vector<1x8x8xi32>
    %4 = vector.shape_cast %3 : vector<1x8x8xi32> to vector<8x8xi32>
    %c0_3 = arith.constant 0 : index
    %c0_4 = arith.constant 0 : index
    %5 = vector.load %arg8[%c0_3, %c0_4] : memref<8x64xbf16, #tpu.memory_space<vmem>>, vector<8x64xbf16>
    %6 = tpu.iota {dimensions = array<i32: 1>} : vector<8x8xi32>
    %7 = vector.extract_strided_slice %4 {offsets = [0, 0], sizes = [8, 1], strides = [1, 1]} : vector<8x8xi32> to vector<8x1xi32>
    %8 = vector.broadcast %7 : vector<8x1xi32> to vector<8x8xi32>
    %9 = arith.cmpi eq, %6, %8 : vector<8x8xi32>
    %cst = arith.constant 1.000000e+00 : f32
    %cst_5 = arith.constant 0.000000e+00 : f32
    %10 = vector.broadcast %cst : f32 to vector<8x8xf32>
    %11 = vector.broadcast %cst_5 : f32 to vector<8x8xf32>
    %12 = arith.select %9, %10, %11 : vector<8x8xi1>, vector<8x8xf32>
    %13 = arith.truncf %12 : vector<8x8xf32> to vector<8x8xbf16>
    %cst_6 = arith.constant dense<0.000000e+00> : vector<8x64xf32>
    %14 = tpu.matmul %13, %5, %cst_6 {dimension_numbers = #tpu.dot_dimension_numbers<[1], [0], [0], [1], [0, 0, 1, 1], [], []>} : vector<8x8xbf16>, vector<8x64xbf16>, vector<8x64xf32> -> vector<8x64xf32>
    %cst_7 = arith.constant dense<0xFF800000> : vector<64xf32>
    %15 = vector.multi_reduction <maximumf>, %14, %cst_7 [0] : vector<8x64xf32> to vector<64xf32>
    %16 = vector.shape_cast %15 : vector<64xf32> to vector<1x64xf32>
    %17 = vector.extract_strided_slice %4 {offsets = [0, 1], sizes = [8, 1], strides = [1, 1]} : vector<8x8xi32> to vector<8x1xi32>
    %18 = vector.broadcast %17 : vector<8x1xi32> to vector<8x8xi32>
    %19 = arith.cmpi eq, %6, %18 : vector<8x8xi32>
    %cst_8 = arith.constant 1.000000e+00 : f32
    %cst_9 = arith.constant 0.000000e+00 : f32
    %20 = vector.broadcast %cst_8 : f32 to vector<8x8xf32>
    %21 = vector.broadcast %cst_9 : f32 to vector<8x8xf32>
    %22 = arith.select %19, %20, %21 : vector<8x8xi1>, vector<8x8xf32>
    %23 = arith.truncf %22 : vector<8x8xf32> to vector<8x8xbf16>
    %cst_10 = arith.constant dense<0.000000e+00> : vector<8x64xf32>
    %24 = tpu.matmul %23, %5, %cst_10 {dimension_numbers = #tpu.dot_dimension_numbers<[1], [0], [0], [1], [0, 0, 1, 1], [], []>} : vector<8x8xbf16>, vector<8x64xbf16>, vector<8x64xf32> -> vector<8x64xf32>
    %cst_11 = arith.constant dense<0xFF800000> : vector<64xf32>
    %25 = vector.multi_reduction <maximumf>, %24, %cst_11 [0] : vector<8x64xf32> to vector<64xf32>
    %26 = vector.shape_cast %25 : vector<64xf32> to vector<1x64xf32>
    %27 = vector.extract_strided_slice %4 {offsets = [0, 2], sizes = [8, 1], strides = [1, 1]} : vector<8x8xi32> to vector<8x1xi32>
    %28 = vector.broadcast %27 : vector<8x1xi32> to vector<8x8xi32>
    %29 = arith.cmpi eq, %6, %28 : vector<8x8xi32>
    %cst_12 = arith.constant 1.000000e+00 : f32
    %cst_13 = arith.constant 0.000000e+00 : f32
    %30 = vector.broadcast %cst_12 : f32 to vector<8x8xf32>
    %31 = vector.broadcast %cst_13 : f32 to vector<8x8xf32>
    %32 = arith.select %29, %30, %31 : vector<8x8xi1>, vector<8x8xf32>
    %33 = arith.truncf %32 : vector<8x8xf32> to vector<8x8xbf16>
    %cst_14 = arith.constant dense<0.000000e+00> : vector<8x64xf32>
    %34 = tpu.matmul %33, %5, %cst_14 {dimension_numbers = #tpu.dot_dimension_numbers<[1], [0], [0], [1], [0, 0, 1, 1], [], []>} : vector<8x8xbf16>, vector<8x64xbf16>, vector<8x64xf32> -> vector<8x64xf32>
    %cst_15 = arith.constant dense<0xFF800000> : vector<64xf32>
    %35 = vector.multi_reduction <maximumf>, %34, %cst_15 [0] : vector<8x64xf32> to vector<64xf32>
    %36 = vector.shape_cast %35 : vector<64xf32> to vector<1x64xf32>
    %37 = vector.extract_strided_slice %4 {offsets = [0, 3], sizes = [8, 1], strides = [1, 1]} : vector<8x8xi32> to vector<8x1xi32>
    %38 = vector.broadcast %37 : vector<8x1xi32> to vector<8x8xi32>
    %39 = arith.cmpi eq, %6, %38 : vector<8x8xi32>
    %cst_16 = arith.constant 1.000000e+00 : f32
    %cst_17 = arith.constant 0.000000e+00 : f32
    %40 = vector.broadcast %cst_16 : f32 to vector<8x8xf32>
    %41 = vector.broadcast %cst_17 : f32 to vector<8x8xf32>
    %42 = arith.select %39, %40, %41 : vector<8x8xi1>, vector<8x8xf32>
    %43 = arith.truncf %42 : vector<8x8xf32> to vector<8x8xbf16>
    %cst_18 = arith.constant dense<0.000000e+00> : vector<8x64xf32>
    %44 = tpu.matmul %43, %5, %cst_18 {dimension_numbers = #tpu.dot_dimension_numbers<[1], [0], [0], [1], [0, 0, 1, 1], [], []>} : vector<8x8xbf16>, vector<8x64xbf16>, vector<8x64xf32> -> vector<8x64xf32>
    %cst_19 = arith.constant dense<0xFF800000> : vector<64xf32>
    %45 = vector.multi_reduction <maximumf>, %44, %cst_19 [0] : vector<8x64xf32> to vector<64xf32>
    %46 = vector.shape_cast %45 : vector<64xf32> to vector<1x64xf32>
    %47 = vector.extract_strided_slice %4 {offsets = [0, 4], sizes = [8, 1], strides = [1, 1]} : vector<8x8xi32> to vector<8x1xi32>
    %48 = vector.broadcast %47 : vector<8x1xi32> to vector<8x8xi32>
    %49 = arith.cmpi eq, %6, %48 : vector<8x8xi32>
    %cst_20 = arith.constant 1.000000e+00 : f32
    %cst_21 = arith.constant 0.000000e+00 : f32
    %50 = vector.broadcast %cst_20 : f32 to vector<8x8xf32>
    %51 = vector.broadcast %cst_21 : f32 to vector<8x8xf32>
    %52 = arith.select %49, %50, %51 : vector<8x8xi1>, vector<8x8xf32>
    %53 = arith.truncf %52 : vector<8x8xf32> to vector<8x8xbf16>
    %cst_22 = arith.constant dense<0.000000e+00> : vector<8x64xf32>
    %54 = tpu.matmul %53, %5, %cst_22 {dimension_numbers = #tpu.dot_dimension_numbers<[1], [0], [0], [1], [0, 0, 1, 1], [], []>} : vector<8x8xbf16>, vector<8x64xbf16>, vector<8x64xf32> -> vector<8x64xf32>
    %cst_23 = arith.constant dense<0xFF800000> : vector<64xf32>
    %55 = vector.multi_reduction <maximumf>, %54, %cst_23 [0] : vector<8x64xf32> to vector<64xf32>
    %56 = vector.shape_cast %55 : vector<64xf32> to vector<1x64xf32>
    %57 = vector.extract_strided_slice %4 {offsets = [0, 5], sizes = [8, 1], strides = [1, 1]} : vector<8x8xi32> to vector<8x1xi32>
    %58 = vector.broadcast %57 : vector<8x1xi32> to vector<8x8xi32>
    %59 = arith.cmpi eq, %6, %58 : vector<8x8xi32>
    %cst_24 = arith.constant 1.000000e+00 : f32
    %cst_25 = arith.constant 0.000000e+00 : f32
    %60 = vector.broadcast %cst_24 : f32 to vector<8x8xf32>
    %61 = vector.broadcast %cst_25 : f32 to vector<8x8xf32>
    %62 = arith.select %59, %60, %61 : vector<8x8xi1>, vector<8x8xf32>
    %63 = arith.truncf %62 : vector<8x8xf32> to vector<8x8xbf16>
    %cst_26 = arith.constant dense<0.000000e+00> : vector<8x64xf32>
    %64 = tpu.matmul %63, %5, %cst_26 {dimension_numbers = #tpu.dot_dimension_numbers<[1], [0], [0], [1], [0, 0, 1, 1], [], []>} : vector<8x8xbf16>, vector<8x64xbf16>, vector<8x64xf32> -> vector<8x64xf32>
    %cst_27 = arith.constant dense<0xFF800000> : vector<64xf32>
    %65 = vector.multi_reduction <maximumf>, %64, %cst_27 [0] : vector<8x64xf32> to vector<64xf32>
    %66 = vector.shape_cast %65 : vector<64xf32> to vector<1x64xf32>
    %67 = vector.extract_strided_slice %4 {offsets = [0, 6], sizes = [8, 1], strides = [1, 1]} : vector<8x8xi32> to vector<8x1xi32>
    %68 = vector.broadcast %67 : vector<8x1xi32> to vector<8x8xi32>
    %69 = arith.cmpi eq, %6, %68 : vector<8x8xi32>
    %cst_28 = arith.constant 1.000000e+00 : f32
    %cst_29 = arith.constant 0.000000e+00 : f32
    %70 = vector.broadcast %cst_28 : f32 to vector<8x8xf32>
    %71 = vector.broadcast %cst_29 : f32 to vector<8x8xf32>
    %72 = arith.select %69, %70, %71 : vector<8x8xi1>, vector<8x8xf32>
    %73 = arith.truncf %72 : vector<8x8xf32> to vector<8x8xbf16>
    %cst_30 = arith.constant dense<0.000000e+00> : vector<8x64xf32>
    %74 = tpu.matmul %73, %5, %cst_30 {dimension_numbers = #tpu.dot_dimension_numbers<[1], [0], [0], [1], [0, 0, 1, 1], [], []>} : vector<8x8xbf16>, vector<8x64xbf16>, vector<8x64xf32> -> vector<8x64xf32>
    %cst_31 = arith.constant dense<0xFF800000> : vector<64xf32>
    %75 = vector.multi_reduction <maximumf>, %74, %cst_31 [0] : vector<8x64xf32> to vector<64xf32>
    %76 = vector.shape_cast %75 : vector<64xf32> to vector<1x64xf32>
    %77 = vector.extract_strided_slice %4 {offsets = [0, 7], sizes = [8, 1], strides = [1, 1]} : vector<8x8xi32> to vector<8x1xi32>
    %78 = vector.broadcast %77 : vector<8x1xi32> to vector<8x8xi32>
    %79 = arith.cmpi eq, %6, %78 : vector<8x8xi32>
    %cst_32 = arith.constant 1.000000e+00 : f32
    %cst_33 = arith.constant 0.000000e+00 : f32
    %80 = vector.broadcast %cst_32 : f32 to vector<8x8xf32>
    %81 = vector.broadcast %cst_33 : f32 to vector<8x8xf32>
    %82 = arith.select %79, %80, %81 : vector<8x8xi1>, vector<8x8xf32>
    %83 = arith.truncf %82 : vector<8x8xf32> to vector<8x8xbf16>
    %cst_34 = arith.constant dense<0.000000e+00> : vector<8x64xf32>
    %84 = tpu.matmul %83, %5, %cst_34 {dimension_numbers = #tpu.dot_dimension_numbers<[1], [0], [0], [1], [0, 0, 1, 1], [], []>} : vector<8x8xbf16>, vector<8x64xbf16>, vector<8x64xf32> -> vector<8x64xf32>
    %cst_35 = arith.constant dense<0xFF800000> : vector<64xf32>
    %85 = vector.multi_reduction <maximumf>, %84, %cst_35 [0] : vector<8x64xf32> to vector<64xf32>
    %86 = vector.shape_cast %85 : vector<64xf32> to vector<1x64xf32>
    %87 = tpu.concatenate %16, %26, %36, %46, %56, %66, %76, %86 in 0 : vector<1x64xf32>, vector<1x64xf32>, vector<1x64xf32>, vector<1x64xf32>, vector<1x64xf32>, vector<1x64xf32>, vector<1x64xf32>, vector<1x64xf32> -> vector<8x64xf32>
    %c0_i32_36 = arith.constant 0 : i32
    %88 = arith.cmpi eq, %arg1, %c0_i32_36 : i32
    %89 = arith.extui %88 : i1 to i32
    %c0_i32_37 = arith.constant 0 : i32
    %90 = arith.cmpi ne, %89, %c0_i32_37 : i32
    scf.if %90 {
      %c0_42 = arith.constant 0 : index
      %c0_43 = arith.constant 0 : index
      %97 = vector.load %arg9[%c0_42, %c0_43] : memref<8x64xf32, #tpu.memory_space<vmem>>, vector<8x64xf32>
      tpu.vector_store %arg9[%c0_42, %c0_43], %87 {strides = array<i32>} : memref<8x64xf32, #tpu.memory_space<vmem>>, vector<8x64xf32>,
    } else {
    }
    %c0_i32_38 = arith.constant 0 : i32
    %91 = arith.cmpi sgt, %arg1, %c0_i32_38 : i32
    %92 = arith.extui %91 : i1 to i32
    %c0_i32_39 = arith.constant 0 : i32
    %93 = arith.cmpi ne, %92, %c0_i32_39 : i32
    scf.if %93 {
      %c0_42 = arith.constant 0 : index
      %c0_43 = arith.constant 0 : index
      %97 = vector.load %arg9[%c0_42, %c0_43] : memref<8x64xf32, #tpu.memory_space<vmem>>, vector<8x64xf32>
      %98 = arith.maximumf %97, %87 : vector<8x64xf32>
      %c0_44 = arith.constant 0 : index
      %c0_45 = arith.constant 0 : index
      %99 = vector.load %arg9[%c0_44, %c0_45] : memref<8x64xf32, #tpu.memory_space<vmem>>, vector<8x64xf32>
      tpu.vector_store %arg9[%c0_44, %c0_45], %98 {strides = array<i32>} : memref<8x64xf32, #tpu.memory_space<vmem>>, vector<8x64xf32>,
    } else {
    }
    %c0_i32_40 = arith.constant 0 : i32
    %94 = arith.cmpi eq, %arg1, %c0_i32_40 : i32
    %95 = arith.extui %94 : i1 to i32
    %c0_i32_41 = arith.constant 0 : i32
    %96 = arith.cmpi ne, %95, %c0_i32_41 : i32
    scf.if %96 {
      %c0_42 = arith.constant 0 : index
      %c0_43 = arith.constant 0 : index
      %97 = vector.load %arg9[%c0_42, %c0_43] : memref<8x64xf32, #tpu.memory_space<vmem>>, vector<8x64xf32>
      %c0_44 = arith.constant 0 : index
      %c0_45 = arith.constant 0 : index
      %c0_46 = arith.constant 0 : index
      %98 = vector.load %arg7[%c0_44, %c0_45, %c0_46] : memref<1x8x64xf32, #tpu.memory_space<vmem>>, vector<1x8x64xf32>
      %99 = vector.shape_cast %98 : vector<1x8x64xf32> to vector<8x64xf32>
      %100 = vector.shape_cast %97 : vector<8x64xf32> to vector<1x8x64xf32>
      tpu.vector_store %arg7[%c0_44, %c0_45, %c0_46], %100 {strides = array<i32>} : memref<1x8x64xf32, #tpu.memory_space<vmem>>, vector<1x8x64xf32>,
    } else {
    }
    return
  }
  func.func @transform_0(%arg0: i32, %arg1: i32) -> (i32, i32, i32) {
    %c0_i32 = arith.constant 0 : i32
    %c0_i32_0 = arith.constant 0 : i32
    %c0_i32_1 = arith.constant 0 : i32
    return %arg0, %c0_i32, %c0_i32_0 : i32, i32, i32
  }
  func.func @transform_1(%arg0: i32, %arg1: i32) -> (i32, i32, i32) {
    %c0_i32 = arith.constant 0 : i32
    %c0_i32_0 = arith.constant 0 : i32
    return %arg0, %arg1, %c0_i32 : i32, i32, i32
  }
  func.func @transform_2(%arg0: i32, %arg1: i32) -> (i32, i32) {
    %c0_i32 = arith.constant 0 : i32
    %c0_i32_0 = arith.constant 0 : i32
    %c0_i32_1 = arith.constant 0 : i32
    return %c0_i32, %c0_i32_0 : i32, i32
  }
  func.func @transform_3(%arg0: i32, %arg1: i32) -> (i32, i32) {
    %c0_i32 = arith.constant 0 : i32
    %c0_i32_0 = arith.constant 0 : i32
    %c0_i32_1 = arith.constant 0 : i32
    return %c0_i32, %c0_i32_0 : i32, i32
  }
  func.func @transform_4(%arg0: i32, %arg1: i32) -> (i32, i32) {
    %c0_i32 = arith.constant 0 : i32
    %c0_i32_0 = arith.constant 0 : i32
    %c0_i32_1 = arith.constant 0 : i32
    return %c0_i32, %c0_i32_0 : i32, i32
  }
  func.func @transform_5(%arg0: i32, %arg1: i32) -> (i32, i32, i32) {
    %c0_i32 = arith.constant 0 : i32
    %c0_i32_0 = arith.constant 0 : i32
    %c0_i32_1 = arith.constant 0 : i32
    return %arg0, %c0_i32, %c0_i32_0 : i32, i32, i32
  }
}

module attributes {stable_mosaic.version = 11 : i64} {
  func.func @_dense_bn_relu_kernel(%arg0: i32, %arg1: memref<16x64xf32, #tpu.memory_space<vmem>>, %arg2: memref<64x1024xbf16, #tpu.memory_space<vmem>>, %arg3: memref<1x1024xf32, #tpu.memory_space<vmem>>, %arg4: memref<1x1024xf32, #tpu.memory_space<vmem>>, %arg5: memref<16x1024xf32, #tpu.memory_space<vmem>>) attributes {dimension_semantics = [#tpu.dimension_semantics<parallel>], iteration_bounds = array<i64: 1>, scalar_prefetch = 0 : i64, scratch_operands = 0 : i64, tpu.core_type = #tpu.core_type<tc>, window_params = [{transform_indices = @transform_0, window_bounds = array<i64: 16, 64>}, {pipeline_mode = #tpu.pipeline_mode<synchronous>, transform_indices = @transform_1, window_bounds = array<i64: 64, 1024>}, {pipeline_mode = #tpu.pipeline_mode<synchronous>, transform_indices = @transform_2, window_bounds = array<i64: 1, 1024>}, {pipeline_mode = #tpu.pipeline_mode<synchronous>, transform_indices = @transform_3, window_bounds = array<i64: 1, 1024>}, {transform_indices = @transform_4, window_bounds = array<i64: 16, 1024>}]} {
    %c0 = arith.constant 0 : index
    %c0_0 = arith.constant 0 : index
    %0 = vector.load %arg1[%c0, %c0_0] : memref<16x64xf32, #tpu.memory_space<vmem>>, vector<16x64xf32>
    %1 = arith.truncf %0 : vector<16x64xf32> to vector<16x64xbf16>
    %c0_1 = arith.constant 0 : index
    %c0_2 = arith.constant 0 : index
    %2 = vector.load %arg2[%c0_1, %c0_2] : memref<64x1024xbf16, #tpu.memory_space<vmem>>, vector<64x1024xbf16>
    %cst = arith.constant dense<0.000000e+00> : vector<16x1024xf32>
    %3 = tpu.matmul %1, %2, %cst {dimension_numbers = #tpu.dot_dimension_numbers<[1], [0], [0], [1], [0, 0, 1, 1], [], []>} : vector<16x64xbf16>, vector<64x1024xbf16>, vector<16x1024xf32> -> vector<16x1024xf32>
    %c0_3 = arith.constant 0 : index
    %c0_4 = arith.constant 0 : index
    %4 = vector.load %arg3[%c0_3, %c0_4] : memref<1x1024xf32, #tpu.memory_space<vmem>>, vector<1x1024xf32>
    %5 = vector.broadcast %4 : vector<1x1024xf32> to vector<16x1024xf32>
    %6 = arith.mulf %3, %5 : vector<16x1024xf32>
    %c0_5 = arith.constant 0 : index
    %c0_6 = arith.constant 0 : index
    %7 = vector.load %arg4[%c0_5, %c0_6] : memref<1x1024xf32, #tpu.memory_space<vmem>>, vector<1x1024xf32>
    %8 = vector.broadcast %7 : vector<1x1024xf32> to vector<16x1024xf32>
    %9 = arith.addf %6, %8 : vector<16x1024xf32>
    %cst_7 = arith.constant 0.000000e+00 : f32
    %10 = vector.broadcast %cst_7 : f32 to vector<16x1024xf32>
    %11 = arith.maximumf %9, %10 : vector<16x1024xf32>
    %c0_8 = arith.constant 0 : index
    %c0_9 = arith.constant 0 : index
    %12 = vector.load %arg5[%c0_8, %c0_9] : memref<16x1024xf32, #tpu.memory_space<vmem>>, vector<16x1024xf32>
    tpu.vector_store %arg5[%c0_8, %c0_9], %11 {strides = array<i32>} : memref<16x1024xf32, #tpu.memory_space<vmem>>, vector<16x1024xf32>,
    return
  }
  func.func @transform_0(%arg0: i32) -> (i32, i32) {
    %c0_i32 = arith.constant 0 : i32
    %c0_i32_0 = arith.constant 0 : i32
    return %arg0, %c0_i32 : i32, i32
  }
  func.func @transform_1(%arg0: i32) -> (i32, i32) {
    %c0_i32 = arith.constant 0 : i32
    %c0_i32_0 = arith.constant 0 : i32
    %c0_i32_1 = arith.constant 0 : i32
    return %c0_i32, %c0_i32_0 : i32, i32
  }
  func.func @transform_2(%arg0: i32) -> (i32, i32) {
    %c0_i32 = arith.constant 0 : i32
    %c0_i32_0 = arith.constant 0 : i32
    %c0_i32_1 = arith.constant 0 : i32
    return %c0_i32, %c0_i32_0 : i32, i32
  }
  func.func @transform_3(%arg0: i32) -> (i32, i32) {
    %c0_i32 = arith.constant 0 : i32
    %c0_i32_0 = arith.constant 0 : i32
    %c0_i32_1 = arith.constant 0 : i32
    return %c0_i32, %c0_i32_0 : i32, i32
  }
  func.func @transform_4(%arg0: i32) -> (i32, i32) {
    %c0_i32 = arith.constant 0 : i32
    %c0_i32_0 = arith.constant 0 : i32
    return %arg0, %c0_i32 : i32, i32
  }
}

module attributes {stable_mosaic.version = 11 : i64} {
  func.func @_rowmax_kernel(%arg0: i32, %arg1: memref<1x8x1024xf32, #tpu.memory_space<vmem>>, %arg2: memref<1x1x1024xf32, #tpu.memory_space<vmem>>) attributes {dimension_semantics = [#tpu.dimension_semantics<parallel>], iteration_bounds = array<i64: 2>, scalar_prefetch = 0 : i64, scratch_operands = 0 : i64, tpu.core_type = #tpu.core_type<tc>, window_params = [{transform_indices = @transform_0, window_bounds = array<i64: 1, 8, 1024>}, {transform_indices = @transform_1, window_bounds = array<i64: 1, 1, 1024>}]} {
    %c0 = arith.constant 0 : index
    %c0_0 = arith.constant 0 : index
    %c0_1 = arith.constant 0 : index
    %0 = vector.load %arg1[%c0, %c0_0, %c0_1] : memref<1x8x1024xf32, #tpu.memory_space<vmem>>, vector<1x8x1024xf32>
    %1 = vector.shape_cast %0 : vector<1x8x1024xf32> to vector<8x1024xf32>
    %cst = arith.constant dense<0xFF800000> : vector<1024xf32>
    %2 = vector.multi_reduction <maximumf>, %1, %cst [0] : vector<8x1024xf32> to vector<1024xf32>
    %3 = vector.shape_cast %2 : vector<1024xf32> to vector<1x1024xf32>
    %c0_2 = arith.constant 0 : index
    %c0_3 = arith.constant 0 : index
    %c0_4 = arith.constant 0 : index
    %4 = vector.load %arg2[%c0_2, %c0_3, %c0_4] : memref<1x1x1024xf32, #tpu.memory_space<vmem>>, vector<1x1x1024xf32>
    %5 = vector.shape_cast %4 : vector<1x1x1024xf32> to vector<1x1024xf32>
    %6 = vector.shape_cast %3 : vector<1x1024xf32> to vector<1x1x1024xf32>
    tpu.vector_store %arg2[%c0_2, %c0_3, %c0_4], %6 {strides = array<i32>} : memref<1x1x1024xf32, #tpu.memory_space<vmem>>, vector<1x1x1024xf32>,
    return
  }
  func.func @transform_0(%arg0: i32) -> (i32, i32, i32) {
    %c0_i32 = arith.constant 0 : i32
    %c0_i32_0 = arith.constant 0 : i32
    %c0_i32_1 = arith.constant 0 : i32
    return %arg0, %c0_i32, %c0_i32_0 : i32, i32, i32
  }
  func.func @transform_1(%arg0: i32) -> (i32, i32, i32) {
    %c0_i32 = arith.constant 0 : i32
    %c0_i32_0 = arith.constant 0 : i32
    %c0_i32_1 = arith.constant 0 : i32
    return %arg0, %c0_i32, %c0_i32_0 : i32, i32, i32
  }
}

module attributes {stable_mosaic.version = 11 : i64} {
  func.func @_head_kernel(%arg0: memref<2x1024xf32, #tpu.memory_space<vmem>>, %arg1: memref<1024x512xbf16, #tpu.memory_space<vmem>>, %arg2: memref<1x512xf32, #tpu.memory_space<vmem>>, %arg3: memref<1x512xf32, #tpu.memory_space<vmem>>, %arg4: memref<1x512xf32, #tpu.memory_space<vmem>>, %arg5: memref<512x128xbf16, #tpu.memory_space<vmem>>, %arg6: memref<1x128xf32, #tpu.memory_space<vmem>>, %arg7: memref<1x128xf32, #tpu.memory_space<vmem>>, %arg8: memref<1x128xf32, #tpu.memory_space<vmem>>, %arg9: memref<128x16xbf16, #tpu.memory_space<vmem>>, %arg10: memref<1x16xf32, #tpu.memory_space<vmem>>, %arg11: memref<2x16xf32, #tpu.memory_space<vmem>>) attributes {dimension_semantics = [], scalar_prefetch = 0 : i64, scratch_operands = 0 : i64, tpu.core_type = #tpu.core_type<tc>} {
    %c0 = arith.constant 0 : index
    %c0_0 = arith.constant 0 : index
    %0 = vector.load %arg0[%c0, %c0_0] : memref<2x1024xf32, #tpu.memory_space<vmem>>, vector<2x1024xf32>
    %1 = arith.truncf %0 : vector<2x1024xf32> to vector<2x1024xbf16>
    %c0_1 = arith.constant 0 : index
    %c0_2 = arith.constant 0 : index
    %2 = vector.load %arg1[%c0_1, %c0_2] : memref<1024x512xbf16, #tpu.memory_space<vmem>>, vector<1024x512xbf16>
    %cst = arith.constant dense<0.000000e+00> : vector<2x512xf32>
    %3 = tpu.matmul %1, %2, %cst {dimension_numbers = #tpu.dot_dimension_numbers<[1], [0], [0], [1], [0, 0, 1, 1], [], []>} : vector<2x1024xbf16>, vector<1024x512xbf16>, vector<2x512xf32> -> vector<2x512xf32>
    %c0_3 = arith.constant 0 : index
    %c0_4 = arith.constant 0 : index
    %4 = vector.load %arg2[%c0_3, %c0_4] : memref<1x512xf32, #tpu.memory_space<vmem>>, vector<1x512xf32>
    %5 = vector.broadcast %4 : vector<1x512xf32> to vector<2x512xf32>
    %6 = arith.addf %3, %5 : vector<2x512xf32>
    %c0_5 = arith.constant 0 : index
    %c0_6 = arith.constant 0 : index
    %7 = vector.load %arg3[%c0_5, %c0_6] : memref<1x512xf32, #tpu.memory_space<vmem>>, vector<1x512xf32>
    %8 = vector.broadcast %7 : vector<1x512xf32> to vector<2x512xf32>
    %9 = arith.mulf %6, %8 : vector<2x512xf32>
    %c0_7 = arith.constant 0 : index
    %c0_8 = arith.constant 0 : index
    %10 = vector.load %arg4[%c0_7, %c0_8] : memref<1x512xf32, #tpu.memory_space<vmem>>, vector<1x512xf32>
    %11 = vector.broadcast %10 : vector<1x512xf32> to vector<2x512xf32>
    %12 = arith.addf %9, %11 : vector<2x512xf32>
    %cst_9 = arith.constant 0.000000e+00 : f32
    %13 = vector.broadcast %cst_9 : f32 to vector<2x512xf32>
    %14 = arith.maximumf %12, %13 : vector<2x512xf32>
    %15 = arith.truncf %14 : vector<2x512xf32> to vector<2x512xbf16>
    %c0_10 = arith.constant 0 : index
    %c0_11 = arith.constant 0 : index
    %16 = vector.load %arg5[%c0_10, %c0_11] : memref<512x128xbf16, #tpu.memory_space<vmem>>, vector<512x128xbf16>
    %cst_12 = arith.constant dense<0.000000e+00> : vector<2x128xf32>
    %17 = tpu.matmul %15, %16, %cst_12 {dimension_numbers = #tpu.dot_dimension_numbers<[1], [0], [0], [1], [0, 0, 1, 1], [], []>} : vector<2x512xbf16>, vector<512x128xbf16>, vector<2x128xf32> -> vector<2x128xf32>
    %c0_13 = arith.constant 0 : index
    %c0_14 = arith.constant 0 : index
    %18 = vector.load %arg6[%c0_13, %c0_14] : memref<1x128xf32, #tpu.memory_space<vmem>>, vector<1x128xf32>
    %19 = vector.broadcast %18 : vector<1x128xf32> to vector<2x128xf32>
    %20 = arith.addf %17, %19 : vector<2x128xf32>
    %c0_15 = arith.constant 0 : index
    %c0_16 = arith.constant 0 : index
    %21 = vector.load %arg7[%c0_15, %c0_16] : memref<1x128xf32, #tpu.memory_space<vmem>>, vector<1x128xf32>
    %22 = vector.broadcast %21 : vector<1x128xf32> to vector<2x128xf32>
    %23 = arith.mulf %20, %22 : vector<2x128xf32>
    %c0_17 = arith.constant 0 : index
    %c0_18 = arith.constant 0 : index
    %24 = vector.load %arg8[%c0_17, %c0_18] : memref<1x128xf32, #tpu.memory_space<vmem>>, vector<1x128xf32>
    %25 = vector.broadcast %24 : vector<1x128xf32> to vector<2x128xf32>
    %26 = arith.addf %23, %25 : vector<2x128xf32>
    %cst_19 = arith.constant 0.000000e+00 : f32
    %27 = vector.broadcast %cst_19 : f32 to vector<2x128xf32>
    %28 = arith.maximumf %26, %27 : vector<2x128xf32>
    %29 = arith.truncf %28 : vector<2x128xf32> to vector<2x128xbf16>
    %c0_20 = arith.constant 0 : index
    %c0_21 = arith.constant 0 : index
    %30 = vector.load %arg9[%c0_20, %c0_21] : memref<128x16xbf16, #tpu.memory_space<vmem>>, vector<128x16xbf16>
    %cst_22 = arith.constant dense<0.000000e+00> : vector<2x16xf32>
    %31 = tpu.matmul %29, %30, %cst_22 {dimension_numbers = #tpu.dot_dimension_numbers<[1], [0], [0], [1], [0, 0, 1, 1], [], []>} : vector<2x128xbf16>, vector<128x16xbf16>, vector<2x16xf32> -> vector<2x16xf32>
    %c0_23 = arith.constant 0 : index
    %c0_24 = arith.constant 0 : index
    %32 = vector.load %arg10[%c0_23, %c0_24] : memref<1x16xf32, #tpu.memory_space<vmem>>, vector<1x16xf32>
    %33 = vector.broadcast %32 : vector<1x16xf32> to vector<2x16xf32>
    %34 = arith.addf %31, %33 : vector<2x16xf32>
    %cst_25 = arith.constant 0.000000e+00 : f32
    %35 = vector.broadcast %cst_25 : f32 to vector<2x16xf32>
    %36 = arith.maximumf %34, %35 : vector<2x16xf32>
    %c0_26 = arith.constant 0 : index
    %c0_27 = arith.constant 0 : index
    %37 = vector.load %arg11[%c0_26, %c0_27] : memref<2x16xf32, #tpu.memory_space<vmem>>, vector<2x16xf32>
    tpu.vector_store %arg11[%c0_26, %c0_27], %36 {strides = array<i32>} : memref<2x16xf32, #tpu.memory_space<vmem>>, vector<2x16xf32>,
    return
  }
}

</mosaic_0001>

<bundles_post_ra>
// kernel: dgcnn_cls_forward.11
= control target key start
LH: loop header
LB: loop body
LE: loop exit
PB: predicated region body
PF: predicated region fallthrough
CT: control target
= control target key end

     0   :  { %s556_s9 = smov 0   ;;  %s558_s10 = smov 0   ;;  %s605_s0 = inlined_call_operand.vmem [shape: f32[2,16,4], index: 0, kind: input, shape index: {}, may-alias: {0,1}]   ;;  %s606_s1 = inlined_call_operand.vmem [shape: f32[2,16,4], index: 1, kind: input, shape index: {}, may-alias: {0,1}]   ;;  %s607_s2 = inlined_call_operand.vmem [shape: f32[2,16,16], index: 2, kind: output, shape index: {}]  }
   0x1   :  { %s560_s11 = smov 0  }
   0x2 LB: > { %s24_s12 = sadd.s32 1, %s535_s10  ;;  %p459_p0 = scmp.ge.s32.totalorder %s539_s11, 1  ;;  %s539_s11 = sphi %s560_s11, %s12_s11   ;;  %s535_s10 = sphi %s558_s10, %s609_s10   ;;  %s531_s9 = sphi %s556_s9, %s608_s9  }
   0x3   : > { %p26_p1 = scmp.ge.s32.totalorder %s24_s12, 2  ;;  %p143_p2 = scmp.lt.s32.totalorder %s539_s11, 3 }
   0x5   : > { %s611_s12 = smov (%p26_p1, %s24_s12), 0  ;;  %p144_p3 = pnand %p459_p0, %p143_p2 }
   0x6   : > { %p179_p4 = scmp.lt.s32.totalorder (!%p144_p3), %s531_s9, 1  ;;  %vm207_vm0 = vcmask (!%p144_p3), 31744   ;;  %v347_v17 = vlaneseq (!%p144_p3)  ;;  %vm353_vm2 = vcmask (!%p144_p3), 130048  }
   0x7   : > { %147 = sbr.rel (%p144_p3) target bundleno = 297 (0x129), region = 28  ;;  %vm487_vm1 = vmpackc.low (!%p144_p3), %vm207_vm0, %vm207_vm0 }
   0x8   : > { %v348_v19 = vshrl.u32 (!%p144_p3), %v347_v17, 7 }
   0xa   : > { %v349_v23 = vsub.s32 (!%p144_p3), 0, %v348_v19 }
   0xe   : > { %s613_s9 = smov (!%p179_p4, %s531_s9), 1 }
   0xf   : > { %s574_s13 = sshll.u32 %s613_s9, 4 }
  0x10   : > { %s192_s16 = scalar_lea.vmem %s606_s1, %s574_s13  ;;  %s186_s19 = scalar_lea.vmem %s605_s0, %s574_s13 }
  0x11   : > { %v205_v0 = vld [vmem:[%s192_s16] sm:$0xff]  ;;  %v206_v1 = vld [vmem:[%s192_s16 + $0x8] sm:$0xff]  ;;  %s201_s22 = scalar_lea.vmem %s607_s2, %s574_s13 }
  0x12   : > { %v303_v2 = vmul.f32 %v205_v0, %v205_v0  ;;  %v304_v3 = vmul.f32 %v206_v1, %v206_v1  ;;  %v486_v4 = vpack.c.bf16 %v206_v1, %v205_v0  ;;  %v203_v5 = vld [vmem:[%s186_s19] sm:$0xff]  ;;  %v204_v6 = vld [vmem:[%s186_s19 + $0x8] sm:$0xff] }
  0x13   : > { %483 = vmatprep.mubr.msk.f32.mxu0 %vm207_vm0, %v203_v5  ;;  %v295_v7 = vmul.f32 %v203_v5, %v203_v5  ;;  %v296_v8 = vmul.f32 %v204_v6, %v204_v6 }
  0x14   : > { %v305_v9 = vsel %vm207_vm0, %v303_v2, 0.0  ;;  %488 = vmatprep.subr.msk.bf16.mxu0 %vm487_vm1, %v486_v4  ;;  %v308_v11 = vsel %vm207_vm0, %v304_v3, 0.0 }
  0x15   : > { %306 = vadd.xlane.f32.xlu0 %v305_v9  ;;  %491 = vmatpush3.bf16.xpose.msk.msra.mxu0 %vm487_vm1, %v486_v4  ;;  %v297_v10 = vsel %vm207_vm0, %v295_v7, 0.0  ;;  %v300_v12 = vsel %vm207_vm0, %v296_v8, 0.0 }
  0x16   : > { %298 = vadd.xlane.f32.xlu1 %v297_v10 }
  0x19   : > { %309 = vadd.xlane.f32.xlu0 %v308_v11 }
  0x1a   : > { %301 = vadd.xlane.f32.xlu1 %v300_v12 }
  0x1c   : > { %484 = vmatmul.mubr.msk.f32.vlgmr.msra.gmra.mrb[0].mxu0 %vm207_vm0, %v204_v6 }
  0xa2   : > { %v307_v13 = vpop.xlane.xlu0 %306 }
  0xa3   : > { %315 = vxpose.xlu0.b32.start [1/2] (short) (narrow) %v307_v13, 8  ;;  %v299_v18 = vpop.xlane.xlu1 %298 }
  0xa6   : > { %v310_v14 = vpop.xlane.xlu0 %309 }
  0xa7   : > { %316 = vxpose.xlu0.b32.end [2/2] (short) (narrow) %v310_v14, 8  ;;  %v302_v21 = vpop.xlane.xlu1 %301 }
  0xef   : > { %v485_v15 = vpop.f32.mrb[0].mxu0 }
  0xf0   : > { %v286_v16 = vpop.f32.mrb[1].mxu0  ;;  %v312_v20 = vmul.f32 2.0, %v485_v15 }
  0xf1   : > { %v311_v22 = vmul.f32 2.0, %v286_v16 }
  0xf2   : > { %v314_v24 = vsub.f32 %v312_v20, %v302_v21 }
  0xf3   : > { %v313_v26 = vsub.f32 %v311_v22, %v299_v18 }
 0x123   : > { %v331_v25 = vpop.trf.xlu0 }
 0x124   : > { %v350_v27 = vrot.slane %v331_v25, %v349_v23 }
 0x126   : > { %v351_v28 = vsub.f32 %v313_v26, %v350_v27  ;;  %v352_v29 = vsub.f32 %v314_v24, %v350_v27 }
 0x128   : > { %354 = vst.msk [vmem:[%s201_s22] sm:$0xff] %vm353_vm2, %v351_v28  ;;  %355 = vst.msk [vmem:[%s201_s22 + $0x8] sm:$0xff] %vm353_vm2, %v352_v29 }
 0x129 PF: > { %s12_s11 = sadd.s32 1, %s539_s11   ;;  %s608_s9 = smov %s535_s10 }
 0x12a   : > { %p9_p5 = scmp.ge.s32.totalorder %s12_s11, 4   ;;  %s609_s10 = smov %s611_s12 }
 0x12c   :  { %11 = sbr.rel (!%p9_p5) target bundleno = 2 (0x2), region = 61 }

// kernel: dgcnn_cls_forward.13
= control target key start
LH: loop header
LB: loop body
LE: loop exit
PB: predicated region body
PF: predicated region fallthrough
CT: control target
= control target key end

     0   :  { %s487_s9 = smov 0   ;;  %s489_s10 = smov 0   ;;  %s528_s0 = inlined_call_operand.vmem [shape: f32[2,8,64], index: 0, kind: input, shape index: {}, may-alias: {0,1}]   ;;  %s529_s1 = inlined_call_operand.vmem [shape: f32[2,8,64], index: 1, kind: input, shape index: {}, may-alias: {0,1}]   ;;  %s530_s2 = inlined_call_operand.vmem [shape: f32[2,8,8], index: 2, kind: output, shape index: {}]  }
   0x1   :  { %s491_s11 = smov 0  }
   0x2 LB: > { %s24_s12 = sadd.s32 1, %s464_s10  ;;  %p405_p0 = scmp.ge.s32.totalorder %s468_s11, 1  ;;  %s468_s11 = sphi %s491_s11, %s12_s11   ;;  %s464_s10 = sphi %s489_s10, %s532_s10   ;;  %s460_s9 = sphi %s487_s9, %s531_s9  }
   0x3   : > { %p26_p1 = scmp.ge.s32.totalorder %s24_s12, 2  ;;  %p139_p2 = scmp.lt.s32.totalorder %s468_s11, 3 }
   0x5   : > { %s534_s12 = smov (%p26_p1, %s24_s12), 0  ;;  %p140_p3 = pnand %p405_p0, %p139_p2 }
   0x6   : > { %p169_p4 = scmp.lt.s32.totalorder (!%p140_p3), %s460_s9, 1  ;;  %v470_v0 = vmov (!%p140_p3), 0.0   ;;  %vm471_vm0 = vmmov (!%p140_p3), 0   ;;  %vm189_vm1 = vcmask (!%p140_p3), 523264   ;;  %v308_v10 = vlaneseq (!%p140_p3) }
   0x7   : > { %143 = sbr.rel (%p140_p3) target bundleno = 297 (0x129), region = 28  ;;  %415 = vmatprep.subr.mxu0 (!%p140_p3), %v470_v0  ;;  %417 = vmatprep.mubr.msk.f32.mxu0 (!%p140_p3), %vm471_vm0, %v470_v0  ;;  %vm313_vm2 = vcmask (!%p140_p3), 64512  }
   0x8   : > { %v309_v11 = vshrl.u32 (!%p140_p3), %v308_v10, 7 }
   0xa   : > { %v310_v14 = vsub.s32 (!%p140_p3), 0, %v309_v11 }
   0xe   : > { %s536_s9 = smov (!%p169_p4, %s460_s9), 1 }
   0xf   : > { %s505_s13 = sshll.u32 %s536_s9, 3 }
  0x10   : > { %s179_s16 = scalar_lea.vmem %s529_s1, %s505_s13  ;;  %s175_s19 = scalar_lea.vmem %s528_s0, %s505_s13 }
  0x11   : > { %v188_v1 = vld [vmem:[%s179_s16] sm:$0xff]  ;;  %s186_s22 = scalar_lea.vmem %s530_s2, %s505_s13 }
  0x12   : > { %v270_v2 = vmul.f32 %v188_v1, %v188_v1  ;;  %416 = vmatpush3.xpose.msk.msra.mxu0 %vm189_vm1, %v188_v1  ;;  %v187_v3 = vld [vmem:[%s175_s19] sm:$0xff] }
  0x13   : > { %v266_v4 = vmul.f32 %v187_v3, %v187_v3 }
  0x14   : > { %v271_v5 = vsel %vm189_vm1, %v270_v2, 0.0 }
  0x15   : > { %272 = vadd.xlane.f32.xlu0 %v271_v5  ;;  %418 = vmatmul.mubr.msk.f32.vlgmr.msra.gmra.mrb[0].mxu0 %vm189_vm1, %v187_v3  ;;  %v267_v6 = vsel %vm189_vm1, %v266_v4, 0.0 }
  0x19   : > { %268 = vadd.xlane.f32.xlu0 %v267_v6 }
  0xa2   : > { %v273_v7 = vpop.xlane.xlu0 %272 }
  0xa3   : > { %276 = vxpose.xlu1.b32.start.end [1/1] (short) (narrow) %v273_v7, 8 }
  0xa6   : > { %v269_v13 = vpop.xlane.xlu0 %268 }
  0xe8   : > { %v262_v8 = vpop.f32.mrb[0].mxu0 }
  0xe9   : > { %v419_v9 = vpop.f32.mrb[1].mxu0  ;;  %v274_v12 = vmul.f32 2.0, %v262_v8 }
  0xeb   : > { %v275_v15 = vsub.f32 %v274_v12, %v269_v13 }
 0x123   : > { %v292_v16 = vpop.trf.xlu1 }
 0x124   : > { %v311_v17 = vrot.slane %v292_v16, %v310_v14 }
 0x126   : > { %v312_v18 = vsub.f32 %v275_v15, %v311_v17 }
 0x128   : > { %314 = vst.msk [vmem:[%s186_s22] sm:$0xff] %vm313_vm2, %v312_v18 }
 0x129 PF: > { %s12_s11 = sadd.s32 1, %s468_s11   ;;  %s531_s9 = smov %s464_s10 }
 0x12a   : > { %p9_p5 = scmp.ge.s32.totalorder %s12_s11, 4   ;;  %s532_s10 = smov %s534_s12 }
 0x12c   :  { %11 = sbr.rel (!%p9_p5) target bundleno = 2 (0x2), region = 61 }

// kernel: dgcnn_cls_forward.12
= control target key start
LH: loop header
LB: loop body
LE: loop exit
PB: predicated region body
PF: predicated region fallthrough
CT: control target
= control target key end

     0   :  { %s1188_s18 = smov 0   ;;  %s1190_s19 = smov 0   ;;  %s1327_s0 = inlined_call_operand.vmem [shape: f32[2,16,4], index: 0, kind: input, shape index: {}]   ;;  %s1328_s1 = inlined_call_operand.vmem [shape: s32[2,16,8], index: 1, kind: input, shape index: {}]   ;;  %s1329_s2 = inlined_call_operand.vmem [shape: bf16[4,64], index: 2, kind: input, shape index: {}]   ;;  %s1330_s3 = inlined_call_operand.vmem [shape: f32[1,64], index: 3, kind: input, shape index: {}]   ;;  %s1331_s4 = inlined_call_operand.vmem [shape: f32[1,64], index: 4, kind: input, shape index: {}]   ;;  %s1332_s5 = inlined_call_operand.vmem [shape: f32[2,8,64], index: 5, kind: output, shape index: {}]  }
   0x1   :  { %s1192_s20 = smov 0  }
   0x2 LB: > { %s27_s21 = sadd.s32 1, %s1142_s19  ;;  %p984_p0 = scmp.ge.s32.totalorder %s1146_s20, 1  ;;  %s1146_s20 = sphi %s1192_s20, %s15_s20   ;;  %s1142_s19 = sphi %s1190_s19, %s1334_s19   ;;  %s1138_s18 = sphi %s1188_s18, %s1333_s18  }
   0x3   : > { %p29_p1 = scmp.ge.s32.totalorder %s27_s21, 2  ;;  %p216_p2 = scmp.lt.s32.totalorder %s1146_s20, 3 }
   0x5   : > { %s1336_s21 = smov (%p29_p1, %s27_s21), 0  ;;  %p217_p3 = pnand %p984_p0, %p216_p2 }
   0x6   : > { %v279_v0 = vld [vmem:[%s1329_s2] sm:$0x3] (!%p217_p3)  ;;  %vm284_vm0 = vcmask (!%p217_p3), 1041408   ;;  %p252_p4 = scmp.lt.s32.totalorder (!%p217_p3), %s1138_s18, 1  ;;  %v1148_v1 = vmov (!%p217_p3), 0.0   ;;  %vm1149_vm1 = vmmov (!%p217_p3), 0   ;;  %v355_v31 = vlaneseq (!%p217_p3) }
   0x7   : > { %220 = sbr.rel (%p217_p3) target bundleno = 517 (0x205), region = 40  ;;  %1023 = vmatprep.subr.bf16.mxu0 (!%p217_p3), %v1148_v1  ;;  %v286_v2 = vsel (!%p217_p3), %vm284_vm0, %v279_v0, 0  ;;  %1025 = vmatprep.mubr.msk.bf16.mxu0 (!%p217_p3), %vm1149_vm1, %v1148_v1  ;;  %v1150_v3 = vmov (!%p217_p3), 1   ;;  %v1151_v4 = vmov (!%p217_p3), 0   ;;  %vm280_vm2 = vcmask (!%p217_p3), 31744  }
   0x8   : > { %1024 = vmatpush3.bf16.msra.mxu0 (!%p217_p3), %v286_v2  ;;  %1112 = vset.pattern.permute.xlu1 (!%p217_p3), %v1150_v3  ;;  %v1152_v10 = vmov (!%p217_p3), 2   ;;  %v1153_v11 = vmov (!%p217_p3), 3   ;;  %v1154_v12 = vmov (!%p217_p3), 4   ;;  %v1155_v13 = vmov (!%p217_p3), 5   ;;  %v991_v19 = vld [vmem:[%s1330_s3] ss:$0 sm:$0xff] (!%p217_p3) }
   0x9   : > { %1111 = vset.pattern.permute.xlu0 (!%p217_p3), %v1151_v4  ;;  %1029 = vmatprep.subr.bf16.mxu1 (!%p217_p3), %v1148_v1  ;;  %v1156_v14 = vmov (!%p217_p3), 6   ;;  %v1157_v15 = vmov (!%p217_p3), 7   ;;  %v992_v21 = vld [vmem:[%s1331_s4] ss:$0 sm:$0xff] (!%p217_p3)  ;;  %vm350_vm3 = vcmask (!%p217_p3), 523264   ;;  %v1234_v37 = vand.u32 (!%p217_p3), 127, %v355_v31 }
   0xa   : > { %1035 = vmatprep.subr.bf16.mxu0 (!%p217_p3), %v1148_v1  ;;  %1031 = vmatprep.mubr.msk.bf16.mxu1 (!%p217_p3), %vm1149_vm1, %v1148_v1  ;;  %vm368_vm8 = vcmask (!%p217_p3), 130048  }
   0xe   : > { %s1338_s18 = smov (!%p252_p4, %s1138_s18), 1 }
   0xf   : > { %s1003_s24 = sshll.u32 %s1338_s18, 4  ;;  %s989_s10 = sshll.u32 %s1338_s18, 3 }
  0x10   : > { %s256_s27 = scalar_lea.vmem %s1327_s0, %s1003_s24  ;;  %s265_s30 = scalar_lea.vmem %s1328_s1, %s1003_s24 }
  0x11   : > { %v276_v5 = vld [vmem:[%s256_s27] sm:$0xff]  ;;  %v277_v6 = vld [vmem:[%s256_s27 + $0x8] sm:$0xff]  ;;  %s270_s13 = scalar_lea.vmem %s1332_s5, %s989_s10 }
  0x12   : > { %v352_v7 = vld [vmem:[%s265_s30] sm:$0xff]  ;;  %v278_v8 = vpack.c.bf16 %v277_v6, %v276_v5  ;;  %v353_v9 = vld [vmem:[%s265_s30 + $0x8] sm:$0xff] }
  0x13   : > { %424 = vperm.xlu1 %1112, %v352_v7   ;;  %358 = vperm.xlu0 %1111, %v352_v7  }
  0x14   : > { %1026 = vmatmul.mubr.msk.bf16.vlgmr.msra.gmra.mrb[0].mxu0 %vm280_vm2, %v278_v8 }
  0x15   : > { %1037 = vmatprep.mubr.msk.bf16.mxu0 %vm1149_vm1, %v1148_v1 }
  0x17   : > { %427 = vperm.xlu1 %1112, %v353_v9   ;;  %361 = vperm.xlu0 %1111, %v353_v9  }
  0x1b   : > { %1114 = vset.pattern.permute.xlu1 %v1152_v10  ;;  %1113 = vset.pattern.permute.xlu0 %v1152_v10 }
  0x1c   : > { %491 = vperm.xlu1 %1114, %v353_v9   ;;  %488 = vperm.xlu0 %1113, %v352_v7  }
  0x20   : > { %1115 = vset.pattern.permute.xlu1 %v1153_v11  ;;  %1116 = vset.pattern.permute.xlu0 %v1153_v11 }
  0x21   : > { %552 = vperm.xlu1 %1115, %v352_v7   ;;  %555 = vperm.xlu0 %1116, %v353_v9  }
  0x25   : > { %1117 = vset.pattern.permute.xlu1 %v1154_v12  ;;  %1118 = vset.pattern.permute.xlu0 %v1155_v13 }
  0x26   : > { %616 = vperm.xlu1 %1117, %v352_v7   ;;  %680 = vperm.xlu0 %1118, %v352_v7  }
  0x2a   : > { %619 = vperm.xlu1 %1117, %v353_v9   ;;  %1121 = vset.pattern.permute.xlu0 %v1156_v14 }
  0x2b   : > { %747 = vperm.xlu0 %1121, %v353_v9  }
  0x2e   : > { %1119 = vset.pattern.permute.xlu1 %v1155_v13 }
  0x2f   : > { %683 = vperm.xlu1 %1119, %v353_v9   ;;  %1123 = vset.pattern.permute.xlu0 %v1157_v15 }
  0x33   : > { %1120 = vset.pattern.permute.xlu1 %v1156_v14 }
  0x34   : > { %744 = vperm.xlu1 %1120, %v352_v7  }
  0x38   : > { %1122 = vset.pattern.permute.xlu1 %v1157_v15 }
  0x39   : > { %808 = vperm.xlu1 %1122, %v352_v7  }
  0x3d   : > { %811 = vperm.xlu1 %1122, %v353_v9  }
  0x92   : > { %v425_v16 = vpop.permute.xlu1 %424  ;;  %v359_v22 = vpop.permute.xlu0 %358 }
  0x93   : > { %vm429_vm4 = vcmp.eq.s32.totalorder %v1234_v37, %v425_v16  ;;  %vm363_vm6 = vcmp.eq.s32.totalorder %v1234_v37, %v359_v22 }
  0x94   : > { %v431_v40 = vsel %vm429_vm4, 1.0, %v1148_v1  ;;  %v365_v42 = vsel %vm363_vm6, 1.0, %v1148_v1 }
  0x96   : > { %v428_v17 = vpop.permute.xlu1 %427  ;;  %v362_v34 = vpop.permute.xlu0 %361 }
  0x97   : > { %vm430_vm5 = vcmp.eq.s32.totalorder %v1234_v37, %v428_v17  ;;  %vm364_vm7 = vcmp.eq.s32.totalorder %v1234_v37, %v362_v34 }
  0x98   : > { %v432_v41 = vsel %vm430_vm5, 1.0, %v1148_v1  ;;  %v366_v43 = vsel %vm364_vm7, 1.0, %v1148_v1 }
  0x99   : > { %v433_v47 = vpack.c.bf16 %v432_v41, %v431_v40  ;;  %v367_v48 = vpack.c.bf16 %v366_v43, %v365_v42 }
  0x9b   : > { %v492_v18 = vpop.permute.xlu1 %491  ;;  %v489_v38 = vpop.permute.xlu0 %488 }
  0x9c   : > { %vm494_vm9 = vcmp.eq.s32.totalorder %v1234_v37, %v492_v18  ;;  %vm493_vm10 = vcmp.eq.s32.totalorder %v1234_v37, %v489_v38 }
  0x9d   : > { %v496_v50 = vsel %vm494_vm9, 1.0, %v1148_v1  ;;  %v495_v51 = vsel %vm493_vm10, 1.0, %v1148_v1  ;;  %vm879_vm9 = vcmask 1044480   ;;  %vm881_vm10 = vcmask 1045504  }
  0x9e   : > { %v497_v55 = vpack.c.bf16 %v496_v50, %v495_v51 }
  0xa0   : > { %v553_v25 = vpop.permute.xlu1 %552  ;;  %v556_v46 = vpop.permute.xlu0 %555 }
  0xa1   : > { %vm557_vm11 = vcmp.eq.s32.totalorder %v1234_v37, %v553_v25  ;;  %vm558_vm12 = vcmp.eq.s32.totalorder %v1234_v37, %v556_v46 }
  0xa2   : > { %v559_v52 = vsel %vm557_vm11, 1.0, %v1148_v1  ;;  %v560_v53 = vsel %vm558_vm12, 1.0, %v1148_v1  ;;  %vm883_vm11 = vcmask 1046528  }
  0xa3   : > { %v561_v56 = vpack.c.bf16 %v560_v53, %v559_v52 }
  0xa5   : > { %v617_v35 = vpop.permute.xlu1 %616  ;;  %v681_v54 = vpop.permute.xlu0 %680 }
  0xa6   : > { %vm621_vm13 = vcmp.eq.s32.totalorder %v1234_v37, %v617_v35  ;;  %vm685_vm2 = vcmp.eq.s32.totalorder %v1234_v37, %v681_v54 }
  0xa7   : > { %v623_v58 = vsel %vm621_vm13, 1.0, %v1148_v1  ;;  %v687_v61 = vsel %vm685_vm2, 1.0, %v1148_v1 }
  0xa9   : > { %v620_v39 = vpop.permute.xlu1 %619 }
  0xaa   : > { %vm622_vm14 = vcmp.eq.s32.totalorder %v1234_v37, %v620_v39  ;;  %v748_v62 = vpop.permute.xlu0 %747 }
  0xab   : > { %v624_v59 = vsel %vm622_vm14, 1.0, %v1148_v1  ;;  %vm750_vm4 = vcmp.eq.s32.totalorder %v1234_v37, %v748_v62 }
  0xac   : > { %v625_v0 = vpack.c.bf16 %v624_v59, %v623_v58  ;;  %v752_v5 = vsel %vm750_vm4, 1.0, %v1148_v1 }
  0xae   : > { %v684_v44 = vpop.permute.xlu1 %683 }
  0xaf   : > { %vm686_vm15 = vcmp.eq.s32.totalorder %v1234_v37, %v684_v44 }
  0xb0   : > { %v688_v60 = vsel %vm686_vm15, 1.0, %v1148_v1 }
  0xb1   : > { %v689_v2 = vpack.c.bf16 %v688_v60, %v687_v61 }
  0xb3   : > { %v745_v49 = vpop.permute.xlu1 %744 }
  0xb4   : > { %vm749_vm5 = vcmp.eq.s32.totalorder %v1234_v37, %v745_v49 }
  0xb5   : > { %v751_v3 = vsel %vm749_vm5, 1.0, %v1148_v1 }
  0xb6   : > { %v753_v7 = vpack.c.bf16 %v752_v5, %v751_v3 }
  0xb8   : > { %v809_v57 = vpop.permute.xlu1 %808 }
  0xb9   : > { %vm813_vm6 = vcmp.eq.s32.totalorder %v1234_v37, %v809_v57 }
  0xba   : > { %v815_v4 = vsel %vm813_vm6, 1.0, %v1148_v1 }
  0xbc   : > { %v812_v63 = vpop.permute.xlu1 %811 }
  0xbd   : > { %vm814_vm7 = vcmp.eq.s32.totalorder %v1234_v37, %v812_v63 }
  0xbe   : > { %v816_v6 = vsel %vm814_vm7, 1.0, %v1148_v1 }
  0xbf   : > { %v817_v8 = vpack.c.bf16 %v816_v6, %v815_v4 }
  0xe7   : > { %v322_v20 = vpop.f32.mrb[0].mxu0 }
  0xe8   : > { %v336_v23 = vmul.f32 %v991_v19, %v322_v20  ;;  %v1027_v24 = vpop.f32.mrb[1].mxu0 }
  0xe9   : > { %v325_v26 = vpop.f32.mrb[2].mxu0 }
  0xea   : > { %v345_v27 = vadd.f32 %v992_v21, %v336_v23  ;;  %v337_v28 = vmul.f32 %v991_v19, %v325_v26  ;;  %v1028_v29 = vpop.f32.mrb[3].mxu0 }
  0xec   : > { %v346_v30 = vadd.f32 %v992_v21, %v337_v28  ;;  %v347_v32 = vmax.f32 %v345_v27, 0.0 }
  0xee   : > { %v348_v33 = vmax.f32 %v346_v30, 0.0 }
  0xf0   : > { %v349_v36 = vpack.c.bf16 %v348_v33, %v347_v32 }
  0xf2   : > { %351 = vst.msk [vmem:[#allocation2] sm:$0xff] %vm350_vm3, %v349_v36 }
  0xf9   : > { %v354_v45 = vld [vmem:[#allocation2] sm:$0xff] }
  0xfa   : > { %1030 = vmatpush3.bf16.msra.mxu1 %v354_v45  ;;  %1036 = vmatpush3.bf16.msra.mxu0 %v354_v45 }
  0xfb   : > { %1041 = vmatprep.subr.bf16.mxu1 %v1148_v1  ;;  %1047 = vmatprep.subr.bf16.mxu0 %v1148_v1 }
  0xfd   : > { %1032 = vmatmul.mubr.msk.bf16.vlgmr.msra.gmra.mrb[0].mxu1 %vm368_vm8, %v367_v48  ;;  %1038 = vmatmul.mubr.msk.bf16.vlgmr.msra.gmra.mrb[4].mxu0 %vm368_vm8, %v433_v47 }
  0xfe   : > { %1042 = vmatpush3.bf16.msra.mxu1 %v354_v45  ;;  %1048 = vmatpush3.bf16.msra.mxu0 %v354_v45 }
  0xff   : > { %1043 = vmatprep.mubr.msk.bf16.mxu1 %vm1149_vm1, %v1148_v1  ;;  %1049 = vmatprep.mubr.msk.bf16.mxu0 %vm1149_vm1, %v1148_v1 }
 0x100   : > { %1053 = vmatprep.subr.bf16.mxu1 %v1148_v1  ;;  %1059 = vmatprep.subr.bf16.mxu0 %v1148_v1 }
 0x105   : > { %1044 = vmatmul.mubr.msk.bf16.vlgmr.msra.gmra.mrb[4].mxu1 %vm368_vm8, %v497_v55  ;;  %1050 = vmatmul.mubr.msk.bf16.vlgmr.msra.gmra.mrb[8].mxu0 %vm368_vm8, %v561_v56 }
 0x106   : > { %1054 = vmatpush3.bf16.msra.mxu1 %v354_v45  ;;  %1060 = vmatpush3.bf16.msra.mxu0 %v354_v45 }
 0x107   : > { %1055 = vmatprep.mubr.msk.bf16.mxu1 %vm1149_vm1, %v1148_v1  ;;  %1061 = vmatprep.mubr.msk.bf16.mxu0 %vm1149_vm1, %v1148_v1 }
 0x108   : > { %1065 = vmatprep.subr.bf16.mxu1 %v1148_v1  ;;  %1071 = vmatprep.subr.bf16.mxu0 %v1148_v1 }
 0x10d   : > { %1056 = vmatmul.mubr.msk.bf16.vlgmr.msra.gmra.mrb[8].mxu1 %vm368_vm8, %v625_v0  ;;  %1062 = vmatmul.mubr.msk.bf16.vlgmr.msra.gmra.mrb[12].mxu0 %vm368_vm8, %v689_v2 }
 0x10e   : > { %1066 = vmatpush3.bf16.msra.mxu1 %v354_v45  ;;  %1072 = vmatpush3.bf16.msra.mxu0 %v354_v45 }
 0x10f   : > { %1067 = vmatprep.mubr.msk.bf16.mxu1 %vm1149_vm1, %v1148_v1  ;;  %1073 = vmatprep.mubr.msk.bf16.mxu0 %vm1149_vm1, %v1148_v1  ;;  %vm871_vm1 = vcmask 1040384  }
 0x115   : > { %1068 = vmatmul.mubr.msk.bf16.vlgmr.msra.gmra.mrb[12].mxu1 %vm368_vm8, %v753_v7  ;;  %1074 = vmatmul.mubr.msk.bf16.vlgmr.msra.gmra.mrb[16].mxu0 %vm368_vm8, %v817_v8  ;;  %vm875_vm8 = vcmask 1042432  }
 0x1d0   : > { %v406_v9 = vpop.f32.mrb[0].mxu1  ;;  %v471_v10 = vpop.f32.mrb[4].mxu0 }
 0x1d1   : > { %v1033_v11 = vpop.f32.mrb[1].mxu1  ;;  %v1039_v12 = vpop.f32.mrb[5].mxu0  ;;  %v414_v15 = vsel %vm350_vm3, %v406_v9, -inf  ;;  %v478_v16 = vsel %vm350_vm3, %v471_v10, -inf }
 0x1d2   : > { %v409_v13 = vpop.f32.mrb[2].mxu1  ;;  %v474_v14 = vpop.f32.mrb[6].mxu0 }
 0x1d3   : > { %v415_v17 = vsel %vm350_vm3, %v409_v13, -inf  ;;  %v479_v1 = vsel %vm350_vm3, %v474_v14, -inf  ;;  %v1034_v18 = vpop.f32.mrb[3].mxu1  ;;  %v1040_v19 = vpop.f32.mrb[7].mxu0 }
 0x1d4   : > { %v416_v20 = vmax.f32 %v414_v15, %v415_v17  ;;  %v480_v21 = vmax.f32 %v478_v16, %v479_v1 }
 0x1d6   : > { %v417_v22 = vrot.slane %v416_v20, 4  ;;  %v481_v23 = vrot.slane %v480_v21, 4 }
 0x1d8   : > { %v418_v24 = vmax.f32 %v416_v20, %v417_v22  ;;  %v482_v25 = vmax.f32 %v480_v21, %v481_v23  ;;  %v535_v26 = vpop.f32.mrb[4].mxu1  ;;  %v599_v27 = vpop.f32.mrb[8].mxu0 }
 0x1d9   : > { %v1045_v28 = vpop.f32.mrb[5].mxu1  ;;  %v1051_v29 = vpop.f32.mrb[9].mxu0  ;;  %v542_v34 = vsel %vm350_vm3, %v535_v26, -inf  ;;  %v606_v35 = vsel %vm350_vm3, %v599_v27, -inf }
 0x1da   : > { %v419_v30 = vrot.slane %v418_v24, 2  ;;  %v483_v31 = vrot.slane %v482_v25, 2  ;;  %v538_v32 = vpop.f32.mrb[6].mxu1  ;;  %v602_v33 = vpop.f32.mrb[10].mxu0 }
 0x1db   : > { %v543_v36 = vsel %vm350_vm3, %v538_v32, -inf  ;;  %v607_v37 = vsel %vm350_vm3, %v602_v33, -inf  ;;  %v1046_v38 = vpop.f32.mrb[7].mxu1  ;;  %v1052_v39 = vpop.f32.mrb[11].mxu0 }
 0x1dc   : > { %v420_v40 = vmax.f32 %v418_v24, %v419_v30  ;;  %v484_v41 = vmax.f32 %v482_v25, %v483_v31  ;;  %v544_v42 = vmax.f32 %v542_v34, %v543_v36  ;;  %v608_v43 = vmax.f32 %v606_v35, %v607_v37 }
 0x1de   : > { %v421_v44 = vrot.slane %v420_v40, 1  ;;  %v485_v45 = vrot.slane %v484_v41, 1  ;;  %v545_v46 = vrot.slane %v544_v42, 4  ;;  %v609_v47 = vrot.slane %v608_v43, 4 }
 0x1e0   : > { %v422_v48 = vmax.f32 %v420_v40, %v421_v44  ;;  %v486_v49 = vmax.f32 %v484_v41, %v485_v45  ;;  %v546_v50 = vmax.f32 %v544_v42, %v545_v46  ;;  %v610_v51 = vmax.f32 %v608_v43, %v609_v47  ;;  %v663_v52 = vpop.f32.mrb[8].mxu1  ;;  %v727_v53 = vpop.f32.mrb[12].mxu0 }
 0x1e1   : > { %v1057_v54 = vpop.f32.mrb[9].mxu1  ;;  %v1063_v55 = vpop.f32.mrb[13].mxu0  ;;  %v670_v61 = vsel %vm350_vm3, %v663_v52, -inf  ;;  %v734_v62 = vsel %vm350_vm3, %v727_v53, -inf }
 0x1e2   : > { %v872_v56 = vsel %vm871_vm1, %v422_v48, %v486_v49  ;;  %v547_v57 = vrot.slane %v546_v50, 2  ;;  %v611_v58 = vrot.slane %v610_v51, 2  ;;  %v666_v59 = vpop.f32.mrb[10].mxu1  ;;  %v730_v60 = vpop.f32.mrb[14].mxu0 }
 0x1e3   : > { %v671_v63 = vsel %vm350_vm3, %v666_v59, -inf  ;;  %v735_v0 = vsel %vm350_vm3, %v730_v60, -inf  ;;  %v1058_v2 = vpop.f32.mrb[11].mxu1  ;;  %v1064_v3 = vpop.f32.mrb[15].mxu0 }
 0x1e4   : > { %v548_v4 = vmax.f32 %v546_v50, %v547_v57  ;;  %v612_v5 = vmax.f32 %v610_v51, %v611_v58  ;;  %v672_v6 = vmax.f32 %v670_v61, %v671_v63  ;;  %v736_v7 = vmax.f32 %v734_v62, %v735_v0 }
 0x1e6   : > { %v549_v8 = vrot.slane %v548_v4, 1  ;;  %v613_v9 = vrot.slane %v612_v5, 1  ;;  %v673_v10 = vrot.slane %v672_v6, 4  ;;  %v737_v11 = vrot.slane %v736_v7, 4 }
 0x1e8   : > { %v550_v12 = vmax.f32 %v548_v4, %v549_v8  ;;  %v614_v13 = vmax.f32 %v612_v5, %v613_v9  ;;  %v674_v14 = vmax.f32 %v672_v6, %v673_v10  ;;  %v738_v15 = vmax.f32 %v736_v7, %v737_v11  ;;  %v791_v16 = vpop.f32.mrb[12].mxu1  ;;  %v855_v17 = vpop.f32.mrb[16].mxu0 }
 0x1e9   : > { %v1069_v1 = vpop.f32.mrb[13].mxu1  ;;  %v1075_v18 = vpop.f32.mrb[17].mxu0  ;;  %v798_v22 = vsel %vm350_vm3, %v791_v16, -inf  ;;  %v862_v26 = vsel %vm350_vm3, %v855_v17, -inf }
 0x1ea   : > { %v874_v19 = vsel %vm284_vm0, %v872_v56, %v550_v12  ;;  %v675_v20 = vrot.slane %v674_v14, 2  ;;  %v739_v21 = vrot.slane %v738_v15, 2  ;;  %v794_v23 = vpop.f32.mrb[14].mxu1  ;;  %v858_v24 = vpop.f32.mrb[18].mxu0  ;;  %vm877_vm0 = vcmask 1043456  }
 0x1eb   : > { %v876_v25 = vsel %vm875_vm8, %v874_v19, %v614_v13  ;;  %v799_v27 = vsel %vm350_vm3, %v794_v23, -inf  ;;  %v863_v28 = vsel %vm350_vm3, %v858_v24, -inf  ;;  %v1070_v29 = vpop.f32.mrb[15].mxu1  ;;  %v1076_v30 = vpop.f32.mrb[19].mxu0 }
 0x1ec   : > { %v676_v31 = vmax.f32 %v674_v14, %v675_v20  ;;  %v740_v32 = vmax.f32 %v738_v15, %v739_v21  ;;  %v800_v33 = vmax.f32 %v798_v22, %v799_v27  ;;  %v864_v34 = vmax.f32 %v862_v26, %v863_v28 }
 0x1ee   : > { %v677_v35 = vrot.slane %v676_v31, 1  ;;  %v741_v36 = vrot.slane %v740_v32, 1  ;;  %v801_v37 = vrot.slane %v800_v33, 4  ;;  %v865_v38 = vrot.slane %v864_v34, 4 }
 0x1f0   : > { %v678_v39 = vmax.f32 %v676_v31, %v677_v35  ;;  %v742_v40 = vmax.f32 %v740_v32, %v741_v36  ;;  %v802_v41 = vmax.f32 %v800_v33, %v801_v37  ;;  %v866_v42 = vmax.f32 %v864_v34, %v865_v38 }
 0x1f2   : > { %v878_v43 = vsel %vm877_vm0, %v876_v25, %v678_v39  ;;  %v803_v44 = vrot.slane %v802_v41, 2  ;;  %v867_v45 = vrot.slane %v866_v42, 2 }
 0x1f3   : > { %v880_v46 = vsel %vm879_vm9, %v878_v43, %v742_v40 }
 0x1f4   : > { %v804_v47 = vmax.f32 %v802_v41, %v803_v44  ;;  %v868_v48 = vmax.f32 %v866_v42, %v867_v45 }
 0x1f6   : > { %v805_v49 = vrot.slane %v804_v47, 1  ;;  %v869_v50 = vrot.slane %v868_v48, 1 }
 0x1f8   : > { %v806_v51 = vmax.f32 %v804_v47, %v805_v49  ;;  %v870_v52 = vmax.f32 %v868_v48, %v869_v50 }
 0x1fa   : > { %v882_v53 = vsel %vm881_vm10, %v880_v46, %v806_v51 }
 0x1fb   : > { %v884_v54 = vsel %vm883_vm11, %v882_v53, %v870_v52 }
 0x1fc   : > { %888 = vst.msk [vmem:[#allocation3] sm:$0xff] %vm350_vm3, %v884_v54 }
 0x203   : > { %v899_v55 = vld [vmem:[#allocation3] sm:$0xff] }
 0x204   : > { %900 = vst.msk [vmem:[%s270_s13] sm:$0xff] %vm350_vm3, %v899_v55 }
 0x205 PF: > { %s15_s20 = sadd.s32 1, %s1146_s20   ;;  %s1333_s18 = smov %s1142_s19 }
 0x206   : > { %p12_p5 = scmp.ge.s32.totalorder %s15_s20, 4   ;;  %s1334_s19 = smov %s1336_s21 }
 0x208   :  { %14 = sbr.rel (!%p12_p5) target bundleno = 2 (0x2), region = 89 }

// kernel: dgcnn_cls_forward.20
= control target key start
LH: loop header
LB: loop body
LE: loop exit
PB: predicated region body
PF: predicated region fallthrough
CT: control target
= control target key end

     0   :  { %s322_s6 = smov 0   ;;  %s343_s0 = inlined_call_operand.vmem [shape: f32[2,8,1024], index: 0, kind: input, shape index: {}]   ;;  %s344_s1 = inlined_call_operand.vmem [shape: f32[2,1,1024], index: 1, kind: output, shape index: {}]  }
   0x1 LB: > { %s283_s7 = sadd.s32 4294967295, %s309_s6   ;;  %p287_p0 = scmp.ge.s32.totalorder %s309_s6, 1  ;;  %s309_s6 = sphi %s322_s6, %s11_s6  }
   0x2   : > { %p87_p1 = scmp.lt.s32.totalorder %s309_s6, 3 }
   0x4   : > { %p88_p2 = pnand %p287_p0, %p87_p1 }
   0x5   : > { %p106_p3 = scmp.lt.s32.totalorder (!%p88_p2), %s283_s7, 1  ;;  %v186_v0 = vlaneseq (!%p88_p2)  ;;  %v311_v1 = vmov (!%p88_p2), 1966171168  }
   0x6   : > { %91 = sbr.rel (%p88_p2) target bundleno = 43 (0x2b), region = 24  ;;  %v184_v2 = vunpack.c.l.s4 (!%p88_p2), %v311_v1 }
   0x7   : > { %v187_v4 = vshrl.u32 (!%p88_p2), %v186_v0, 7 }
   0x8   : > { %v185_v3 = vunpack.c.0.s8 (!%p88_p2), %v184_v2 }
   0xa   : > { %v188_v19 = vsub.s32 (!%p88_p2), %v185_v3, %v187_v4 }
   0xd   : > { %s346_s7 = smov (!%p106_p3, %s283_s7), 1 }
   0xe   : > { %s293_s8 = sshll.u32 %s346_s7, 6  ;;  %s290_s12 = sshll.u32 %s346_s7, 3 }
   0xf   : > { %s110_s11 = scalar_lea.vmem %s343_s0, %s293_s8  ;;  %s114_s15 = scalar_lea.vmem %s344_s1, %s290_s12 }
  0x10   : > { %v115_v5 = vld [vmem:[%s110_s11] sm:$0xff]  ;;  %v116_v6 = vld [vmem:[%s110_s11 + $0x8] sm:$0xff]  ;;  %v117_v7 = vld [vmem:[%s110_s11 + $0x10] sm:$0xff] }
  0x11   : > { %v118_v8 = vld [vmem:[%s110_s11 + $0x18] sm:$0xff]  ;;  %v119_v9 = vld [vmem:[%s110_s11 + $0x20] sm:$0xff]  ;;  %v120_v10 = vld [vmem:[%s110_s11 + $0x28] sm:$0xff]  ;;  %v123_v11 = vrot.slane %v115_v5, 4  ;;  %v129_v12 = vrot.slane %v116_v6, 4  ;;  %v135_v13 = vrot.slane %v117_v7, 4 }
  0x12   : > { %v121_v14 = vld [vmem:[%s110_s11 + $0x30] sm:$0xff]  ;;  %v122_v15 = vld [vmem:[%s110_s11 + $0x38] sm:$0xff]  ;;  %v141_v16 = vrot.slane %v118_v8, 4  ;;  %v147_v17 = vrot.slane %v119_v9, 4  ;;  %v153_v18 = vrot.slane %v120_v10, 4 }
  0x13   : > { %v124_v20 = vmax.f32 %v115_v5, %v123_v11  ;;  %v130_v21 = vmax.f32 %v116_v6, %v129_v12  ;;  %v136_v22 = vmax.f32 %v117_v7, %v135_v13  ;;  %v159_v23 = vrot.slane %v121_v14, 4 }
  0x14   : > { %v142_v24 = vmax.f32 %v118_v8, %v141_v16  ;;  %v148_v25 = vmax.f32 %v119_v9, %v147_v17  ;;  %v154_v26 = vmax.f32 %v120_v10, %v153_v18  ;;  %v165_v27 = vrot.slane %v122_v15, 4 }
  0x15   : > { %v125_v28 = vrot.slane %v124_v20, 2  ;;  %v131_v29 = vrot.slane %v130_v21, 2  ;;  %v137_v30 = vrot.slane %v136_v22, 2  ;;  %v160_v31 = vmax.f32 %v121_v14, %v159_v23 }
  0x16   : > { %v143_v32 = vrot.slane %v142_v24, 2  ;;  %v149_v33 = vrot.slane %v148_v25, 2  ;;  %v155_v34 = vrot.slane %v154_v26, 2  ;;  %v166_v35 = vmax.f32 %v122_v15, %v165_v27 }
  0x17   : > { %v126_v36 = vmax.f32 %v124_v20, %v125_v28  ;;  %v132_v37 = vmax.f32 %v130_v21, %v131_v29  ;;  %v138_v38 = vmax.f32 %v136_v22, %v137_v30  ;;  %v161_v39 = vrot.slane %v160_v31, 2 }
  0x18   : > { %v144_v40 = vmax.f32 %v142_v24, %v143_v32  ;;  %v150_v41 = vmax.f32 %v148_v25, %v149_v33  ;;  %v156_v42 = vmax.f32 %v154_v26, %v155_v34  ;;  %v167_v43 = vrot.slane %v166_v35, 2 }
  0x19   : > { %v127_v44 = vrot.slane %v126_v36, 1  ;;  %v133_v45 = vrot.slane %v132_v37, 1  ;;  %v139_v46 = vrot.slane %v138_v38, 1  ;;  %v162_v47 = vmax.f32 %v160_v31, %v161_v39 }
  0x1a   : > { %v145_v48 = vrot.slane %v144_v40, 1  ;;  %v151_v49 = vrot.slane %v150_v41, 1  ;;  %v157_v50 = vrot.slane %v156_v42, 1  ;;  %v168_v51 = vmax.f32 %v166_v35, %v167_v43 }
  0x1b   : > { %v128_v52 = vmax.f32 %v126_v36, %v127_v44  ;;  %v134_v53 = vmax.f32 %v132_v37, %v133_v45  ;;  %v140_v54 = vmax.f32 %v138_v38, %v139_v46  ;;  %v163_v55 = vrot.slane %v162_v47, 1 }
  0x1c   : > { %v146_v56 = vmax.f32 %v144_v40, %v145_v48  ;;  %v152_v57 = vmax.f32 %v150_v41, %v151_v49  ;;  %v158_v58 = vmax.f32 %v156_v42, %v157_v50  ;;  %v169_v59 = vrot.slane %v168_v51, 1 }
  0x1d   : > { %v164_v60 = vmax.f32 %v162_v47, %v163_v55  ;;  %v179_v61 = vcombine.low %v128_v52, %v134_v53 }
  0x1e   : > { %v170_v62 = vmax.f32 %v168_v51, %v169_v59  ;;  %v180_v63 = vcombine.low %v140_v54, %v146_v56  ;;  %v181_v0 = vcombine.low %v152_v57, %v158_v58 }
  0x1f   : > { %v189_v1 = vrot.slane %v179_v61, %v188_v19 }
  0x20   : > { %v182_v2 = vcombine.low %v164_v60, %v170_v62  ;;  %v196_v3 = vrot.slane %v180_v63, %v188_v19  ;;  %v203_v4 = vrot.slane %v181_v0, %v188_v19 }
  0x22   : > { %v210_v5 = vrot.slane %v182_v2, %v188_v19  ;;  %v211_v6 = vcombine.low %v189_v1, %v196_v3 }
  0x24   : > { %v212_v7 = vcombine.low %v203_v4, %v210_v5  ;;  %v219_v8 = vrot.slane %v211_v6, %v188_v19 }
  0x26   : > { %v226_v9 = vrot.slane %v212_v7, %v188_v19 }
  0x28   : > { %v227_v10 = vcombine.low %v219_v8, %v226_v9 }
  0x2a   : > { %229 = vst [vmem:[%s114_s15] sm:$0xff] %v227_v10 }
  0x2b PF: > { %s11_s6 = sadd.s32 1, %s309_s6  }
  0x2c   : > { %p8_p4 = scmp.ge.s32.totalorder %s11_s6, 4  }
  0x2e   :  { %10 = sbr.rel (!%p8_p4) target bundleno = 1 (0x1), region = 54 }

// kernel: dgcnn_cls_forward.14
= control target key start
LH: loop header
LB: loop body
LE: loop exit
PB: predicated region body
PF: predicated region fallthrough
CT: control target
= control target key end

     0   :  { %s1143_s18 = smov 0   ;;  %s1145_s19 = smov 0   ;;  %s1261_s0 = inlined_call_operand.vmem [shape: f32[2,8,64], index: 0, kind: input, shape index: {}]   ;;  %s1262_s1 = inlined_call_operand.vmem [shape: s32[2,8,8], index: 1, kind: input, shape index: {}]   ;;  %s1263_s2 = inlined_call_operand.vmem [shape: bf16[64,64], index: 2, kind: input, shape index: {}]   ;;  %s1264_s3 = inlined_call_operand.vmem [shape: f32[1,64], index: 3, kind: input, shape index: {}]   ;;  %s1265_s4 = inlined_call_operand.vmem [shape: f32[1,64], index: 4, kind: input, shape index: {}]   ;;  %s1266_s5 = inlined_call_operand.vmem [shape: f32[2,8,64], index: 5, kind: output, shape index: {}]  }
   0x1   :  { %s1147_s20 = smov 0  }
   0x2 LB: > { %s27_s21 = sadd.s32 1, %s1097_s19  ;;  %p930_p0 = scmp.ge.s32.totalorder %s1101_s20, 1  ;;  %s1101_s20 = sphi %s1147_s20, %s15_s20   ;;  %s1097_s19 = sphi %s1145_s19, %s1268_s19   ;;  %s1093_s18 = sphi %s1143_s18, %s1267_s18  }
   0x3   : > { %p29_p1 = scmp.ge.s32.totalorder %s27_s21, 2  ;;  %p212_p2 = scmp.lt.s32.totalorder %s1101_s20, 3 }
   0x5   : > { %s1270_s21 = smov (%p29_p1, %s27_s21), 0  ;;  %p213_p3 = pnand %p930_p0, %p212_p2 }
   0x6   : > { %v1075_v0 = vld [vmem:[%s1263_s2] sm:$0xff] (!%p213_p3)   ;;  %v1103_v1 = vmov (!%p213_p3), 0.0   ;;  %v1076_v2 = vld [vmem:[%s1263_s2 + $0x8] sm:$0xff] (!%p213_p3)   ;;  %vm1104_vm0 = vmmov (!%p213_p3), 0   ;;  %p245_p4 = scmp.lt.s32.totalorder (!%p213_p3), %s1093_s18, 1  ;;  %v1105_v3 = vmov (!%p213_p3), 2   ;;  %v365_v25 = vlaneseq (!%p213_p3) }
   0x7   : > { %216 = sbr.rel (%p213_p3) target bundleno = 524 (0x20c), region = 40  ;;  %972 = vmatprep.subr.bf16.mxu0 (!%p213_p3), %v1103_v1  ;;  %984 = vmatprep.subr.bf16.mxu1 (!%p213_p3), %v1103_v1  ;;  %v1106_v4 = vmov (!%p213_p3), 0   ;;  %v1077_v5 = vld [vmem:[%s1263_s2 + $0x10] sm:$0xff] (!%p213_p3)   ;;  %v1078_v7 = vld [vmem:[%s1263_s2 + $0x18] sm:$0xff] (!%p213_p3)   ;;  %v1107_v10 = vmov (!%p213_p3), 3   ;;  %v1108_v11 = vmov (!%p213_p3), 1  }
   0x8   : > { %973 = vmatpush3.bf16.msra.mxu0 (!%p213_p3), %v1075_v0  ;;  %980 = vmatprep.mubr.msk.bf16.mxu0 (!%p213_p3), %vm1104_vm0, %v1103_v1  ;;  %vm299_vm1 = vcmask (!%p213_p3), 523264   ;;  %v1109_v12 = vmov (!%p213_p3), 4   ;;  %v1110_v13 = vmov (!%p213_p3), 5   ;;  %v1111_v14 = vmov (!%p213_p3), 6   ;;  %v939_v16 = vld [vmem:[%s1264_s3] ss:$0 sm:$0xff] (!%p213_p3) }
   0x9   : > { %974 = vmatprep.subr.bf16.mxu0 (!%p213_p3), %v1103_v1  ;;  %986 = vmatprep.mubr.msk.bf16.mxu1 (!%p213_p3), %vm1104_vm0, %v1103_v1  ;;  %v1112_v15 = vmov (!%p213_p3), 7   ;;  %v940_v18 = vld [vmem:[%s1265_s4] ss:$0 sm:$0xff] (!%p213_p3)  ;;  %vm361_vm2 = vcmask (!%p213_p3), 519168   ;;  %v366_v29 = vand.u32 (!%p213_p3), 127, %v365_v25  ;;  %vm377_vm5 = vcmask (!%p213_p3), 1043456  }
   0xa   : > { %1068 = vset.pattern.permute.xlu1 (!%p213_p3), %v1105_v3  ;;  %1066 = vset.pattern.permute.xlu0 (!%p213_p3), %v1106_v4  ;;  %vm373_vm6 = vcmask (!%p213_p3), 64512   ;;  %vm821_vm13 = vcmask (!%p213_p3), 1040384   ;;  %vm823_vm14 = vcmask (!%p213_p3), 1041408   ;;  %vm825_vm15 = vcmask (!%p213_p3), 1042432  }
   0xc   : > { %975 = vmatpush3.bf16.msra.mxu0 (!%p213_p3), %v1076_v2 }
   0xd   : > { %976 = vmatprep.subr.bf16.mxu0 (!%p213_p3), %v1103_v1 }
   0xe   : > { %s1272_s18 = smov (!%p245_p4, %s1093_s18), 1 }
   0xf   : > { %s1177_s28 = sshll.u32 %s1272_s18, 3 }
  0x10   : > { %s248_s6 = scalar_lea.vmem %s1261_s0, %s1177_s28  ;;  %s255_s9 = scalar_lea.vmem %s1262_s1, %s1177_s28  ;;  %977 = vmatpush3.bf16.msra.mxu0 %v1077_v5 }
  0x11   : > { %v363_v6 = vld [vmem:[%s255_s9] sm:$0xff]  ;;  %978 = vmatprep.subr.bf16.mxu0 %v1103_v1  ;;  %s259_s18 = scalar_lea.vmem %s1266_s5, %s1177_s28 }
  0x12   : > { %486 = vperm.xlu1 %1068, %v363_v6   ;;  %368 = vperm.xlu0 %1066, %v363_v6   ;;  %v265_v8 = vld [vmem:[%s248_s6] sm:$0xff] }
  0x13   : > { %v266_v9 = vpack.c.bf16 %v265_v8, %v265_v8 }
  0x14   : > { %979 = vmatpush3.bf16.msra.mxu0 %v1078_v7 }
  0x15   : > { %1002 = vmatprep.subr.bf16.mxu0 %v1103_v1 }
  0x16   : > { %1069 = vset.pattern.permute.xlu1 %v1107_v10  ;;  %1067 = vset.pattern.permute.xlu0 %v1108_v11 }
  0x17   : > { %542 = vperm.xlu1 %1069, %v363_v6   ;;  %430 = vperm.xlu0 %1067, %v363_v6  }
  0x18   : > { %981 = vmatmul.mubr.msk.bf16.vlgmr.msra.gmra.mrb[0].mxu0 %vm299_vm1, %v266_v9 }
  0x19   : > { %1004 = vmatprep.mubr.msk.bf16.mxu0 %vm1104_vm0, %v1103_v1 }
  0x1b   : > { %1070 = vset.pattern.permute.xlu1 %v1109_v12  ;;  %1071 = vset.pattern.permute.xlu0 %v1110_v13 }
  0x1c   : > { %598 = vperm.xlu1 %1070, %v363_v6   ;;  %654 = vperm.xlu0 %1071, %v363_v6  }
  0x20   : > { %1072 = vset.pattern.permute.xlu1 %v1111_v14  ;;  %1074 = vset.pattern.permute.xlu0 %v1112_v15 }
  0x21   : > { %710 = vperm.xlu1 %1072, %v363_v6  }
  0x25   : > { %1073 = vset.pattern.permute.xlu1 %v1112_v15 }
  0x26   : > { %766 = vperm.xlu1 %1073, %v363_v6  }
  0x91   : > { %v487_v22 = vpop.permute.xlu1 %486  ;;  %v369_v26 = vpop.permute.xlu0 %368 }
  0x92   : > { %vm370_vm4 = vcmp.eq.s32.totalorder %v366_v29, %v369_v26  ;;  %vm488_vm10 = vcmp.eq.s32.totalorder %v366_v29, %v487_v22 }
  0x93   : > { %v371_v34 = vsel %vm370_vm4, 1.0, %v1103_v1  ;;  %v489_v47 = vsel %vm488_vm10, 1.0, %v1103_v1 }
  0x94   : > { %v372_v38 = vpack.c.bf16 %v371_v34, %v371_v34  ;;  %v490_v49 = vpack.c.bf16 %v489_v47, %v489_v47 }
  0x96   : > { %v543_v30 = vpop.permute.xlu1 %542  ;;  %v431_v31 = vpop.permute.xlu0 %430 }
  0x97   : > { %vm544_vm3 = vcmp.eq.s32.totalorder %v366_v29, %v543_v30  ;;  %vm432_vm7 = vcmp.eq.s32.totalorder %v366_v29, %v431_v31 }
  0x98   : > { %v545_v33 = vsel %vm544_vm3, 1.0, %v1103_v1  ;;  %v433_v41 = vsel %vm432_vm7, 1.0, %v1103_v1  ;;  %vm832_vm3 = vcmask 1046528  }
  0x99   : > { %v546_v37 = vpack.c.bf16 %v545_v33, %v545_v33  ;;  %v434_v44 = vpack.c.bf16 %v433_v41, %v433_v41 }
  0x9b   : > { %v599_v32 = vpop.permute.xlu1 %598  ;;  %v655_v36 = vpop.permute.xlu0 %654 }
  0x9c   : > { %vm656_vm8 = vcmp.eq.s32.totalorder %v366_v29, %v655_v36  ;;  %vm600_vm11 = vcmp.eq.s32.totalorder %v366_v29, %v599_v32 }
  0x9d   : > { %v657_v42 = vsel %vm656_vm8, 1.0, %v1103_v1  ;;  %v601_v50 = vsel %vm600_vm11, 1.0, %v1103_v1 }
  0x9e   : > { %v658_v45 = vpack.c.bf16 %v657_v42, %v657_v42  ;;  %v602_v51 = vpack.c.bf16 %v601_v50, %v601_v50 }
  0xa0   : > { %v711_v40 = vpop.permute.xlu1 %710 }
  0xa1   : > { %vm712_vm12 = vcmp.eq.s32.totalorder %v366_v29, %v711_v40 }
  0xa2   : > { %v713_v52 = vsel %vm712_vm12, 1.0, %v1103_v1 }
  0xa3   : > { %v714_v53 = vpack.c.bf16 %v713_v52, %v713_v52 }
  0xa5   : > { %v767_v43 = vpop.permute.xlu1 %766 }
  0xa6   : > { %vm768_vm9 = vcmp.eq.s32.totalorder %v366_v29, %v767_v43 }
  0xa7   : > { %v769_v46 = vsel %vm768_vm9, 1.0, %v1103_v1 }
  0xa8   : > { %v770_v48 = vpack.c.bf16 %v769_v46, %v769_v46 }
  0xeb   : > { %v337_v17 = vpop.f32.mrb[0].mxu0 }
  0xec   : > { %v350_v19 = vmul.f32 %v939_v16, %v337_v17  ;;  %v982_v20 = vpop.f32.mrb[1].mxu0 }
  0xed   : > { %v340_v21 = vpop.f32.mrb[2].mxu0 }
  0xee   : > { %v358_v23 = vadd.f32 %v940_v18, %v350_v19  ;;  %v983_v24 = vpop.f32.mrb[3].mxu0 }
  0xf0   : > { %v359_v27 = vmax.f32 %v358_v23, 0.0 }
  0xf2   : > { %v360_v28 = vpack.c.bf16 %v359_v27, %v359_v27 }
  0xf4   : > { %362 = vst.msk [vmem:[#allocation2] sm:$0xf] %vm361_vm2, %v360_v28  ;;  %vm830_vm2 = vcmask 1045504  }
  0xfb   : > { %v364_v35 = vld [vmem:[#allocation2] sm:$0xf] }
  0xfc   : > { %v379_v39 = vsel %vm377_vm5, %v364_v35, 0 }
  0xfd   : > { %985 = vmatpush3.bf16.msra.mxu1 %v379_v39  ;;  %1003 = vmatpush3.bf16.msra.mxu0 %v379_v39 }
  0xfe   : > { %990 = vmatprep.subr.bf16.mxu1 %v1103_v1  ;;  %1014 = vmatprep.subr.bf16.mxu0 %v1103_v1 }
 0x100   : > { %987 = vmatmul.mubr.msk.bf16.vlgmr.msra.gmra.mrb[0].mxu1 %vm373_vm6, %v372_v38  ;;  %1005 = vmatmul.mubr.msk.bf16.vlgmr.msra.gmra.mrb[4].mxu0 %vm373_vm6, %v546_v37 }
 0x101   : > { %991 = vmatpush3.bf16.msra.mxu1 %v379_v39  ;;  %1015 = vmatpush3.bf16.msra.mxu0 %v379_v39 }
 0x102   : > { %992 = vmatprep.mubr.msk.bf16.mxu1 %vm1104_vm0, %v1103_v1  ;;  %996 = vmatprep.subr.bf16.mxu1 %v1103_v1 }
 0x103   : > { %1016 = vmatprep.mubr.msk.bf16.mxu0 %vm1104_vm0, %v1103_v1  ;;  %1026 = vmatprep.subr.bf16.mxu0 %v1103_v1 }
 0x108   : > { %993 = vmatmul.mubr.msk.bf16.vlgmr.msra.gmra.mrb[4].mxu1 %vm373_vm6, %v434_v44  ;;  %1017 = vmatmul.mubr.msk.bf16.vlgmr.msra.gmra.mrb[8].mxu0 %vm373_vm6, %v658_v45 }
 0x109   : > { %997 = vmatpush3.bf16.msra.mxu1 %v379_v39  ;;  %1027 = vmatpush3.bf16.msra.mxu0 %v379_v39 }
 0x10a   : > { %998 = vmatprep.mubr.msk.bf16.mxu1 %vm1104_vm0, %v1103_v1  ;;  %1008 = vmatprep.subr.bf16.mxu1 %v1103_v1 }
 0x10b   : > { %1028 = vmatprep.mubr.msk.bf16.mxu0 %vm1104_vm0, %v1103_v1 }
 0x110   : > { %999 = vmatmul.mubr.msk.bf16.vlgmr.msra.gmra.mrb[8].mxu1 %vm373_vm6, %v490_v49  ;;  %1029 = vmatmul.mubr.msk.bf16.vlgmr.msra.gmra.mrb[12].mxu0 %vm373_vm6, %v770_v48 }
 0x111   : > { %1009 = vmatpush3.bf16.msra.mxu1 %v379_v39  ;;  %1010 = vmatprep.mubr.msk.bf16.mxu1 %vm1104_vm0, %v1103_v1 }
 0x112   : > { %1020 = vmatprep.subr.bf16.mxu1 %v1103_v1 }
 0x118   : > { %1011 = vmatmul.mubr.msk.bf16.vlgmr.msra.gmra.mrb[12].mxu1 %vm373_vm6, %v602_v51 }
 0x119   : > { %1021 = vmatpush3.bf16.msra.mxu1 %v379_v39  ;;  %1022 = vmatprep.mubr.msk.bf16.mxu1 %vm1104_vm0, %v1103_v1  ;;  %vm828_vm0 = vcmask 1044480  }
 0x120   : > { %1023 = vmatmul.mubr.msk.bf16.vlgmr.msra.gmra.mrb[16].mxu1 %vm373_vm6, %v714_v53 }
 0x1d3   : > { %v415_v54 = vpop.f32.mrb[0].mxu1  ;;  %v584_v55 = vpop.f32.mrb[4].mxu0 }
 0x1d4   : > { %v422_v56 = vsel %vm299_vm1, %v415_v54, -inf  ;;  %v988_v57 = vpop.f32.mrb[1].mxu1  ;;  %v1006_v58 = vpop.f32.mrb[5].mxu0  ;;  %v590_v2 = vsel %vm299_vm1, %v584_v55, -inf }
 0x1d5   : > { %v423_v59 = vrot.slane %v422_v56, 4  ;;  %v418_v60 = vpop.f32.mrb[2].mxu1  ;;  %v587_v61 = vpop.f32.mrb[6].mxu0  ;;  %v591_v7 = vrot.slane %v590_v2, 4 }
 0x1d6   : > { %v989_v62 = vpop.f32.mrb[3].mxu1  ;;  %v1007_v63 = vpop.f32.mrb[7].mxu0 }
 0x1d7   : > { %v424_v0 = vmax.f32 %v422_v56, %v423_v59  ;;  %v592_v16 = vmax.f32 %v590_v2, %v591_v7 }
 0x1d9   : > { %v425_v3 = vrot.slane %v424_v0, 2  ;;  %v593_v23 = vrot.slane %v592_v16, 2 }
 0x1db   : > { %v472_v4 = vpop.f32.mrb[4].mxu1  ;;  %v696_v1 = vpop.f32.mrb[8].mxu0  ;;  %v426_v14 = vmax.f32 %v424_v0, %v425_v3  ;;  %v594_v37 = vmax.f32 %v592_v16, %v593_v23 }
 0x1dc   : > { %v478_v5 = vsel %vm299_vm1, %v472_v4, -inf  ;;  %v994_v6 = vpop.f32.mrb[5].mxu1  ;;  %v1018_v8 = vpop.f32.mrb[9].mxu0  ;;  %v702_v18 = vsel %vm299_vm1, %v696_v1, -inf }
 0x1dd   : > { %v479_v9 = vrot.slane %v478_v5, 4  ;;  %v475_v10 = vpop.f32.mrb[6].mxu1  ;;  %v699_v11 = vpop.f32.mrb[10].mxu0  ;;  %v427_v19 = vrot.slane %v426_v14, 1  ;;  %v703_v26 = vrot.slane %v702_v18, 4  ;;  %v595_v44 = vrot.slane %v594_v37, 1 }
 0x1de   : > { %v995_v12 = vpop.f32.mrb[7].mxu1  ;;  %v1019_v13 = vpop.f32.mrb[11].mxu0 }
 0x1df   : > { %v480_v15 = vmax.f32 %v478_v5, %v479_v9  ;;  %v428_v34 = vmax.f32 %v426_v14, %v427_v19  ;;  %v704_v38 = vmax.f32 %v702_v18, %v703_v26  ;;  %v596_v55 = vmax.f32 %v594_v37, %v595_v44 }
 0x1e1   : > { %v481_v17 = vrot.slane %v480_v15, 2  ;;  %v705_v45 = vrot.slane %v704_v38, 2 }
 0x1e3   : > { %v482_v20 = vmax.f32 %v480_v15, %v481_v17  ;;  %v528_v21 = vpop.f32.mrb[8].mxu1  ;;  %v808_v22 = vpop.f32.mrb[12].mxu0  ;;  %v706_v56 = vmax.f32 %v704_v38, %v705_v45 }
 0x1e4   : > { %v534_v24 = vsel %vm299_vm1, %v528_v21, -inf  ;;  %v1000_v25 = vpop.f32.mrb[9].mxu1  ;;  %v1030_v27 = vpop.f32.mrb[13].mxu0  ;;  %v814_v41 = vsel %vm299_vm1, %v808_v22, -inf }
 0x1e5   : > { %v483_v28 = vrot.slane %v482_v20, 1  ;;  %v535_v29 = vrot.slane %v534_v24, 4  ;;  %v531_v30 = vpop.f32.mrb[10].mxu1  ;;  %v811_v31 = vpop.f32.mrb[14].mxu0  ;;  %v815_v48 = vrot.slane %v814_v41, 4  ;;  %v707_v63 = vrot.slane %v706_v56, 1 }
 0x1e6   : > { %v1001_v32 = vpop.f32.mrb[11].mxu1  ;;  %v1031_v33 = vpop.f32.mrb[15].mxu0 }
 0x1e7   : > { %v484_v35 = vmax.f32 %v482_v20, %v483_v28  ;;  %v536_v36 = vmax.f32 %v534_v24, %v535_v29  ;;  %v816_v57 = vmax.f32 %v814_v41, %v815_v48  ;;  %v708_v9 = vmax.f32 %v706_v56, %v707_v63 }
 0x1e9   : > { %v822_v39 = vsel %vm821_vm13, %v428_v34, %v484_v35  ;;  %v537_v40 = vrot.slane %v536_v36, 2  ;;  %v817_v0 = vrot.slane %v816_v57, 2 }
 0x1eb   : > { %v538_v42 = vmax.f32 %v536_v36, %v537_v40  ;;  %v640_v43 = vpop.f32.mrb[12].mxu1  ;;  %v818_v10 = vmax.f32 %v816_v57, %v817_v0 }
 0x1ec   : > { %v646_v46 = vsel %vm299_vm1, %v640_v43, -inf  ;;  %v1012_v47 = vpop.f32.mrb[13].mxu1 }
 0x1ed   : > { %v539_v49 = vrot.slane %v538_v42, 1  ;;  %v647_v50 = vrot.slane %v646_v46, 4  ;;  %v643_v51 = vpop.f32.mrb[14].mxu1  ;;  %v819_v15 = vrot.slane %v818_v10, 1 }
 0x1ee   : > { %v1013_v52 = vpop.f32.mrb[15].mxu1 }
 0x1ef   : > { %v540_v53 = vmax.f32 %v538_v42, %v539_v49  ;;  %v648_v54 = vmax.f32 %v646_v46, %v647_v50  ;;  %v820_v18 = vmax.f32 %v818_v10, %v819_v15 }
 0x1f1   : > { %v824_v58 = vsel %vm823_vm14, %v822_v39, %v540_v53  ;;  %v649_v59 = vrot.slane %v648_v54, 2 }
 0x1f2   : > { %v826_v60 = vsel %vm825_vm15, %v824_v58, %v596_v55 }
 0x1f3   : > { %v650_v61 = vmax.f32 %v648_v54, %v649_v59  ;;  %v752_v62 = vpop.f32.mrb[16].mxu1 }
 0x1f4   : > { %v758_v2 = vsel %vm299_vm1, %v752_v62, -inf  ;;  %v1024_v3 = vpop.f32.mrb[17].mxu1 }
 0x1f5   : > { %v651_v4 = vrot.slane %v650_v61, 1  ;;  %v759_v1 = vrot.slane %v758_v2, 4  ;;  %v755_v5 = vpop.f32.mrb[18].mxu1 }
 0x1f6   : > { %v1025_v6 = vpop.f32.mrb[19].mxu1 }
 0x1f7   : > { %v652_v7 = vmax.f32 %v650_v61, %v651_v4  ;;  %v760_v8 = vmax.f32 %v758_v2, %v759_v1 }
 0x1f9   : > { %v827_v11 = vsel %vm377_vm5, %v826_v60, %v652_v7  ;;  %v761_v12 = vrot.slane %v760_v8, 2 }
 0x1fa   : > { %v829_v13 = vsel %vm828_vm0, %v827_v11, %v708_v9 }
 0x1fb   : > { %v762_v14 = vmax.f32 %v760_v8, %v761_v12 }
 0x1fd   : > { %v763_v16 = vrot.slane %v762_v14, 1 }
 0x1ff   : > { %v764_v17 = vmax.f32 %v762_v14, %v763_v16 }
 0x201   : > { %v831_v19 = vsel %vm830_vm2, %v829_v13, %v764_v17 }
 0x202   : > { %v833_v20 = vsel %vm832_vm3, %v831_v19, %v820_v18 }
 0x203   : > { %837 = vst.msk [vmem:[#allocation3] sm:$0xff] %vm299_vm1, %v833_v20 }
 0x20a   : > { %v848_v21 = vld [vmem:[#allocation3] sm:$0xff] }
 0x20b   : > { %849 = vst.msk [vmem:[%s259_s18] sm:$0xff] %vm299_vm1, %v848_v21 }
 0x20c PF: > { %s15_s20 = sadd.s32 1, %s1101_s20   ;;  %s1267_s18 = smov %s1097_s19 }
 0x20d   : > { %p12_p5 = scmp.ge.s32.totalorder %s15_s20, 4   ;;  %s1268_s19 = smov %s1270_s21 }
 0x20f   :  { %14 = sbr.rel (!%p12_p5) target bundleno = 2 (0x2), region = 89 }

// kernel: dgcnn_cls_forward.19
= control target key start
LH: loop header
LB: loop body
LE: loop exit
PB: predicated region body
PF: predicated region fallthrough
CT: control target
= control target key end

     0   :  { %v578_v3 = vmov 0   ;;  %vm213_vm0 = vcmask 523264   ;;  %s788_s1 = inlined_call_operand.vmem [shape: bf16[64,1024], index: 1, kind: input, shape index: {}]   ;;  %s789_s0 = inlined_call_operand.vmem [shape: f32[16,64], index: 0, kind: input, shape index: {}]   ;;  %s790_s2 = inlined_call_operand.vmem [shape: f32[1,1024], index: 2, kind: input, shape index: {}]   ;;  %s791_s3 = inlined_call_operand.vmem [shape: f32[1,1024], index: 3, kind: input, shape index: {}]   ;;  %s792_s4 = inlined_call_operand.vmem [shape: f32[16,1024], index: 4, kind: output, shape index: {}]  }
   0x1   :  { %v21_v0 = vld [vmem:[%s788_s1] sm:$0xff]  ;;  %v22_v2 = vld [vmem:[%s788_s1 + $0x8] sm:$0xff]  ;;  %249 = vmatprep.mubr.bf16.mxu0 %v578_v3  ;;  %292 = vmatprep.mubr.bf16.mxu1 %v578_v3  ;;  %v23_v31 = vld [vmem:[%s788_s1 + $0x10] sm:$0xff] }
   0x2   :  { %v25_v1 = vld [vmem:[%s788_s1 + $0x20] sm:$0xff]  ;;  %v26_v5 = vld [vmem:[%s788_s1 + $0x28] sm:$0xff]  ;;  %v27_v32 = vld [vmem:[%s788_s1 + $0x30] sm:$0xff] }
   0x3   :  { %v542_v4 = vcombine.high %v21_v0, %v25_v1  ;;  %v541_v6 = vcombine.low %v21_v0, %v25_v1  ;;  %v29_v7 = vld [vmem:[%s788_s1 + $0x40] sm:$0xff]  ;;  %v544_v9 = vcombine.high %v22_v2, %v26_v5  ;;  %v543_v10 = vcombine.low %v22_v2, %v26_v5  ;;  %v30_v12 = vld [vmem:[%s788_s1 + $0x48] sm:$0xff]  ;;  %v24_v33 = vld [vmem:[%s788_s1 + $0x18] sm:$0xff] }
   0x4   :  { %v33_v8 = vld [vmem:[%s788_s1 + $0x60] sm:$0xff]  ;;  %v34_v13 = vld [vmem:[%s788_s1 + $0x68] sm:$0xff]  ;;  %v28_v34 = vld [vmem:[%s788_s1 + $0x38] sm:$0xff]  ;;  %v546_v39 = vcombine.high %v23_v31, %v27_v32  ;;  %v545_v46 = vcombine.low %v23_v31, %v27_v32 }
   0x5   :  { %v550_v11 = vcombine.high %v29_v7, %v33_v8  ;;  %v37_v14 = vld [vmem:[%s788_s1 + $0x80] sm:$0xff]  ;;  %217 = vmatprep.subr.bf16.mxu0 %v542_v4  ;;  %v552_v15 = vcombine.high %v30_v12, %v34_v13  ;;  %v38_v17 = vld [vmem:[%s788_s1 + $0x88] sm:$0xff]  ;;  %260 = vmatprep.subr.bf16.mxu1 %v544_v9  ;;  %v549_v19 = vcombine.low %v29_v7, %v33_v8  ;;  %v31_v41 = vld [vmem:[%s788_s1 + $0x50] sm:$0xff] }
   0x6   :  { %v41_v16 = vld [vmem:[%s788_s1 + $0xa0] sm:$0xff]  ;;  %v42_v18 = vld [vmem:[%s788_s1 + $0xa8] sm:$0xff]  ;;  %218 = vmatpush1.bf16.msra.mxu0 %v541_v6  ;;  %261 = vmatpush1.bf16.msra.mxu1 %v543_v10  ;;  %v551_v20 = vcombine.low %v30_v12, %v34_v13  ;;  %v548_v40 = vcombine.high %v24_v33, %v28_v34  ;;  %v35_v42 = vld [vmem:[%s788_s1 + $0x70] sm:$0xff]  ;;  %v547_v47 = vcombine.low %v24_v33, %v28_v34 }
   0x7   :  { %219 = vmatprep.subr.bf16.mxu0 %v550_v11  ;;  %v558_v21 = vcombine.high %v37_v14, %v41_v16  ;;  %262 = vmatprep.subr.bf16.mxu1 %v552_v15  ;;  %v560_v22 = vcombine.high %v38_v17, %v42_v18  ;;  %v45_v23 = vld [vmem:[%s788_s1 + $0xc0] sm:$0xff]  ;;  %v46_v25 = vld [vmem:[%s788_s1 + $0xc8] sm:$0xff]  ;;  %v557_v27 = vcombine.low %v37_v14, %v41_v16  ;;  %v32_v44 = vld [vmem:[%s788_s1 + $0x58] sm:$0xff] }
   0x8   :  { %v49_v24 = vld [vmem:[%s788_s1 + $0xe0] sm:$0xff]  ;;  %v50_v26 = vld [vmem:[%s788_s1 + $0xe8] sm:$0xff]  ;;  %v559_v28 = vcombine.low %v38_v17, %v42_v18  ;;  %v36_v45 = vld [vmem:[%s788_s1 + $0x78] sm:$0xff]  ;;  %v554_v48 = vcombine.high %v31_v41, %v35_v42  ;;  %v553_v54 = vcombine.low %v31_v41, %v35_v42 }
   0x9   :  { %v566_v29 = vcombine.high %v45_v23, %v49_v24  ;;  %v568_v30 = vcombine.high %v46_v25, %v50_v26  ;;  %v565_v35 = vcombine.low %v45_v23, %v49_v24  ;;  %v18_v36 = vld [vmem:[%s789_s0] sm:$0xff]  ;;  %v19_v37 = vld [vmem:[%s789_s0 + $0x8] sm:$0xff]  ;;  %v567_v38 = vcombine.low %v46_v25, %v50_v26  ;;  %v39_v50 = vld [vmem:[%s788_s1 + $0x90] sm:$0xff] }
   0xa   :  { %220 = vmatpush1.bf16.msra.mxu0 %v549_v19  ;;  %263 = vmatpush1.bf16.msra.mxu1 %v551_v20  ;;  %v20_v43 = vpack.c.bf16 %v19_v37, %v18_v36  ;;  %v556_v49 = vcombine.high %v32_v44, %v36_v45  ;;  %v43_v51 = vld [vmem:[%s788_s1 + $0xb0] sm:$0xff]  ;;  %v40_v52 = vld [vmem:[%s788_s1 + $0x98] sm:$0xff]  ;;  %v555_v55 = vcombine.low %v32_v44, %v36_v45  ;;  %v389_v7 = vld [vmem:[%s790_s2] sm:$0xff] }
   0xb   :  { %221 = vmatprep.subr.bf16.mxu0 %v558_v21  ;;  %264 = vmatprep.subr.bf16.mxu1 %v560_v22  ;;  %v44_v53 = vld [vmem:[%s788_s1 + $0xb8] sm:$0xff]  ;;  %v562_v56 = vcombine.high %v39_v50, %v43_v51  ;;  %v47_v58 = vld [vmem:[%s788_s1 + $0xd0] sm:$0xff]  ;;  %v561_v62 = vcombine.low %v39_v50, %v43_v51  ;;  %v726_v11 = vld [vmem:[%s791_s3] sm:$0xff] }
   0xc   :  { %v564_v57 = vcombine.high %v40_v52, %v44_v53  ;;  %v51_v59 = vld [vmem:[%s788_s1 + $0xf0] sm:$0xff]  ;;  %v48_v60 = vld [vmem:[%s788_s1 + $0xd8] sm:$0xff]  ;;  %v563_v63 = vcombine.low %v40_v52, %v44_v53 }
   0xd   :  { %v52_v61 = vld [vmem:[%s788_s1 + $0xf8] sm:$0xff]  ;;  %v570_v0 = vcombine.high %v47_v58, %v51_v59  ;;  %v569_v2 = vcombine.low %v47_v58, %v51_v59 }
   0xe   :  { %222 = vmatpush1.bf16.msra.mxu0 %v557_v27  ;;  %265 = vmatpush1.bf16.msra.mxu1 %v559_v28  ;;  %v572_v1 = vcombine.high %v48_v60, %v52_v61  ;;  %v571_v4 = vcombine.low %v48_v60, %v52_v61 }
   0xf   :  { %223 = vmatprep.subr.bf16.mxu0 %v566_v29  ;;  %266 = vmatprep.subr.bf16.mxu1 %v568_v30 }
  0x12   :  { %224 = vmatpush1.bf16.msra.mxu0 %v565_v35  ;;  %267 = vmatpush1.bf16.msra.mxu1 %v567_v38 }
  0x13   :  { %303 = vmatprep.subr.bf16.mxu0 %v546_v39  ;;  %346 = vmatprep.subr.bf16.mxu1 %v548_v40 }
  0x15   :  { %573 = vmatmul.mubr.msk.bf16.vlgmr.msra.gmra.mrb[0].mxu0 %vm213_vm0, %v20_v43  ;;  %574 = vmatmul.mubr.msk.bf16.vlgmr.msra.gmra.mrb[0].mxu1 %vm213_vm0, %v20_v43 }
  0x16   :  { %304 = vmatpush1.bf16.msra.mxu0 %v545_v46  ;;  %347 = vmatpush1.bf16.msra.mxu1 %v547_v47 }
  0x17   :  { %305 = vmatprep.subr.bf16.mxu0 %v554_v48  ;;  %348 = vmatprep.subr.bf16.mxu1 %v556_v49 }
  0x18   :  { %335 = vmatprep.mubr.bf16.mxu0 %v578_v3  ;;  %378 = vmatprep.mubr.bf16.mxu1 %v578_v3  ;;  %v391_v3 = vlaneseq }
  0x1a   :  { %306 = vmatpush1.bf16.msra.mxu0 %v553_v54  ;;  %349 = vmatpush1.bf16.msra.mxu1 %v555_v55  ;;  %v714_v5 = vshrl.u32 %v391_v3, 7 }
  0x1b   :  { %307 = vmatprep.subr.bf16.mxu0 %v562_v56  ;;  %350 = vmatprep.subr.bf16.mxu1 %v564_v57 }
  0x1c   :  { %v393_v6 = vsub.s32 0, %v714_v5  ;;  %v401_v8 = vsub.s32 2, %v714_v5  ;;  %v397_v9 = vsub.s32 1, %v714_v5  ;;  %v405_v10 = vsub.s32 3, %v714_v5 }
  0x1d   :  { %v409_v52 = vsub.s32 4, %v714_v5  ;;  %v417_v53 = vsub.s32 6, %v714_v5  ;;  %v413_v54 = vsub.s32 5, %v714_v5  ;;  %v421_v55 = vsub.s32 7, %v714_v5 }
  0x1e   :  { %308 = vmatpush1.bf16.msra.mxu0 %v561_v62  ;;  %351 = vmatpush1.bf16.msra.mxu1 %v563_v63  ;;  %v394_v12 = vrot.slane %v389_v7, %v393_v6  ;;  %v402_v13 = vrot.slane %v389_v7, %v401_v8  ;;  %v398_v14 = vrot.slane %v389_v7, %v397_v9 }
  0x1f   :  { %309 = vmatprep.subr.bf16.mxu0 %v570_v0  ;;  %352 = vmatprep.subr.bf16.mxu1 %v572_v1  ;;  %v452_v15 = vrot.slane %v726_v11, %v393_v6  ;;  %v406_v16 = vrot.slane %v389_v7, %v405_v10  ;;  %v460_v18 = vrot.slane %v726_v11, %v401_v8 }
  0x20   :  { %v456_v19 = vrot.slane %v726_v11, %v397_v9  ;;  %v464_v23 = vrot.slane %v726_v11, %v405_v10  ;;  %v410_v56 = vrot.slane %v389_v7, %v409_v52  ;;  %v418_v57 = vrot.slane %v389_v7, %v417_v53 }
  0x21   :  { %v414_v58 = vrot.slane %v389_v7, %v413_v54  ;;  %v468_v59 = vrot.slane %v726_v11, %v409_v52  ;;  %v422_v60 = vrot.slane %v389_v7, %v421_v55  ;;  %v476_v62 = vrot.slane %v726_v11, %v417_v53 }
  0x22   :  { %310 = vmatpush1.bf16.msra.mxu0 %v569_v2  ;;  %353 = vmatpush1.bf16.msra.mxu1 %v571_v4  ;;  %v472_v63 = vrot.slane %v726_v11, %v413_v54  ;;  %v480_v4 = vrot.slane %v726_v11, %v421_v55 }
  0x25   :  { %575 = vmatmul.mubr.msk.bf16.vlgmr.msra.gmra.mrb[4].mxu0 %vm213_vm0, %v20_v43  ;;  %576 = vmatmul.mubr.msk.bf16.vlgmr.msra.gmra.mrb[4].mxu1 %vm213_vm0, %v20_v43 }
  0xe8   :  { %v251_v17 = vpop.f32.mrb[0].mxu0  ;;  %v294_v21 = vpop.f32.mrb[0].mxu1 }
  0xe9   :  { %v431_v20 = vmul.f32 %v394_v12, %v251_v17  ;;  %v253_v22 = vpop.f32.mrb[1].mxu0  ;;  %v433_v24 = vmul.f32 %v402_v13, %v294_v21  ;;  %v296_v26 = vpop.f32.mrb[1].mxu1 }
  0xea   :  { %v432_v25 = vmul.f32 %v398_v14, %v253_v22  ;;  %v255_v27 = vpop.f32.mrb[2].mxu0  ;;  %v434_v29 = vmul.f32 %v406_v16, %v296_v26  ;;  %v298_v31 = vpop.f32.mrb[2].mxu1 }
  0xeb   :  { %v489_v28 = vadd.f32 %v452_v15, %v431_v20  ;;  %v439_v30 = vmul.f32 %v394_v12, %v255_v27  ;;  %v257_v32 = vpop.f32.mrb[3].mxu0  ;;  %v491_v33 = vadd.f32 %v460_v18, %v433_v24  ;;  %v441_v35 = vmul.f32 %v402_v13, %v298_v31  ;;  %v300_v37 = vpop.f32.mrb[3].mxu1 }
  0xec   :  { %v490_v34 = vadd.f32 %v456_v19, %v432_v25  ;;  %v440_v36 = vmul.f32 %v398_v14, %v257_v32  ;;  %v492_v39 = vadd.f32 %v464_v23, %v434_v29  ;;  %v442_v41 = vmul.f32 %v406_v16, %v300_v37 }
  0xed   :  { %v505_v38 = vmax.f32 %v489_v28, 0.0  ;;  %v497_v40 = vadd.f32 %v452_v15, %v439_v30  ;;  %v507_v42 = vmax.f32 %v491_v33, 0.0  ;;  %v499_v44 = vadd.f32 %v460_v18, %v441_v35 }
  0xee   :  { %v506_v43 = vmax.f32 %v490_v34, 0.0  ;;  %v498_v45 = vadd.f32 %v456_v19, %v440_v36  ;;  %v508_v46 = vmax.f32 %v492_v39, 0.0  ;;  %v500_v48 = vadd.f32 %v464_v23, %v442_v41 }
  0xef   :  { %521 = vst [vmem:[%s792_s4] sm:$0xff] %v505_v38  ;;  %v513_v47 = vmax.f32 %v497_v40, 0.0  ;;  %523 = vst [vmem:[%s792_s4 + $0x10] sm:$0xff] %v507_v42  ;;  %v515_v49 = vmax.f32 %v499_v44, 0.0 }
  0xf0   :  { %522 = vst [vmem:[%s792_s4 + $0x8] sm:$0xff] %v506_v43  ;;  %v514_v50 = vmax.f32 %v498_v45, 0.0  ;;  %524 = vst [vmem:[%s792_s4 + $0x18] sm:$0xff] %v508_v46  ;;  %v516_v51 = vmax.f32 %v500_v48, 0.0 }
  0xf1   :  { %529 = vst [vmem:[%s792_s4 + $0x40] sm:$0xff] %v513_v47  ;;  %531 = vst [vmem:[%s792_s4 + $0x50] sm:$0xff] %v515_v49 }
  0xf2   :  { %530 = vst [vmem:[%s792_s4 + $0x48] sm:$0xff] %v514_v50  ;;  %532 = vst [vmem:[%s792_s4 + $0x58] sm:$0xff] %v516_v51 }
  0xf8   :  { %v337_v61 = vpop.f32.mrb[4].mxu0  ;;  %v380_v1 = vpop.f32.mrb[4].mxu1 }
  0xf9   :  { %v435_v0 = vmul.f32 %v410_v56, %v337_v61  ;;  %v339_v2 = vpop.f32.mrb[5].mxu0  ;;  %v437_v3 = vmul.f32 %v418_v57, %v380_v1  ;;  %v382_v8 = vpop.f32.mrb[5].mxu1 }
  0xfa   :  { %v436_v6 = vmul.f32 %v414_v58, %v339_v2  ;;  %v341_v5 = vpop.f32.mrb[6].mxu0  ;;  %v438_v10 = vmul.f32 %v422_v60, %v382_v8  ;;  %v384_v13 = vpop.f32.mrb[6].mxu1 }
  0xfb   :  { %v493_v9 = vadd.f32 %v468_v59, %v435_v0  ;;  %v443_v12 = vmul.f32 %v410_v56, %v341_v5  ;;  %v343_v14 = vpop.f32.mrb[7].mxu0  ;;  %v495_v7 = vadd.f32 %v476_v62, %v437_v3  ;;  %v445_v16 = vmul.f32 %v418_v57, %v384_v13  ;;  %v386_v18 = vpop.f32.mrb[7].mxu1 }
  0xfc   :  { %v494_v15 = vadd.f32 %v472_v63, %v436_v6  ;;  %v444_v17 = vmul.f32 %v414_v58, %v343_v14  ;;  %v496_v20 = vadd.f32 %v480_v4, %v438_v10  ;;  %v446_v22 = vmul.f32 %v422_v60, %v386_v18 }
  0xfd   :  { %v509_v19 = vmax.f32 %v493_v9, 0.0  ;;  %v501_v21 = vadd.f32 %v468_v59, %v443_v12  ;;  %v511_v23 = vmax.f32 %v495_v7, 0.0  ;;  %v503_v24 = vadd.f32 %v476_v62, %v445_v16 }
  0xfe   :  { %v510_v11 = vmax.f32 %v494_v15, 0.0  ;;  %v502_v25 = vadd.f32 %v472_v63, %v444_v17  ;;  %v512_v26 = vmax.f32 %v496_v20, 0.0  ;;  %v504_v28 = vadd.f32 %v480_v4, %v446_v22 }
  0xff   :  { %525 = vst [vmem:[%s792_s4 + $0x20] sm:$0xff] %v509_v19  ;;  %v517_v27 = vmax.f32 %v501_v21, 0.0  ;;  %527 = vst [vmem:[%s792_s4 + $0x30] sm:$0xff] %v511_v23  ;;  %v519_v29 = vmax.f32 %v503_v24, 0.0 }
 0x100   :  { %526 = vst [vmem:[%s792_s4 + $0x28] sm:$0xff] %v510_v11  ;;  %v518_v30 = vmax.f32 %v502_v25, 0.0  ;;  %528 = vst [vmem:[%s792_s4 + $0x38] sm:$0xff] %v512_v26  ;;  %v520_v31 = vmax.f32 %v504_v28, 0.0 }
 0x101   :  { %533 = vst [vmem:[%s792_s4 + $0x60] sm:$0xff] %v517_v27  ;;  %535 = vst [vmem:[%s792_s4 + $0x70] sm:$0xff] %v519_v29 }
 0x102   :  { %534 = vst [vmem:[%s792_s4 + $0x68] sm:$0xff] %v518_v30  ;;  %536 = vst [vmem:[%s792_s4 + $0x78] sm:$0xff] %v520_v31 }

// kernel: dgcnn_cls_forward.21
= control target key start
LH: loop header
LB: loop body
LE: loop exit
PB: predicated region body
PF: predicated region fallthrough
CT: control target
= control target key end

     0   :  { %16 = vsyncpa [#allocation3], 0  ;;  %s3709_s0 = inlined_call_operand.vmem [shape: f32[2,1024], index: 0, kind: input, shape index: {}]   ;;  %s3710_s1 = inlined_call_operand.hbm [shape: bf16[1024,512], index: 1, kind: input, shape index: {}]   ;;  %s3711_s2 = inlined_call_operand.vmem [shape: f32[1,512], index: 2, kind: input, shape index: {}]   ;;  %s3712_s3 = inlined_call_operand.vmem [shape: f32[1,512], index: 3, kind: input, shape index: {}]   ;;  %s3713_s4 = inlined_call_operand.vmem [shape: f32[1,512], index: 4, kind: input, shape index: {}]   ;;  %s3714_s5 = inlined_call_operand.vmem [shape: bf16[512,128], index: 5, kind: input, shape index: {}]   ;;  %s3715_s6 = inlined_call_operand.vmem [shape: f32[1,128], index: 6, kind: input, shape index: {}]   ;;  %s3716_s7 = inlined_call_operand.vmem [shape: f32[1,128], index: 7, kind: input, shape index: {}]   ;;  %s3717_s8 = inlined_call_operand.vmem [shape: f32[1,128], index: 8, kind: input, shape index: {}]   ;;  %s3718_s9 = inlined_call_operand.vmem [shape: bf16[128,16], index: 9, kind: input, shape index: {}]   ;;  %s3719_s10 = inlined_call_operand.vmem [shape: f32[1,16], index: 10, kind: input, shape index: {}]   ;;  %s3720_s11 = inlined_call_operand.hbm [shape: f32[2,16], index: 11, kind: output, shape index: {}]  }
   0x1   :  { %17 = vsyncpa [#allocation4], 0  ;;  %s3426_s17 = smov [#allocation2]   ;;  %s3378_s21 = scalar_lea.hbm %s3710_s1, 32768 }
   0x2   :  { %s25_s18 = sshll.u32 %s3426_s17, 4  ;;  %p3379_p0 = scmp.ne.s32.totalorder %s3710_s1, %s3378_s21  ;;  %s26_s18 = int_to_ptr.vmem [resolvable:$true] %s25_s18 }
   0x3   :  { %p3382_p1 = scmp.lt.u32.totalorder %s3378_s21, %s3710_s1 }
   0x5   :  { %p3384_p2 = pnand %p3382_p1, %p3379_p0 }
   0x7   :  { %3387 = shalt.err (!%p3384_p2)
}
   0x8   :  { %s3388_s26 = scalar_lea.vmem %s26_s18, 32768  ;;  %p3393_p4 = scmp.lt.s32.totalorder %s26_s18, %s26_s18 }
   0x9   :  { %p3389_p3 = scmp.ne.s32.totalorder %s26_s18, %s3388_s26  ;;  %p3394_p5 = scmp.lt.s32.totalorder %s3388_s26, %s3388_s26 }
   0xb   :  { %p3395_p6 = por %p3394_p5, %p3393_p4 }
   0xd   :  { %p3396_p7 = pnand %p3395_p6, %p3389_p3 }
   0xf   :  { %3399 = shalt.err (!%p3396_p7)
}
  0x10   :  { %s3427_s27 = smov 256   ;;  %s3428_s28 = smov 16  }
  0x11   :  { %31 = dma.hbm_to_vmem [thread:$0]  %s3710_s1, 32768, %s26_s18, [#allocation3], %s3427_s27, %s3427_s27, %s3428_s28  }
  0x12   :  { %3422 = dma.done.wait [#allocation3], 32768  }
  0x13   :  { %3423 = vsyncadd [#allocation3], 4294934528  ;;  %v2952_v0 = vld [vmem:[#allocation2 + $0x4] ss:$16 sps:$4 sm:$0xff]   ;;  %v2954_v1 = vld [vmem:[#allocation2 + $0xc] ss:$16 sps:$4 sm:$0xff]   ;;  %v62_v38 = vlaneseq }
  0x14   :  { %1666 = vmatprep.subr.bf16.mxu0 %v2952_v0  ;;  %v2956_v2 = vld [vmem:[#allocation2] ss:$16 sps:$4 sm:$0xff]   ;;  %v2957_v3 = vld [vmem:[#allocation2 + $0x8] ss:$16 sps:$4 sm:$0xff]   ;;  %1830 = vmatprep.subr.bf16.mxu1 %v2954_v1  ;;  %v2958_v4 = vld [vmem:[#allocation2 + $0x24] ss:$16 sps:$4 sm:$0xff]  }
  0x15   :  { %1667 = vmatpush1.bf16.msra.mxu0 %v2956_v2  ;;  %1831 = vmatpush1.bf16.msra.mxu1 %v2957_v3  ;;  %v2960_v5 = vld [vmem:[#allocation2 + $0x2c] ss:$16 sps:$4 sm:$0xff]   ;;  %v2962_v6 = vld [vmem:[#allocation2 + $0x20] ss:$16 sps:$4 sm:$0xff]   ;;  %v2963_v7 = vld [vmem:[#allocation2 + $0x28] ss:$16 sps:$4 sm:$0xff]  }
  0x16   :  { %1668 = vmatprep.subr.bf16.mxu0 %v2958_v4  ;;  %1832 = vmatprep.subr.bf16.mxu1 %v2960_v5  ;;  %v2964_v8 = vld [vmem:[#allocation2 + $0x44] ss:$16 sps:$4 sm:$0xff]   ;;  %v2966_v9 = vld [vmem:[#allocation2 + $0x4c] ss:$16 sps:$4 sm:$0xff]   ;;  %v2968_v10 = vld [vmem:[#allocation2 + $0x40] ss:$16 sps:$4 sm:$0xff]  }
  0x17   :  { %v2969_v11 = vld [vmem:[#allocation2 + $0x48] ss:$16 sps:$4 sm:$0xff]   ;;  %v2970_v12 = vld [vmem:[#allocation2 + $0x64] ss:$16 sps:$4 sm:$0xff]   ;;  %v2972_v13 = vld [vmem:[#allocation2 + $0x6c] ss:$16 sps:$4 sm:$0xff]  }
  0x18   :  { %v2974_v14 = vld [vmem:[#allocation2 + $0x60] ss:$16 sps:$4 sm:$0xff]   ;;  %v2975_v15 = vld [vmem:[#allocation2 + $0x68] ss:$16 sps:$4 sm:$0xff]   ;;  %v2976_v16 = vld [vmem:[#allocation2 + $0x84] ss:$16 sps:$4 sm:$0xff]  }
  0x19   :  { %1669 = vmatpush1.bf16.msra.mxu0 %v2962_v6  ;;  %1833 = vmatpush1.bf16.msra.mxu1 %v2963_v7  ;;  %v2978_v17 = vld [vmem:[#allocation2 + $0x8c] ss:$16 sps:$4 sm:$0xff]   ;;  %v2980_v18 = vld [vmem:[#allocation2 + $0x80] ss:$16 sps:$4 sm:$0xff]   ;;  %v2981_v19 = vld [vmem:[#allocation2 + $0x88] ss:$16 sps:$4 sm:$0xff]  }
  0x1a   :  { %1670 = vmatprep.subr.bf16.mxu0 %v2964_v8  ;;  %1834 = vmatprep.subr.bf16.mxu1 %v2966_v9  ;;  %v2982_v20 = vld [vmem:[#allocation2 + $0xa4] ss:$16 sps:$4 sm:$0xff]   ;;  %v2984_v21 = vld [vmem:[#allocation2 + $0xac] ss:$16 sps:$4 sm:$0xff]   ;;  %v2986_v22 = vld [vmem:[#allocation2 + $0xa0] ss:$16 sps:$4 sm:$0xff]  }
  0x1b   :  { %v2987_v23 = vld [vmem:[#allocation2 + $0xa8] ss:$16 sps:$4 sm:$0xff]   ;;  %v2988_v24 = vld [vmem:[#allocation2 + $0xc4] ss:$16 sps:$4 sm:$0xff]   ;;  %v2990_v25 = vld [vmem:[#allocation2 + $0xcc] ss:$16 sps:$4 sm:$0xff]  }
  0x1c   :  { %v2992_v26 = vld [vmem:[#allocation2 + $0xc0] ss:$16 sps:$4 sm:$0xff]   ;;  %v2993_v27 = vld [vmem:[#allocation2 + $0xc8] ss:$16 sps:$4 sm:$0xff]   ;;  %v2994_v28 = vld [vmem:[#allocation2 + $0xe4] ss:$16 sps:$4 sm:$0xff]  }
  0x1d   :  { %1671 = vmatpush1.bf16.msra.mxu0 %v2968_v10  ;;  %1835 = vmatpush1.bf16.msra.mxu1 %v2969_v11  ;;  %v2996_v29 = vld [vmem:[#allocation2 + $0xec] ss:$16 sps:$4 sm:$0xff]   ;;  %v2998_v30 = vld [vmem:[#allocation2 + $0xe0] ss:$16 sps:$4 sm:$0xff]   ;;  %v2999_v31 = vld [vmem:[#allocation2 + $0xe8] ss:$16 sps:$4 sm:$0xff]  }
  0x1e   :  { %1672 = vmatprep.subr.bf16.mxu0 %v2970_v12  ;;  %1836 = vmatprep.subr.bf16.mxu1 %v2972_v13  ;;  %v3000_v32 = vld [vmem:[#allocation2 + $0x104] ss:$16 sps:$4 sm:$0xff]   ;;  %v3002_v33 = vld [vmem:[#allocation2 + $0x10c] ss:$16 sps:$4 sm:$0xff]   ;;  %v3004_v34 = vld [vmem:[#allocation2 + $0x100] ss:$16 sps:$4 sm:$0xff]  }
  0x1f   :  { %v3005_v35 = vld [vmem:[#allocation2 + $0x108] ss:$16 sps:$4 sm:$0xff]   ;;  %v3429_v36 = vmov 1983009808   ;;  %v3006_v39 = vld [vmem:[#allocation2 + $0x124] ss:$16 sps:$4 sm:$0xff]  }
  0x20   :  { %v60_v37 = vunpack.c.l.s4 %v3429_v36  ;;  %v3008_v40 = vld [vmem:[#allocation2 + $0x12c] ss:$16 sps:$4 sm:$0xff]   ;;  %v3010_v41 = vld [vmem:[#allocation2 + $0x120] ss:$16 sps:$4 sm:$0xff]   ;;  %v3505_v43 = vshrl.u32 %v62_v38, 7  ;;  %vm3431_vm0 = vmmov 0  }
  0x21   :  { %1673 = vmatpush1.bf16.msra.mxu0 %v2974_v14  ;;  %1837 = vmatpush1.bf16.msra.mxu1 %v2975_v15  ;;  %v3011_v44 = vld [vmem:[#allocation2 + $0x128] ss:$16 sps:$4 sm:$0xff]   ;;  %v3012_v45 = vld [vmem:[#allocation2 + $0x144] ss:$16 sps:$4 sm:$0xff]   ;;  %v3014_v46 = vld [vmem:[#allocation2 + $0x14c] ss:$16 sps:$4 sm:$0xff]  }
  0x22   :  { %1674 = vmatprep.subr.bf16.mxu0 %v2976_v16  ;;  %1838 = vmatprep.subr.bf16.mxu1 %v2978_v17  ;;  %v61_v42 = vunpack.c.0.s8 %v60_v37  ;;  %v3016_v47 = vld [vmem:[#allocation2 + $0x140] ss:$16 sps:$4 sm:$0xff]   ;;  %v3017_v48 = vld [vmem:[#allocation2 + $0x148] ss:$16 sps:$4 sm:$0xff]   ;;  %v3018_v50 = vld [vmem:[#allocation2 + $0x164] ss:$16 sps:$4 sm:$0xff]  }
  0x23   :  { %v3020_v51 = vld [vmem:[#allocation2 + $0x16c] ss:$16 sps:$4 sm:$0xff]   ;;  %v54_v52 = vld [vmem:[%s3709_s0] sm:$0xff]  ;;  %v3023_v55 = vld [vmem:[#allocation2 + $0x168] ss:$16 sps:$4 sm:$0xff]   ;;  %s3432_s17 = smov [#allocation5]  }
  0x24   :  { %v3508_v49 = vsub.s32 %v61_v42, %v3505_v43  ;;  %v3022_v53 = vld [vmem:[#allocation2 + $0x160] ss:$16 sps:$4 sm:$0xff]   ;;  %v3024_v56 = vld [vmem:[#allocation2 + $0x184] ss:$16 sps:$4 sm:$0xff]   ;;  %v3026_v57 = vld [vmem:[#allocation2 + $0x18c] ss:$16 sps:$4 sm:$0xff]   ;;  %v58_v4 = vcombine.high %v54_v52, %v54_v52 }
  0x25   :  { %1675 = vmatpush1.bf16.msra.mxu0 %v2980_v18  ;;  %1839 = vmatpush1.bf16.msra.mxu1 %v2981_v19  ;;  %v3028_v59 = vld [vmem:[#allocation2 + $0x180] ss:$16 sps:$4 sm:$0xff]   ;;  %v3029_v61 = vld [vmem:[#allocation2 + $0x188] ss:$16 sps:$4 sm:$0xff]   ;;  %v3030_v62 = vld [vmem:[#allocation2 + $0x1a4] ss:$16 sps:$4 sm:$0xff]  }
  0x26   :  { %1676 = vmatprep.subr.bf16.mxu0 %v2982_v20  ;;  %1840 = vmatprep.subr.bf16.mxu1 %v2984_v21  ;;  %v65_v54 = vrot.slane %v54_v52, %v3508_v49  ;;  %v3032_v63 = vld [vmem:[#allocation2 + $0x1ac] ss:$16 sps:$4 sm:$0xff]   ;;  %v3034_v0 = vld [vmem:[#allocation2 + $0x1a0] ss:$16 sps:$4 sm:$0xff]   ;;  %v3035_v1 = vld [vmem:[#allocation2 + $0x1a8] ss:$16 sps:$4 sm:$0xff]   ;;  %v3515_v9 = vrot.slane %v58_v4, %v3508_v49 }
  0x27   :  { %v3036_v2 = vld [vmem:[#allocation2 + $0x1c4] ss:$16 sps:$4 sm:$0xff]   ;;  %v3038_v3 = vld [vmem:[#allocation2 + $0x1cc] ss:$16 sps:$4 sm:$0xff]   ;;  %v3040_v5 = vld [vmem:[#allocation2 + $0x1c0] ss:$16 sps:$4 sm:$0xff]  }
  0x28   :  { %v73_v58 = vcombine.high %v65_v54, %v65_v54  ;;  %v3041_v6 = vld [vmem:[#allocation2 + $0x1c8] ss:$16 sps:$4 sm:$0xff]   ;;  %v3042_v7 = vld [vmem:[#allocation2 + $0x1e4] ss:$16 sps:$4 sm:$0xff]   ;;  %v3044_v8 = vld [vmem:[#allocation2 + $0x1ec] ss:$16 sps:$4 sm:$0xff]   ;;  %v74_v14 = vcombine.high %v3515_v9, %v3515_v9  ;;  %v100_v16 = vpack.c.bf16 %v65_v54, %v65_v54 }
  0x29   :  { %1677 = vmatpush1.bf16.msra.mxu0 %v2986_v22  ;;  %1841 = vmatpush1.bf16.msra.mxu1 %v2987_v23  ;;  %v3046_v10 = vld [vmem:[#allocation2 + $0x1e0] ss:$16 sps:$4 sm:$0xff]   ;;  %v3047_v11 = vld [vmem:[#allocation2 + $0x1e8] ss:$16 sps:$4 sm:$0xff]   ;;  %v3051_v12 = vld [vmem:[#allocation2 + $0x204] ss:$16 sps:$4 sm:$0xff]  }
  0x2a   :  { %1678 = vmatprep.subr.bf16.mxu0 %v2988_v24  ;;  %1842 = vmatprep.subr.bf16.mxu1 %v2990_v25  ;;  %v101_v60 = vpack.c.bf16 %v73_v58, %v73_v58  ;;  %v3054_v13 = vld [vmem:[#allocation2 + $0x20c] ss:$16 sps:$4 sm:$0xff]   ;;  %v3049_v15 = vld [vmem:[#allocation2 + $0x200] ss:$16 sps:$4 sm:$0xff]   ;;  %v3052_v17 = vld [vmem:[#allocation2 + $0x208] ss:$16 sps:$4 sm:$0xff]   ;;  %v103_v20 = vpack.c.bf16 %v74_v14, %v74_v14 }
  0x2b   :  { %v3057_v18 = vld [vmem:[#allocation2 + $0x224] ss:$16 sps:$4 sm:$0xff]   ;;  %v3060_v19 = vld [vmem:[#allocation2 + $0x22c] ss:$16 sps:$4 sm:$0xff]   ;;  %v3055_v21 = vld [vmem:[#allocation2 + $0x220] ss:$16 sps:$4 sm:$0xff]  }
  0x2c   :  { %1698 = vmatprep.mubr.bf16.mxu0 %v101_v60  ;;  %1862 = vmatprep.mubr.bf16.mxu1 %v101_v60  ;;  %v3058_v22 = vld [vmem:[#allocation2 + $0x228] ss:$16 sps:$4 sm:$0xff]   ;;  %v3063_v23 = vld [vmem:[#allocation2 + $0x244] ss:$16 sps:$4 sm:$0xff]   ;;  %v3066_v24 = vld [vmem:[#allocation2 + $0x24c] ss:$16 sps:$4 sm:$0xff]  }
  0x2d   :  { %1679 = vmatpush1.bf16.msra.mxu0 %v2992_v26  ;;  %1843 = vmatpush1.bf16.msra.mxu1 %v2993_v27  ;;  %v3061_v25 = vld [vmem:[#allocation2 + $0x240] ss:$16 sps:$4 sm:$0xff]   ;;  %v3064_v26 = vld [vmem:[#allocation2 + $0x248] ss:$16 sps:$4 sm:$0xff]   ;;  %v3069_v27 = vld [vmem:[#allocation2 + $0x264] ss:$16 sps:$4 sm:$0xff]  }
  0x2e   :  { %1680 = vmatprep.subr.bf16.mxu0 %v2994_v28  ;;  %1844 = vmatprep.subr.bf16.mxu1 %v2996_v29  ;;  %v3072_v28 = vld [vmem:[#allocation2 + $0x26c] ss:$16 sps:$4 sm:$0xff]   ;;  %v3067_v29 = vld [vmem:[#allocation2 + $0x260] ss:$16 sps:$4 sm:$0xff]   ;;  %v3082_v38 = vld [vmem:[#allocation2 + $0x2a8] ss:$16 sps:$4 sm:$0xff]  }
  0x2f   :  { %v3084_v36 = vld [vmem:[#allocation2 + $0x2ac] ss:$16 sps:$4 sm:$0xff]   ;;  %v3079_v37 = vld [vmem:[#allocation2 + $0x2a0] ss:$16 sps:$4 sm:$0xff]   ;;  %v3088_v42 = vld [vmem:[#allocation2 + $0x2c8] ss:$16 sps:$4 sm:$0xff]  }
  0x30   :  { %v3100_v52 = vld [vmem:[#allocation2 + $0x308] ss:$16 sps:$4 sm:$0xff]   ;;  %v3108_v54 = vld [vmem:[#allocation2 + $0x32c] ss:$16 sps:$4 sm:$0xff]   ;;  %v3141_v14 = vld [vmem:[#allocation2 + $0x3e4] ss:$16 sps:$4 sm:$0xff]  }
  0x31   :  { %1681 = vmatpush1.bf16.msra.mxu0 %v2998_v30  ;;  %1845 = vmatpush1.bf16.msra.mxu1 %v2999_v31  ;;  %v3070_v30 = vld [vmem:[#allocation2 + $0x268] ss:$16 sps:$4 sm:$0xff]   ;;  %v3075_v31 = vld [vmem:[#allocation2 + $0x284] ss:$16 sps:$4 sm:$0xff]   ;;  %v3114_v58 = vld [vmem:[#allocation2 + $0x34c] ss:$16 sps:$4 sm:$0xff]  }
  0x32   :  { %1682 = vmatprep.subr.bf16.mxu0 %v3000_v32  ;;  %1846 = vmatprep.subr.bf16.mxu1 %v3002_v33  ;;  %v3078_v32 = vld [vmem:[#allocation2 + $0x28c] ss:$16 sps:$4 sm:$0xff]   ;;  %v3073_v33 = vld [vmem:[#allocation2 + $0x280] ss:$16 sps:$4 sm:$0xff]   ;;  %v3112_v60 = vld [vmem:[#allocation2 + $0x348] ss:$16 sps:$4 sm:$0xff]  }
  0x33   :  { %v3124_v4 = vld [vmem:[#allocation2 + $0x388] ss:$16 sps:$4 sm:$0xff]   ;;  %s2535_s18 = sshll.u32 %s3432_s17, 4  ;;  %vm2527_vm1 = vcmask 123904   ;;  %s2536_s18 = int_to_ptr.vmem [resolvable:$true] %s2535_s18 }
  0x34   :  { %p3405_p9 = scmp.lt.s32.totalorder %s2536_s18, %s2536_s18 }
  0x35   :  { %1683 = vmatpush1.bf16.msra.mxu0 %v3004_v34  ;;  %1847 = vmatpush1.bf16.msra.mxu1 %v3005_v35  ;;  %v3076_v34 = vld [vmem:[#allocation2 + $0x288] ss:$16 sps:$4 sm:$0xff]   ;;  %v3081_v35 = vld [vmem:[#allocation2 + $0x2a4] ss:$16 sps:$4 sm:$0xff]  }
  0x36   :  { %1684 = vmatprep.subr.bf16.mxu0 %v3006_v39  ;;  %1848 = vmatprep.subr.bf16.mxu1 %v3008_v40  ;;  %v3087_v39 = vld [vmem:[#allocation2 + $0x2c4] ss:$16 sps:$4 sm:$0xff]   ;;  %v3090_v40 = vld [vmem:[#allocation2 + $0x2cc] ss:$16 sps:$4 sm:$0xff]  }
  0x39   :  { %1685 = vmatpush1.bf16.msra.mxu0 %v3010_v41  ;;  %1849 = vmatpush1.bf16.msra.mxu1 %v3011_v44  ;;  %v3085_v41 = vld [vmem:[#allocation2 + $0x2c0] ss:$16 sps:$4 sm:$0xff]   ;;  %v3093_v44 = vld [vmem:[#allocation2 + $0x2e4] ss:$16 sps:$4 sm:$0xff]  }
  0x3a   :  { %1686 = vmatprep.subr.bf16.mxu0 %v3012_v45  ;;  %1850 = vmatprep.subr.bf16.mxu1 %v3014_v46  ;;  %v3096_v45 = vld [vmem:[#allocation2 + $0x2ec] ss:$16 sps:$4 sm:$0xff]   ;;  %v3091_v46 = vld [vmem:[#allocation2 + $0x2e0] ss:$16 sps:$4 sm:$0xff]  }
  0x3d   :  { %1687 = vmatpush1.bf16.msra.mxu0 %v3016_v47  ;;  %1851 = vmatpush1.bf16.msra.mxu1 %v3017_v48  ;;  %v3094_v47 = vld [vmem:[#allocation2 + $0x2e8] ss:$16 sps:$4 sm:$0xff]   ;;  %v3099_v48 = vld [vmem:[#allocation2 + $0x304] ss:$16 sps:$4 sm:$0xff]  }
  0x3e   :  { %1688 = vmatprep.subr.bf16.mxu0 %v3018_v50  ;;  %1852 = vmatprep.subr.bf16.mxu1 %v3020_v51  ;;  %v3102_v50 = vld [vmem:[#allocation2 + $0x30c] ss:$16 sps:$4 sm:$0xff]   ;;  %v3097_v51 = vld [vmem:[#allocation2 + $0x300] ss:$16 sps:$4 sm:$0xff]  }
  0x41   :  { %1689 = vmatpush1.bf16.msra.mxu0 %v3022_v53  ;;  %1853 = vmatpush1.bf16.msra.mxu1 %v3023_v55  ;;  %v3105_v53 = vld [vmem:[#allocation2 + $0x324] ss:$16 sps:$4 sm:$0xff]   ;;  %v3103_v55 = vld [vmem:[#allocation2 + $0x320] ss:$16 sps:$4 sm:$0xff]  }
  0x42   :  { %1690 = vmatprep.subr.bf16.mxu0 %v3024_v56  ;;  %1854 = vmatprep.subr.bf16.mxu1 %v3026_v57  ;;  %v3106_v56 = vld [vmem:[#allocation2 + $0x328] ss:$16 sps:$4 sm:$0xff]   ;;  %v3111_v57 = vld [vmem:[#allocation2 + $0x344] ss:$16 sps:$4 sm:$0xff]  }
  0x45   :  { %1691 = vmatpush1.bf16.msra.mxu0 %v3028_v59  ;;  %1855 = vmatpush1.bf16.msra.mxu1 %v3029_v61  ;;  %v3109_v59 = vld [vmem:[#allocation2 + $0x340] ss:$16 sps:$4 sm:$0xff]   ;;  %v3117_v61 = vld [vmem:[#allocation2 + $0x364] ss:$16 sps:$4 sm:$0xff]  }
  0x46   :  { %1692 = vmatprep.subr.bf16.mxu0 %v3030_v62  ;;  %1856 = vmatprep.subr.bf16.mxu1 %v3032_v63  ;;  %v3120_v62 = vld [vmem:[#allocation2 + $0x36c] ss:$16 sps:$4 sm:$0xff]   ;;  %v3115_v63 = vld [vmem:[#allocation2 + $0x360] ss:$16 sps:$4 sm:$0xff]  }
  0x49   :  { %1693 = vmatpush1.bf16.msra.mxu0 %v3034_v0  ;;  %1857 = vmatpush1.bf16.msra.mxu1 %v3035_v1  ;;  %v3118_v0 = vld [vmem:[#allocation2 + $0x368] ss:$16 sps:$4 sm:$0xff]   ;;  %v3123_v1 = vld [vmem:[#allocation2 + $0x384] ss:$16 sps:$4 sm:$0xff]  }
  0x4a   :  { %1694 = vmatprep.subr.bf16.mxu0 %v3036_v2  ;;  %1858 = vmatprep.subr.bf16.mxu1 %v3038_v3  ;;  %v3126_v2 = vld [vmem:[#allocation2 + $0x38c] ss:$16 sps:$4 sm:$0xff]   ;;  %v3121_v3 = vld [vmem:[#allocation2 + $0x380] ss:$16 sps:$4 sm:$0xff]  }
  0x4d   :  { %1695 = vmatpush1.bf16.msra.mxu0 %v3040_v5  ;;  %1859 = vmatpush1.bf16.msra.mxu1 %v3041_v6  ;;  %v3129_v5 = vld [vmem:[#allocation2 + $0x3a4] ss:$16 sps:$4 sm:$0xff]   ;;  %v3132_v6 = vld [vmem:[#allocation2 + $0x3ac] ss:$16 sps:$4 sm:$0xff]  }
  0x4e   :  { %1696 = vmatprep.subr.bf16.mxu0 %v3042_v7  ;;  %1860 = vmatprep.subr.bf16.mxu1 %v3044_v8  ;;  %v3127_v7 = vld [vmem:[#allocation2 + $0x3a0] ss:$16 sps:$4 sm:$0xff]   ;;  %v3130_v8 = vld [vmem:[#allocation2 + $0x3a8] ss:$16 sps:$4 sm:$0xff]  }
  0x51   :  { %1697 = vmatpush1.bf16.msra.mxu0 %v3046_v10  ;;  %1861 = vmatpush1.bf16.msra.mxu1 %v3047_v11  ;;  %v3135_v10 = vld [vmem:[#allocation2 + $0x3c4] ss:$16 sps:$4 sm:$0xff]   ;;  %v3138_v11 = vld [vmem:[#allocation2 + $0x3cc] ss:$16 sps:$4 sm:$0xff]  }
  0x52   :  { %1707 = vmatprep.subr.bf16.mxu0 %v3051_v12  ;;  %1871 = vmatprep.subr.bf16.mxu1 %v3054_v13  ;;  %v3133_v12 = vld [vmem:[#allocation2 + $0x3c0] ss:$16 sps:$4 sm:$0xff]   ;;  %v3136_v13 = vld [vmem:[#allocation2 + $0x3c8] ss:$16 sps:$4 sm:$0xff]  }
  0x54   :  { %1699 = vmatmul.mubr.bf16.vlgmr.msra.gmra.mrb[0].mxu0 %v100_v16  ;;  %1863 = vmatmul.mubr.bf16.vlgmr.msra.gmra.mrb[0].mxu1 %v100_v16  ;;  %v3139_v16 = vld [vmem:[#allocation2 + $0x3e0] ss:$16 sps:$4 sm:$0xff]  }
  0x55   :  { %1708 = vmatpush1.bf16.msra.mxu0 %v3049_v15  ;;  %1872 = vmatpush1.bf16.msra.mxu1 %v3052_v17  ;;  %v3144_v15 = vld [vmem:[#allocation2 + $0x3ec] ss:$16 sps:$4 sm:$0xff]   ;;  %v3142_v17 = vld [vmem:[#allocation2 + $0x3e8] ss:$16 sps:$4 sm:$0xff]  }
  0x56   :  { %1709 = vmatprep.subr.bf16.mxu0 %v3057_v18  ;;  %1873 = vmatprep.subr.bf16.mxu1 %v3060_v19  ;;  %v3147_v18 = vld [vmem:[#allocation2 + $0x404] ss:$16 sps:$4 sm:$0xff]   ;;  %v3150_v19 = vld [vmem:[#allocation2 + $0x40c] ss:$16 sps:$4 sm:$0xff]  }
  0x57   :  { %1739 = vmatprep.mubr.bf16.mxu0 %v103_v20  ;;  %1903 = vmatprep.mubr.bf16.mxu1 %v103_v20  ;;  %v3145_v20 = vld [vmem:[#allocation2 + $0x400] ss:$16 sps:$4 sm:$0xff]  }
  0x59   :  { %1710 = vmatpush1.bf16.msra.mxu0 %v3055_v21  ;;  %1874 = vmatpush1.bf16.msra.mxu1 %v3058_v22  ;;  %v102_v21 = vpack.c.bf16 %v3515_v9, %v3515_v9  ;;  %v3148_v22 = vld [vmem:[#allocation2 + $0x408] ss:$16 sps:$4 sm:$0xff]  }
  0x5a   :  { %1711 = vmatprep.subr.bf16.mxu0 %v3063_v23  ;;  %1875 = vmatprep.subr.bf16.mxu1 %v3066_v24  ;;  %v3524_v23 = vld [vmem:[%s3709_s0 + $0x8] sm:$0xff]  ;;  %v3153_v24 = vld [vmem:[#allocation2 + $0x424] ss:$16 sps:$4 sm:$0xff]  }
  0x5d   :  { %1712 = vmatpush1.bf16.msra.mxu0 %v3061_v25  ;;  %1876 = vmatpush1.bf16.msra.mxu1 %v3064_v26  ;;  %v3156_v25 = vld [vmem:[#allocation2 + $0x42c] ss:$16 sps:$4 sm:$0xff]   ;;  %v3528_v26 = vrot.slane %v3524_v23, %v3508_v49 }
  0x5e   :  { %1713 = vmatprep.subr.bf16.mxu0 %v3069_v27  ;;  %1877 = vmatprep.subr.bf16.mxu1 %v3072_v28  ;;  %v3151_v27 = vld [vmem:[#allocation2 + $0x420] ss:$16 sps:$4 sm:$0xff]   ;;  %v3154_v28 = vld [vmem:[#allocation2 + $0x428] ss:$16 sps:$4 sm:$0xff]  }
  0x5f   :  { %v90_v9 = vcombine.high %v3528_v26, %v3528_v26 }
  0x61   :  { %1714 = vmatpush1.bf16.msra.mxu0 %v3067_v29  ;;  %1878 = vmatpush1.bf16.msra.mxu1 %v3070_v30  ;;  %v3159_v29 = vld [vmem:[#allocation2 + $0x444] ss:$16 sps:$4 sm:$0xff]   ;;  %v3162_v30 = vld [vmem:[#allocation2 + $0x44c] ss:$16 sps:$4 sm:$0xff]  }
  0x62   :  { %1715 = vmatprep.subr.bf16.mxu0 %v3075_v31  ;;  %1879 = vmatprep.subr.bf16.mxu1 %v3078_v32  ;;  %v105_v31 = vpack.c.bf16 %v90_v9, %v90_v9  ;;  %v3157_v32 = vld [vmem:[#allocation2 + $0x440] ss:$16 sps:$4 sm:$0xff]  }
  0x65   :  { %1716 = vmatpush1.bf16.msra.mxu0 %v3073_v33  ;;  %1880 = vmatpush1.bf16.msra.mxu1 %v3076_v34  ;;  %v3160_v33 = vld [vmem:[#allocation2 + $0x448] ss:$16 sps:$4 sm:$0xff]   ;;  %v3165_v34 = vld [vmem:[#allocation2 + $0x464] ss:$16 sps:$4 sm:$0xff]  }
  0x66   :  { %1717 = vmatprep.subr.bf16.mxu0 %v3081_v35  ;;  %1881 = vmatprep.subr.bf16.mxu1 %v3084_v36  ;;  %v3168_v35 = vld [vmem:[#allocation2 + $0x46c] ss:$16 sps:$4 sm:$0xff]   ;;  %v3163_v36 = vld [vmem:[#allocation2 + $0x460] ss:$16 sps:$4 sm:$0xff]  }
  0x69   :  { %1718 = vmatpush1.bf16.msra.mxu0 %v3079_v37  ;;  %1882 = vmatpush1.bf16.msra.mxu1 %v3082_v38  ;;  %v3166_v37 = vld [vmem:[#allocation2 + $0x468] ss:$16 sps:$4 sm:$0xff]   ;;  %v3171_v38 = vld [vmem:[#allocation2 + $0x484] ss:$16 sps:$4 sm:$0xff]  }
  0x6a   :  { %1719 = vmatprep.subr.bf16.mxu0 %v3087_v39  ;;  %1883 = vmatprep.subr.bf16.mxu1 %v3090_v40  ;;  %v3174_v39 = vld [vmem:[#allocation2 + $0x48c] ss:$16 sps:$4 sm:$0xff]   ;;  %v3169_v40 = vld [vmem:[#allocation2 + $0x480] ss:$16 sps:$4 sm:$0xff]  }
  0x6d   :  { %1720 = vmatpush1.bf16.msra.mxu0 %v3085_v41  ;;  %1884 = vmatpush1.bf16.msra.mxu1 %v3088_v42  ;;  %v3172_v41 = vld [vmem:[#allocation2 + $0x488] ss:$16 sps:$4 sm:$0xff]   ;;  %v3177_v42 = vld [vmem:[#allocation2 + $0x4a4] ss:$16 sps:$4 sm:$0xff]  }
  0x6e   :  { %1721 = vmatprep.subr.bf16.mxu0 %v3093_v44  ;;  %1885 = vmatprep.subr.bf16.mxu1 %v3096_v45  ;;  %v3180_v44 = vld [vmem:[#allocation2 + $0x4ac] ss:$16 sps:$4 sm:$0xff]   ;;  %v3175_v45 = vld [vmem:[#allocation2 + $0x4a0] ss:$16 sps:$4 sm:$0xff]  }
  0x71   :  { %1722 = vmatpush1.bf16.msra.mxu0 %v3091_v46  ;;  %1886 = vmatpush1.bf16.msra.mxu1 %v3094_v47  ;;  %v3178_v46 = vld [vmem:[#allocation2 + $0x4a8] ss:$16 sps:$4 sm:$0xff]   ;;  %v3183_v47 = vld [vmem:[#allocation2 + $0x4c4] ss:$16 sps:$4 sm:$0xff]  }
  0x72   :  { %1723 = vmatprep.subr.bf16.mxu0 %v3099_v48  ;;  %1887 = vmatprep.subr.bf16.mxu1 %v3102_v50  ;;  %v3186_v48 = vld [vmem:[#allocation2 + $0x4cc] ss:$16 sps:$4 sm:$0xff]   ;;  %v3181_v50 = vld [vmem:[#allocation2 + $0x4c0] ss:$16 sps:$4 sm:$0xff]  }
  0x75   :  { %1724 = vmatpush1.bf16.msra.mxu0 %v3097_v51  ;;  %1888 = vmatpush1.bf16.msra.mxu1 %v3100_v52  ;;  %v3184_v51 = vld [vmem:[#allocation2 + $0x4c8] ss:$16 sps:$4 sm:$0xff]   ;;  %v3189_v52 = vld [vmem:[#allocation2 + $0x4e4] ss:$16 sps:$4 sm:$0xff]  }
  0x76   :  { %1725 = vmatprep.subr.bf16.mxu0 %v3105_v53  ;;  %1889 = vmatprep.subr.bf16.mxu1 %v3108_v54  ;;  %v3192_v53 = vld [vmem:[#allocation2 + $0x4ec] ss:$16 sps:$4 sm:$0xff]   ;;  %v3187_v54 = vld [vmem:[#allocation2 + $0x4e0] ss:$16 sps:$4 sm:$0xff]  }
  0x79   :  { %1726 = vmatpush1.bf16.msra.mxu0 %v3103_v55  ;;  %1890 = vmatpush1.bf16.msra.mxu1 %v3106_v56  ;;  %v3190_v55 = vld [vmem:[#allocation2 + $0x4e8] ss:$16 sps:$4 sm:$0xff]   ;;  %v3195_v56 = vld [vmem:[#allocation2 + $0x504] ss:$16 sps:$4 sm:$0xff]  }
  0x7a   :  { %1727 = vmatprep.subr.bf16.mxu0 %v3111_v57  ;;  %1891 = vmatprep.subr.bf16.mxu1 %v3114_v58  ;;  %v3198_v57 = vld [vmem:[#allocation2 + $0x50c] ss:$16 sps:$4 sm:$0xff]   ;;  %v3193_v58 = vld [vmem:[#allocation2 + $0x500] ss:$16 sps:$4 sm:$0xff]  }
  0x7d   :  { %1728 = vmatpush1.bf16.msra.mxu0 %v3109_v59  ;;  %1892 = vmatpush1.bf16.msra.mxu1 %v3112_v60  ;;  %v3196_v59 = vld [vmem:[#allocation2 + $0x508] ss:$16 sps:$4 sm:$0xff]   ;;  %v3201_v60 = vld [vmem:[#allocation2 + $0x524] ss:$16 sps:$4 sm:$0xff]  }
  0x7e   :  { %1729 = vmatprep.subr.bf16.mxu0 %v3117_v61  ;;  %1893 = vmatprep.subr.bf16.mxu1 %v3120_v62  ;;  %v3204_v61 = vld [vmem:[#allocation2 + $0x52c] ss:$16 sps:$4 sm:$0xff]   ;;  %v3199_v62 = vld [vmem:[#allocation2 + $0x520] ss:$16 sps:$4 sm:$0xff]  }
  0x81   :  { %1730 = vmatpush1.bf16.msra.mxu0 %v3115_v63  ;;  %1894 = vmatpush1.bf16.msra.mxu1 %v3118_v0  ;;  %v3202_v63 = vld [vmem:[#allocation2 + $0x528] ss:$16 sps:$4 sm:$0xff]   ;;  %v3207_v0 = vld [vmem:[#allocation2 + $0x544] ss:$16 sps:$4 sm:$0xff]  }
  0x82   :  { %1731 = vmatprep.subr.bf16.mxu0 %v3123_v1  ;;  %1895 = vmatprep.subr.bf16.mxu1 %v3126_v2  ;;  %v3210_v1 = vld [vmem:[#allocation2 + $0x54c] ss:$16 sps:$4 sm:$0xff]   ;;  %v3205_v2 = vld [vmem:[#allocation2 + $0x540] ss:$16 sps:$4 sm:$0xff]  }
  0x85   :  { %1732 = vmatpush1.bf16.msra.mxu0 %v3121_v3  ;;  %1896 = vmatpush1.bf16.msra.mxu1 %v3124_v4  ;;  %v3208_v3 = vld [vmem:[#allocation2 + $0x548] ss:$16 sps:$4 sm:$0xff]   ;;  %v3213_v4 = vld [vmem:[#allocation2 + $0x564] ss:$16 sps:$4 sm:$0xff]  }
  0x86   :  { %1733 = vmatprep.subr.bf16.mxu0 %v3129_v5  ;;  %1897 = vmatprep.subr.bf16.mxu1 %v3132_v6  ;;  %v3216_v5 = vld [vmem:[#allocation2 + $0x56c] ss:$16 sps:$4 sm:$0xff]   ;;  %v3211_v6 = vld [vmem:[#allocation2 + $0x560] ss:$16 sps:$4 sm:$0xff]  }
  0x89   :  { %1734 = vmatpush1.bf16.msra.mxu0 %v3127_v7  ;;  %1898 = vmatpush1.bf16.msra.mxu1 %v3130_v8  ;;  %v3214_v7 = vld [vmem:[#allocation2 + $0x568] ss:$16 sps:$4 sm:$0xff]   ;;  %v3219_v8 = vld [vmem:[#allocation2 + $0x584] ss:$16 sps:$4 sm:$0xff]  }
  0x8a   :  { %1735 = vmatprep.subr.bf16.mxu0 %v3135_v10  ;;  %1899 = vmatprep.subr.bf16.mxu1 %v3138_v11  ;;  %v3222_v10 = vld [vmem:[#allocation2 + $0x58c] ss:$16 sps:$4 sm:$0xff]   ;;  %v3217_v11 = vld [vmem:[#allocation2 + $0x580] ss:$16 sps:$4 sm:$0xff]  }
  0x8d   :  { %1736 = vmatpush1.bf16.msra.mxu0 %v3133_v12  ;;  %1900 = vmatpush1.bf16.msra.mxu1 %v3136_v13  ;;  %v3220_v12 = vld [vmem:[#allocation2 + $0x588] ss:$16 sps:$4 sm:$0xff]   ;;  %v3225_v13 = vld [vmem:[#allocation2 + $0x5a4] ss:$16 sps:$4 sm:$0xff]  }
  0x8e   :  { %1737 = vmatprep.subr.bf16.mxu0 %v3141_v14  ;;  %1901 = vmatprep.subr.bf16.mxu1 %v3144_v15  ;;  %v3228_v14 = vld [vmem:[#allocation2 + $0x5ac] ss:$16 sps:$4 sm:$0xff]   ;;  %v3223_v15 = vld [vmem:[#allocation2 + $0x5a0] ss:$16 sps:$4 sm:$0xff]  }
  0x91   :  { %1738 = vmatpush1.bf16.msra.mxu0 %v3139_v16  ;;  %1902 = vmatpush1.bf16.msra.mxu1 %v3142_v17  ;;  %v3226_v16 = vld [vmem:[#allocation2 + $0x5a8] ss:$16 sps:$4 sm:$0xff]   ;;  %v3231_v17 = vld [vmem:[#allocation2 + $0x5c4] ss:$16 sps:$4 sm:$0xff]  }
  0x92   :  { %1748 = vmatprep.subr.bf16.mxu0 %v3147_v18  ;;  %1912 = vmatprep.subr.bf16.mxu1 %v3150_v19  ;;  %v3234_v18 = vld [vmem:[#allocation2 + $0x5cc] ss:$16 sps:$4 sm:$0xff]   ;;  %v3229_v19 = vld [vmem:[#allocation2 + $0x5c0] ss:$16 sps:$4 sm:$0xff]  }
  0x94   :  { %1740 = vmatmul.mubr.bf16.vlgmr.msra.gmra.mrb[0].mxu0 %v102_v21  ;;  %1904 = vmatmul.mubr.bf16.vlgmr.msra.gmra.mrb[0].mxu1 %v102_v21  ;;  %v3232_v21 = vld [vmem:[#allocation2 + $0x5c8] ss:$16 sps:$4 sm:$0xff]  }
  0x95   :  { %1749 = vmatpush1.bf16.msra.mxu0 %v3145_v20  ;;  %1913 = vmatpush1.bf16.msra.mxu1 %v3148_v22  ;;  %v75_v20 = vcombine.high %v3524_v23, %v3524_v23  ;;  %v3237_v22 = vld [vmem:[#allocation2 + $0x5e4] ss:$16 sps:$4 sm:$0xff]   ;;  %v3244_v23 = vld [vmem:[#allocation2 + $0x608] ss:$16 sps:$4 sm:$0xff]  }
  0x96   :  { %1750 = vmatprep.subr.bf16.mxu0 %v3153_v24  ;;  %1914 = vmatprep.subr.bf16.mxu1 %v3156_v25  ;;  %v3240_v24 = vld [vmem:[#allocation2 + $0x5ec] ss:$16 sps:$4 sm:$0xff]   ;;  %v3235_v25 = vld [vmem:[#allocation2 + $0x5e0] ss:$16 sps:$4 sm:$0xff]  }
  0x97   :  { %1780 = vmatprep.mubr.bf16.mxu0 %v105_v31  ;;  %1944 = vmatprep.mubr.bf16.mxu1 %v105_v31  ;;  %v3535_v9 = vrot.slane %v75_v20, %v3508_v49  ;;  %v3247_v49 = vld [vmem:[#allocation2 + $0x620] ss:$16 sps:$4 sm:$0xff]   ;;  %v3324_v20 = vld [vmem:[#allocation2 + $0x7ac] ss:$16 sps:$4 sm:$0xff]  }
  0x99   :  { %1751 = vmatpush1.bf16.msra.mxu0 %v3151_v27  ;;  %1915 = vmatpush1.bf16.msra.mxu1 %v3154_v28  ;;  %v3238_v27 = vld [vmem:[#allocation2 + $0x5e8] ss:$16 sps:$4 sm:$0xff]   ;;  %v3243_v28 = vld [vmem:[#allocation2 + $0x604] ss:$16 sps:$4 sm:$0xff]   ;;  %v91_v31 = vcombine.high %v3535_v9, %v3535_v9 }
  0x9a   :  { %1752 = vmatprep.subr.bf16.mxu0 %v3159_v29  ;;  %1916 = vmatprep.subr.bf16.mxu1 %v3162_v30  ;;  %v3246_v29 = vld [vmem:[#allocation2 + $0x60c] ss:$16 sps:$4 sm:$0xff]   ;;  %v3241_v30 = vld [vmem:[#allocation2 + $0x600] ss:$16 sps:$4 sm:$0xff]  }
  0x9d   :  { %1753 = vmatpush1.bf16.msra.mxu0 %v3157_v32  ;;  %1917 = vmatpush1.bf16.msra.mxu1 %v3160_v33  ;;  %v104_v32 = vpack.c.bf16 %v3528_v26, %v3528_v26  ;;  %v3249_v33 = vld [vmem:[#allocation2 + $0x624] ss:$16 sps:$4 sm:$0xff]  }
  0x9e   :  { %1754 = vmatprep.subr.bf16.mxu0 %v3165_v34  ;;  %1918 = vmatprep.subr.bf16.mxu1 %v3168_v35  ;;  %v3252_v34 = vld [vmem:[#allocation2 + $0x62c] ss:$16 sps:$4 sm:$0xff]   ;;  %v3250_v35 = vld [vmem:[#allocation2 + $0x628] ss:$16 sps:$4 sm:$0xff]   ;;  %v3261_v26 = vld [vmem:[#allocation2 + $0x664] ss:$16 sps:$4 sm:$0xff]  }
  0xa1   :  { %1755 = vmatpush1.bf16.msra.mxu0 %v3163_v36  ;;  %1919 = vmatpush1.bf16.msra.mxu1 %v3166_v37  ;;  %v107_v36 = vpack.c.bf16 %v91_v31, %v91_v31  ;;  %v3255_v37 = vld [vmem:[#allocation2 + $0x644] ss:$16 sps:$4 sm:$0xff]   ;;  %v3334_v31 = vld [vmem:[#allocation2 + $0x7e8] ss:$16 sps:$4 sm:$0xff]  }
  0xa2   :  { %1756 = vmatprep.subr.bf16.mxu0 %v3171_v38  ;;  %1920 = vmatprep.subr.bf16.mxu1 %v3174_v39  ;;  %v3258_v38 = vld [vmem:[#allocation2 + $0x64c] ss:$16 sps:$4 sm:$0xff]   ;;  %v3253_v39 = vld [vmem:[#allocation2 + $0x640] ss:$16 sps:$4 sm:$0xff]  }
  0xa5   :  { %1757 = vmatpush1.bf16.msra.mxu0 %v3169_v40  ;;  %1921 = vmatpush1.bf16.msra.mxu1 %v3172_v41  ;;  %v3256_v40 = vld [vmem:[#allocation2 + $0x648] ss:$16 sps:$4 sm:$0xff]   ;;  %v3264_v41 = vld [vmem:[#allocation2 + $0x66c] ss:$16 sps:$4 sm:$0xff]  }
  0xa6   :  { %1758 = vmatprep.subr.bf16.mxu0 %v3177_v42  ;;  %1922 = vmatprep.subr.bf16.mxu1 %v3180_v44  ;;  %v3259_v42 = vld [vmem:[#allocation2 + $0x660] ss:$16 sps:$4 sm:$0xff]   ;;  %v3262_v44 = vld [vmem:[#allocation2 + $0x668] ss:$16 sps:$4 sm:$0xff]  }
  0xa9   :  { %1759 = vmatpush1.bf16.msra.mxu0 %v3175_v45  ;;  %1923 = vmatpush1.bf16.msra.mxu1 %v3178_v46  ;;  %v3267_v45 = vld [vmem:[#allocation2 + $0x684] ss:$16 sps:$4 sm:$0xff]   ;;  %v3270_v46 = vld [vmem:[#allocation2 + $0x68c] ss:$16 sps:$4 sm:$0xff]  }
  0xaa   :  { %1760 = vmatprep.subr.bf16.mxu0 %v3183_v47  ;;  %1924 = vmatprep.subr.bf16.mxu1 %v3186_v48  ;;  %v3265_v47 = vld [vmem:[#allocation2 + $0x680] ss:$16 sps:$4 sm:$0xff]   ;;  %v3268_v48 = vld [vmem:[#allocation2 + $0x688] ss:$16 sps:$4 sm:$0xff]  }
  0xad   :  { %1761 = vmatpush1.bf16.msra.mxu0 %v3181_v50  ;;  %1925 = vmatpush1.bf16.msra.mxu1 %v3184_v51  ;;  %v3273_v50 = vld [vmem:[#allocation2 + $0x6a4] ss:$16 sps:$4 sm:$0xff]   ;;  %v3276_v51 = vld [vmem:[#allocation2 + $0x6ac] ss:$16 sps:$4 sm:$0xff]  }
  0xae   :  { %1762 = vmatprep.subr.bf16.mxu0 %v3189_v52  ;;  %1926 = vmatprep.subr.bf16.mxu1 %v3192_v53  ;;  %v3271_v52 = vld [vmem:[#allocation2 + $0x6a0] ss:$16 sps:$4 sm:$0xff]   ;;  %v3274_v53 = vld [vmem:[#allocation2 + $0x6a8] ss:$16 sps:$4 sm:$0xff]  }
  0xb1   :  { %1763 = vmatpush1.bf16.msra.mxu0 %v3187_v54  ;;  %1927 = vmatpush1.bf16.msra.mxu1 %v3190_v55  ;;  %v3279_v54 = vld [vmem:[#allocation2 + $0x6c4] ss:$16 sps:$4 sm:$0xff]   ;;  %v3282_v55 = vld [vmem:[#allocation2 + $0x6cc] ss:$16 sps:$4 sm:$0xff]  }
  0xb2   :  { %1764 = vmatprep.subr.bf16.mxu0 %v3195_v56  ;;  %1928 = vmatprep.subr.bf16.mxu1 %v3198_v57  ;;  %v3277_v56 = vld [vmem:[#allocation2 + $0x6c0] ss:$16 sps:$4 sm:$0xff]   ;;  %v3280_v57 = vld [vmem:[#allocation2 + $0x6c8] ss:$16 sps:$4 sm:$0xff]  }
  0xb5   :  { %1765 = vmatpush1.bf16.msra.mxu0 %v3193_v58  ;;  %1929 = vmatpush1.bf16.msra.mxu1 %v3196_v59  ;;  %v3285_v58 = vld [vmem:[#allocation2 + $0x6e4] ss:$16 sps:$4 sm:$0xff]   ;;  %v3288_v59 = vld [vmem:[#allocation2 + $0x6ec] ss:$16 sps:$4 sm:$0xff]  }
  0xb6   :  { %1766 = vmatprep.subr.bf16.mxu0 %v3201_v60  ;;  %1930 = vmatprep.subr.bf16.mxu1 %v3204_v61  ;;  %v3283_v60 = vld [vmem:[#allocation2 + $0x6e0] ss:$16 sps:$4 sm:$0xff]   ;;  %v3286_v61 = vld [vmem:[#allocation2 + $0x6e8] ss:$16 sps:$4 sm:$0xff]  }
  0xb9   :  { %1767 = vmatpush1.bf16.msra.mxu0 %v3199_v62  ;;  %1931 = vmatpush1.bf16.msra.mxu1 %v3202_v63  ;;  %v3291_v62 = vld [vmem:[#allocation2 + $0x704] ss:$16 sps:$4 sm:$0xff]   ;;  %v3294_v63 = vld [vmem:[#allocation2 + $0x70c] ss:$16 sps:$4 sm:$0xff]  }
  0xba   :  { %1768 = vmatprep.subr.bf16.mxu0 %v3207_v0  ;;  %1932 = vmatprep.subr.bf16.mxu1 %v3210_v1  ;;  %v3289_v0 = vld [vmem:[#allocation2 + $0x700] ss:$16 sps:$4 sm:$0xff]   ;;  %v3292_v1 = vld [vmem:[#allocation2 + $0x708] ss:$16 sps:$4 sm:$0xff]  }
  0xbd   :  { %1769 = vmatpush1.bf16.msra.mxu0 %v3205_v2  ;;  %1933 = vmatpush1.bf16.msra.mxu1 %v3208_v3  ;;  %v3297_v2 = vld [vmem:[#allocation2 + $0x724] ss:$16 sps:$4 sm:$0xff]   ;;  %v3300_v3 = vld [vmem:[#allocation2 + $0x72c] ss:$16 sps:$4 sm:$0xff]  }
  0xbe   :  { %1770 = vmatprep.subr.bf16.mxu0 %v3213_v4  ;;  %1934 = vmatprep.subr.bf16.mxu1 %v3216_v5  ;;  %v3295_v4 = vld [vmem:[#allocation2 + $0x720] ss:$16 sps:$4 sm:$0xff]   ;;  %v3298_v5 = vld [vmem:[#allocation2 + $0x728] ss:$16 sps:$4 sm:$0xff]  }
  0xc1   :  { %1771 = vmatpush1.bf16.msra.mxu0 %v3211_v6  ;;  %1935 = vmatpush1.bf16.msra.mxu1 %v3214_v7  ;;  %v3303_v6 = vld [vmem:[#allocation2 + $0x744] ss:$16 sps:$4 sm:$0xff]   ;;  %v3306_v7 = vld [vmem:[#allocation2 + $0x74c] ss:$16 sps:$4 sm:$0xff]  }
  0xc2   :  { %1772 = vmatprep.subr.bf16.mxu0 %v3219_v8  ;;  %1936 = vmatprep.subr.bf16.mxu1 %v3222_v10  ;;  %v3301_v8 = vld [vmem:[#allocation2 + $0x740] ss:$16 sps:$4 sm:$0xff]   ;;  %v3304_v10 = vld [vmem:[#allocation2 + $0x748] ss:$16 sps:$4 sm:$0xff]  }
  0xc5   :  { %1773 = vmatpush1.bf16.msra.mxu0 %v3217_v11  ;;  %1937 = vmatpush1.bf16.msra.mxu1 %v3220_v12  ;;  %v3309_v11 = vld [vmem:[#allocation2 + $0x764] ss:$16 sps:$4 sm:$0xff]   ;;  %v3312_v12 = vld [vmem:[#allocation2 + $0x76c] ss:$16 sps:$4 sm:$0xff]  }
  0xc6   :  { %1774 = vmatprep.subr.bf16.mxu0 %v3225_v13  ;;  %1938 = vmatprep.subr.bf16.mxu1 %v3228_v14  ;;  %v3307_v13 = vld [vmem:[#allocation2 + $0x760] ss:$16 sps:$4 sm:$0xff]   ;;  %v3310_v14 = vld [vmem:[#allocation2 + $0x768] ss:$16 sps:$4 sm:$0xff]  }
  0xc9   :  { %1775 = vmatpush1.bf16.msra.mxu0 %v3223_v15  ;;  %1939 = vmatpush1.bf16.msra.mxu1 %v3226_v16  ;;  %v3315_v15 = vld [vmem:[#allocation2 + $0x784] ss:$16 sps:$4 sm:$0xff]   ;;  %v3318_v16 = vld [vmem:[#allocation2 + $0x78c] ss:$16 sps:$4 sm:$0xff]  }
  0xca   :  { %1776 = vmatprep.subr.bf16.mxu0 %v3231_v17  ;;  %1940 = vmatprep.subr.bf16.mxu1 %v3234_v18  ;;  %v3313_v17 = vld [vmem:[#allocation2 + $0x780] ss:$16 sps:$4 sm:$0xff]   ;;  %v3316_v18 = vld [vmem:[#allocation2 + $0x788] ss:$16 sps:$4 sm:$0xff]  }
  0xcd   :  { %1777 = vmatpush1.bf16.msra.mxu0 %v3229_v19  ;;  %1941 = vmatpush1.bf16.msra.mxu1 %v3232_v21  ;;  %v3321_v19 = vld [vmem:[#allocation2 + $0x7a4] ss:$16 sps:$4 sm:$0xff]   ;;  %v3319_v21 = vld [vmem:[#allocation2 + $0x7a0] ss:$16 sps:$4 sm:$0xff]  }
  0xce   :  { %1778 = vmatprep.subr.bf16.mxu0 %v3237_v22  ;;  %1942 = vmatprep.subr.bf16.mxu1 %v3240_v24  ;;  %v3322_v22 = vld [vmem:[#allocation2 + $0x7a8] ss:$16 sps:$4 sm:$0xff]   ;;  %v3327_v24 = vld [vmem:[#allocation2 + $0x7c4] ss:$16 sps:$4 sm:$0xff]  }
  0xd1   :  { %1779 = vmatpush1.bf16.msra.mxu0 %v3235_v25  ;;  %1943 = vmatpush1.bf16.msra.mxu1 %v3238_v27  ;;  %v3330_v25 = vld [vmem:[#allocation2 + $0x7cc] ss:$16 sps:$4 sm:$0xff]   ;;  %v3325_v27 = vld [vmem:[#allocation2 + $0x7c0] ss:$16 sps:$4 sm:$0xff]  }
  0xd2   :  { %1789 = vmatprep.subr.bf16.mxu0 %v3243_v28  ;;  %1953 = vmatprep.subr.bf16.mxu1 %v3246_v29  ;;  %v3328_v28 = vld [vmem:[#allocation2 + $0x7c8] ss:$16 sps:$4 sm:$0xff]   ;;  %v3333_v29 = vld [vmem:[#allocation2 + $0x7e4] ss:$16 sps:$4 sm:$0xff]  }
  0xd4   :  { %1781 = vmatmul.mubr.bf16.vlgmr.msra.gmra.mrb[0].mxu0 %v104_v32  ;;  %1945 = vmatmul.mubr.bf16.vlgmr.msra.gmra.mrb[0].mxu1 %v104_v32  ;;  %v3338_v32 = vld [vmem:[%s3714_s5 + $0x40] sm:$0xff]  }
  0xd5   :  { %1790 = vmatpush1.bf16.msra.mxu0 %v3241_v30  ;;  %1954 = vmatpush1.bf16.msra.mxu1 %v3244_v23  ;;  %v3336_v30 = vld [vmem:[#allocation2 + $0x7ec] ss:$16 sps:$4 sm:$0xff]   ;;  %v3331_v23 = vld [vmem:[#allocation2 + $0x7e0] ss:$16 sps:$4 sm:$0xff]  }
  0xd6   :  { %1791 = vmatprep.subr.bf16.mxu0 %v3249_v33  ;;  %1955 = vmatprep.subr.bf16.mxu1 %v3252_v34  ;;  %v3339_v33 = vld [vmem:[%s3714_s5 + $0xc0] sm:$0xff]   ;;  %v106_v34 = vpack.c.bf16 %v3535_v9, %v3535_v9  ;;  %v3343_v9 = vld [vmem:[%s3714_s5 + $0xc8] sm:$0xff]  }
  0xd7   :  { %1821 = vmatprep.mubr.bf16.mxu0 %v107_v36  ;;  %1985 = vmatprep.mubr.bf16.mxu1 %v107_v36  ;;  %v3342_v36 = vld [vmem:[%s3714_s5 + $0x48] sm:$0xff]  }
  0xd9   :  { %1792 = vmatpush1.bf16.msra.mxu0 %v3247_v49  ;;  %1956 = vmatpush1.bf16.msra.mxu1 %v3250_v35  ;;  %v3340_v49 = vld [vmem:[%s3714_s5] sm:$0xff]  }
  0xda   :  { %1793 = vmatprep.subr.bf16.mxu0 %v3255_v37  ;;  %1957 = vmatprep.subr.bf16.mxu1 %v3258_v38  ;;  %v3341_v35 = vld [vmem:[%s3714_s5 + $0x80] sm:$0xff]   ;;  %v3344_v37 = vld [vmem:[%s3714_s5 + $0x8] sm:$0xff]  }
  0xdb   :  { %v3345_v38 = vld [vmem:[%s3714_s5 + $0x88] sm:$0xff]  }
  0xdd   :  { %1794 = vmatpush1.bf16.msra.mxu0 %v3253_v39  ;;  %1958 = vmatpush1.bf16.msra.mxu1 %v3256_v40  ;;  %v3346_v39 = vld [vmem:[%s3714_s5 + $0x50] sm:$0xff]  }
  0xde   :  { %1795 = vmatprep.subr.bf16.mxu0 %v3261_v26  ;;  %1959 = vmatprep.subr.bf16.mxu1 %v3264_v41  ;;  %v3347_v40 = vld [vmem:[%s3714_s5 + $0xd0] sm:$0xff]  }
  0xdf   :  { %v3348_v26 = vld [vmem:[%s3714_s5 + $0x10] sm:$0xff]  }
  0xe0   :  { %v3349_v41 = vld [vmem:[%s3714_s5 + $0x90] sm:$0xff]  }
  0xe1   :  { %1796 = vmatpush1.bf16.msra.mxu0 %v3259_v42  ;;  %1960 = vmatpush1.bf16.msra.mxu1 %v3262_v44  ;;  %v3350_v42 = vld [vmem:[%s3714_s5 + $0x58] sm:$0xff]  }
  0xe2   :  { %1797 = vmatprep.subr.bf16.mxu0 %v3267_v45  ;;  %1961 = vmatprep.subr.bf16.mxu1 %v3270_v46  ;;  %v3351_v44 = vld [vmem:[%s3714_s5 + $0xd8] sm:$0xff]  }
  0xe3   :  { %v3352_v45 = vld [vmem:[%s3714_s5 + $0x18] sm:$0xff]  }
  0xe4   :  { %v3353_v46 = vld [vmem:[%s3714_s5 + $0x98] sm:$0xff]  }
  0xe5   :  { %1798 = vmatpush1.bf16.msra.mxu0 %v3265_v47  ;;  %1962 = vmatpush1.bf16.msra.mxu1 %v3268_v48  ;;  %v3354_v47 = vld [vmem:[%s3714_s5 + $0x60] sm:$0xff]  }
  0xe6   :  { %1799 = vmatprep.subr.bf16.mxu0 %v3273_v50  ;;  %1963 = vmatprep.subr.bf16.mxu1 %v3276_v51  ;;  %v3355_v48 = vld [vmem:[%s3714_s5 + $0xe0] sm:$0xff]  }
  0xe7   :  { %v3356_v50 = vld [vmem:[%s3714_s5 + $0x20] sm:$0xff]  }
  0xe8   :  { %v3357_v51 = vld [vmem:[%s3714_s5 + $0xa0] sm:$0xff]  }
  0xe9   :  { %1800 = vmatpush1.bf16.msra.mxu0 %v3271_v52  ;;  %1964 = vmatpush1.bf16.msra.mxu1 %v3274_v53  ;;  %v3358_v52 = vld [vmem:[%s3714_s5 + $0x68] sm:$0xff]  }
  0xea   :  { %1801 = vmatprep.subr.bf16.mxu0 %v3279_v54  ;;  %1965 = vmatprep.subr.bf16.mxu1 %v3282_v55  ;;  %v3359_v53 = vld [vmem:[%s3714_s5 + $0xe8] sm:$0xff]  }
  0xeb   :  { %v3360_v54 = vld [vmem:[%s3714_s5 + $0x28] sm:$0xff]  }
  0xec   :  { %v3361_v55 = vld [vmem:[%s3714_s5 + $0xa8] sm:$0xff]  }
  0xed   :  { %1802 = vmatpush1.bf16.msra.mxu0 %v3277_v56  ;;  %1966 = vmatpush1.bf16.msra.mxu1 %v3280_v57  ;;  %v3362_v56 = vld [vmem:[%s3714_s5 + $0x70] sm:$0xff]  }
  0xee   :  { %1803 = vmatprep.subr.bf16.mxu0 %v3285_v58  ;;  %1967 = vmatprep.subr.bf16.mxu1 %v3288_v59  ;;  %v3363_v57 = vld [vmem:[%s3714_s5 + $0xf0] sm:$0xff]  }
  0xef   :  { %v3364_v58 = vld [vmem:[%s3714_s5 + $0x30] sm:$0xff]  }
  0xf0   :  { %v3365_v59 = vld [vmem:[%s3714_s5 + $0xb0] sm:$0xff]  }
  0xf1   :  { %1804 = vmatpush1.bf16.msra.mxu0 %v3283_v60  ;;  %1968 = vmatpush1.bf16.msra.mxu1 %v3286_v61  ;;  %v3366_v60 = vld [vmem:[%s3714_s5 + $0x78] sm:$0xff]  }
  0xf2   :  { %1805 = vmatprep.subr.bf16.mxu0 %v3291_v62  ;;  %1969 = vmatprep.subr.bf16.mxu1 %v3294_v63  ;;  %v3367_v61 = vld [vmem:[%s3714_s5 + $0xf8] sm:$0xff]  }
  0xf3   :  { %v3368_v62 = vld [vmem:[%s3714_s5 + $0x38] sm:$0xff]  }
  0xf4   :  { %v3369_v63 = vld [vmem:[%s3714_s5 + $0xb8] sm:$0xff]  }
  0xf5   :  { %1806 = vmatpush1.bf16.msra.mxu0 %v3289_v0  ;;  %1970 = vmatpush1.bf16.msra.mxu1 %v3292_v1  ;;  %v3430_v0 = vmov 0.0   ;;  %v368_v1 = vsub.s32 0, %v3505_v43 }
  0xf6   :  { %1807 = vmatprep.subr.bf16.mxu0 %v3297_v2  ;;  %1971 = vmatprep.subr.bf16.mxu1 %v3300_v3  ;;  %v376_v2 = vsub.s32 2, %v3505_v43  ;;  %v364_v3 = vld [vmem:[%s3711_s2] sm:$0xf] }
  0xf9   :  { %1808 = vmatpush1.bf16.msra.mxu0 %v3295_v4  ;;  %1972 = vmatpush1.bf16.msra.mxu1 %v3298_v5  ;;  %v372_v4 = vsub.s32 1, %v3505_v43  ;;  %v380_v5 = vsub.s32 3, %v3505_v43 }
  0xfa   :  { %1809 = vmatprep.subr.bf16.mxu0 %v3303_v6  ;;  %1973 = vmatprep.subr.bf16.mxu1 %v3306_v7  ;;  %v1994_v6 = vld [vmem:[%s3712_s3] sm:$0xf]  ;;  %v369_v7 = vrot.slane %v364_v3, %v368_v1 }
  0xfd   :  { %1810 = vmatpush1.bf16.msra.mxu0 %v3301_v8  ;;  %1974 = vmatpush1.bf16.msra.mxu1 %v3304_v10  ;;  %v377_v8 = vrot.slane %v364_v3, %v376_v2  ;;  %v2020_v10 = vld [vmem:[%s3713_s4] sm:$0xf] }
  0xfe   :  { %1811 = vmatprep.subr.bf16.mxu0 %v3309_v11  ;;  %1975 = vmatprep.subr.bf16.mxu1 %v3312_v12  ;;  %v373_v11 = vrot.slane %v364_v3, %v372_v4  ;;  %v381_v12 = vrot.slane %v364_v3, %v380_v5  ;;  %v2025_v43 = vrot.slane %v2020_v10, %v368_v1 }
 0x101   :  { %1812 = vmatpush1.bf16.msra.mxu0 %v3307_v13  ;;  %1976 = vmatpush1.bf16.msra.mxu1 %v3310_v14  ;;  %v1999_v13 = vrot.slane %v1994_v6, %v368_v1  ;;  %v2007_v14 = vrot.slane %v1994_v6, %v376_v2 }
 0x102   :  { %1813 = vmatprep.subr.bf16.mxu0 %v3315_v15  ;;  %1977 = vmatprep.subr.bf16.mxu1 %v3318_v16 }
 0x105   :  { %1814 = vmatpush1.bf16.msra.mxu0 %v3313_v17  ;;  %1978 = vmatpush1.bf16.msra.mxu1 %v3316_v18  ;;  %v2003_v17 = vrot.slane %v1994_v6, %v372_v4  ;;  %v2011_v18 = vrot.slane %v1994_v6, %v380_v5  ;;  %v2834_v6 = vld [vmem:[%s3717_s8] ss:$0 sm:$0xff] }
 0x106   :  { %1815 = vmatprep.subr.bf16.mxu0 %v3321_v19  ;;  %1979 = vmatprep.subr.bf16.mxu1 %v3324_v20 }
 0x109   :  { %1816 = vmatpush1.bf16.msra.mxu0 %v3319_v21  ;;  %1980 = vmatpush1.bf16.msra.mxu1 %v3322_v22  ;;  %v2033_v21 = vrot.slane %v2020_v10, %v376_v2 }
 0x10a   :  { %1817 = vmatprep.subr.bf16.mxu0 %v3327_v24  ;;  %1981 = vmatprep.subr.bf16.mxu1 %v3330_v25 }
 0x10d   :  { %1818 = vmatpush1.bf16.msra.mxu0 %v3325_v27  ;;  %1982 = vmatpush1.bf16.msra.mxu1 %v3328_v28  ;;  %v2029_v27 = vrot.slane %v2020_v10, %v372_v4 }
 0x10e   :  { %1819 = vmatprep.subr.bf16.mxu0 %v3333_v29  ;;  %1983 = vmatprep.subr.bf16.mxu1 %v3336_v30  ;;  %v2037_v29 = vrot.slane %v2020_v10, %v380_v5  ;;  %v2833_v5 = vld [vmem:[%s3716_s7] ss:$0 sm:$0xff]  ;;  %s3400_s7 = scalar_lea.vmem %s2536_s18, 32 }
 0x10f   :  { %p3401_p8 = scmp.ne.s32.totalorder %s2536_s18, %s3400_s7  ;;  %p3406_p10 = scmp.lt.s32.totalorder %s3400_s7, %s3400_s7 }
 0x111   :  { %1820 = vmatpush1.bf16.msra.mxu0 %v3331_v23  ;;  %1984 = vmatpush1.bf16.msra.mxu1 %v3334_v31  ;;  %p3407_p11 = por %p3406_p10, %p3405_p9 }
 0x112   :  { %2844 = vmatprep.subr.bf16.mxu0 %v3338_v32  ;;  %2866 = vmatprep.subr.bf16.mxu1 %v3339_v33 }
 0x113   :  { %p3408_p12 = pnand %p3407_p11, %p3401_p8 }
 0x114   :  { %1822 = vmatmul.mubr.bf16.vlgmr.msra.gmra.mrb[0].mxu0 %v106_v34  ;;  %1986 = vmatmul.mubr.bf16.vlgmr.msra.gmra.mrb[0].mxu1 %v106_v34 }
 0x115   :  { %2845 = vmatpush3.bf16.msra.mxu0 %v3340_v49  ;;  %2867 = vmatpush3.bf16.msra.mxu1 %v3341_v35 }
 0x116   :  { %2846 = vmatprep.subr.bf16.mxu0 %v3342_v36  ;;  %2868 = vmatprep.subr.bf16.mxu1 %v3343_v9 }
 0x119   :  { %2847 = vmatpush3.bf16.msra.mxu0 %v3344_v37  ;;  %2869 = vmatpush3.bf16.msra.mxu1 %v3345_v38 }
 0x11a   :  { %2848 = vmatprep.subr.bf16.mxu0 %v3346_v39  ;;  %2870 = vmatprep.subr.bf16.mxu1 %v3347_v40 }
 0x11d   :  { %2849 = vmatpush3.bf16.msra.mxu0 %v3348_v26  ;;  %2871 = vmatpush3.bf16.msra.mxu1 %v3349_v41 }
 0x11e   :  { %2850 = vmatprep.subr.bf16.mxu0 %v3350_v42  ;;  %2872 = vmatprep.subr.bf16.mxu1 %v3351_v44 }
 0x121   :  { %2851 = vmatpush3.bf16.msra.mxu0 %v3352_v45  ;;  %2873 = vmatpush3.bf16.msra.mxu1 %v3353_v46  ;;  %v3370_v45 = vld [vmem:[%s3718_s9] sm:$0xff]  }
 0x122   :  { %2852 = vmatprep.subr.bf16.mxu0 %v3354_v47  ;;  %2874 = vmatprep.subr.bf16.mxu1 %v3355_v48  ;;  %v3371_v48 = vld [vmem:[%s3718_s9 + $0x8] sm:$0xff]  }
 0x125   :  { %2853 = vmatpush3.bf16.msra.mxu0 %v3356_v50  ;;  %2875 = vmatpush3.bf16.msra.mxu1 %v3357_v51  ;;  %v3372_v50 = vld [vmem:[%s3718_s9 + $0x10] sm:$0xff]   ;;  %v3373_v51 = vld [vmem:[%s3718_s9 + $0x18] sm:$0xff]  }
 0x126   :  { %2854 = vmatprep.subr.bf16.mxu0 %v3358_v52  ;;  %2876 = vmatprep.subr.bf16.mxu1 %v3359_v53  ;;  %v3374_v52 = vld [vmem:[%s3718_s9 + $0x20] sm:$0xff]   ;;  %v3375_v53 = vld [vmem:[%s3718_s9 + $0x28] sm:$0xff]  }
 0x129   :  { %2855 = vmatpush3.bf16.msra.mxu0 %v3360_v54  ;;  %2877 = vmatpush3.bf16.msra.mxu1 %v3361_v55  ;;  %v3376_v54 = vld [vmem:[%s3718_s9 + $0x30] sm:$0xff]   ;;  %v3377_v55 = vld [vmem:[%s3718_s9 + $0x38] sm:$0xff]  }
 0x12a   :  { %2856 = vmatprep.subr.bf16.mxu0 %v3362_v56  ;;  %2878 = vmatprep.subr.bf16.mxu1 %v3363_v57 }
 0x12d   :  { %2857 = vmatpush3.bf16.msra.mxu0 %v3364_v58  ;;  %2879 = vmatpush3.bf16.msra.mxu1 %v3365_v59  ;;  %v2800_v58 = vld [vmem:[%s3715_s6] ss:$0 sm:$0xff] }
 0x12e   :  { %2858 = vmatprep.subr.bf16.mxu0 %v3366_v60  ;;  %2880 = vmatprep.subr.bf16.mxu1 %v3367_v61 }
 0x131   :  { %2859 = vmatpush3.bf16.msra.mxu0 %v3368_v62  ;;  %2881 = vmatpush3.bf16.msra.mxu1 %v3369_v63 }
 0x132   :  { %2897 = vmatprep.subr.bf16.mxu0 %v3430_v0 }
 0x1e7   :  { %v1823_v15 = vpop.f32.mrb[0].mxu0  ;;  %v1987_v16 = vpop.f32.mrb[0].mxu1 }
 0x1e8   :  { %v2917_v19 = vadd.f32 %v1823_v15, %v369_v7  ;;  %v2919_v20 = vadd.f32 %v1987_v16, %v377_v8  ;;  %v1825_v22 = vpop.f32.mrb[1].mxu0  ;;  %v1989_v24 = vpop.f32.mrb[1].mxu1 }
 0x1e9   :  { %v2918_v25 = vadd.f32 %v1825_v22, %v373_v11  ;;  %v2920_v28 = vadd.f32 %v1989_v24, %v381_v12  ;;  %v1827_v30 = vpop.f32.mrb[2].mxu0  ;;  %v1991_v23 = vpop.f32.mrb[2].mxu1  ;;  %v2835_v12 = vld [vmem:[%s3719_s10] ss:$0 sm:$0xff] }
 0x1ea   :  { %v2016_v31 = vmul.f32 %v2917_v19, %v1999_v13  ;;  %v2018_v32 = vmul.f32 %v2919_v20, %v2007_v14  ;;  %v1828_v33 = vpop.f32.mrb[3].mxu0  ;;  %v1992_v34 = vpop.f32.mrb[3].mxu1 }
 0x1eb   :  { %v2017_v49 = vmul.f32 %v2918_v25, %v2003_v17  ;;  %v2019_v35 = vmul.f32 %v2920_v28, %v2011_v18 }
 0x1ec   :  { %v2042_v36 = vadd.f32 %v2025_v43, %v2016_v31  ;;  %v2044_v9 = vadd.f32 %v2033_v21, %v2018_v32 }
 0x1ed   :  { %v2043_v37 = vadd.f32 %v2029_v27, %v2017_v49  ;;  %v2045_v38 = vadd.f32 %v2037_v29, %v2019_v35 }
 0x1ee   :  { %v2046_v39 = vmax.f32 %v2042_v36, 0.0  ;;  %v2048_v40 = vmax.f32 %v2044_v9, 0.0 }
 0x1ef   :  { %v2047_v26 = vmax.f32 %v2043_v37, 0.0  ;;  %v2049_v41 = vmax.f32 %v2045_v38, 0.0 }
 0x1f0   :  { %v2050_v46 = vpack.c.bf16 %v2046_v39, %v2046_v39  ;;  %v2052_v47 = vpack.c.bf16 %v2048_v40, %v2048_v40 }
 0x1f1   :  { %v2051_v42 = vpack.c.bf16 %v2047_v26, %v2047_v26  ;;  %v2053_v44 = vpack.c.bf16 %v2049_v41, %v2049_v41 }
 0x1f3   :  { %2349 = vmatprep.mubr.bf16.mxu0 %v2051_v42  ;;  %2389 = vmatprep.mubr.bf16.mxu1 %v2053_v44 }
 0x1f4   :  { %2350 = vmatmul.mubr.bf16.vlgmr.msra.gmra.mrb[4].mxu0 %v2050_v46  ;;  %2390 = vmatmul.mubr.bf16.vlgmr.msra.gmra.mrb[4].mxu1 %v2052_v47 }
 0x1f5   :  { %2898 = vmatpush3.bf16.msra.mxu0 %v3370_v45  ;;  %2913 = vmatprep.mubr.msk.bf16.mxu0 %vm3431_vm0, %v3430_v0 }
 0x1f6   :  { %2899 = vmatprep.subr.bf16.mxu0 %v3430_v0 }
 0x1f9   :  { %2900 = vmatpush3.bf16.msra.mxu0 %v3371_v48 }
 0x1fa   :  { %2901 = vmatprep.subr.bf16.mxu0 %v3430_v0 }
 0x1fd   :  { %2902 = vmatpush3.bf16.msra.mxu0 %v3372_v50 }
 0x1fe   :  { %2903 = vmatprep.subr.bf16.mxu0 %v3430_v0 }
 0x201   :  { %2904 = vmatpush3.bf16.msra.mxu0 %v3373_v51 }
 0x202   :  { %2905 = vmatprep.subr.bf16.mxu0 %v3430_v0 }
 0x205   :  { %2906 = vmatpush3.bf16.msra.mxu0 %v3374_v52 }
 0x206   :  { %2907 = vmatprep.subr.bf16.mxu0 %v3430_v0 }
 0x209   :  { %2908 = vmatpush3.bf16.msra.mxu0 %v3375_v53 }
 0x20a   :  { %2909 = vmatprep.subr.bf16.mxu0 %v3430_v0 }
 0x20d   :  { %2910 = vmatpush3.bf16.msra.mxu0 %v3376_v54 }
 0x20e   :  { %2911 = vmatprep.subr.bf16.mxu0 %v3430_v0 }
 0x211   :  { %2912 = vmatpush3.bf16.msra.mxu0 %v3377_v55 }
 0x2c7   :  { %v2860_v56 = vpop.f32.mrb[4].mxu0  ;;  %v2882_v57 = vpop.f32.mrb[4].mxu1 }
 0x2c8   :  { %v2861_v59 = vpop.f32.mrb[5].mxu0  ;;  %v2883_v60 = vpop.f32.mrb[5].mxu1 }
 0x2c9   :  { %v2862_v61 = vadd.f32 %v2861_v59, %v2860_v56  ;;  %v2884_v62 = vadd.f32 %v2883_v60, %v2882_v57  ;;  %v2863_v63 = vpop.f32.mrb[6].mxu0  ;;  %v2885_v1 = vpop.f32.mrb[6].mxu1 }
 0x2ca   :  { %v2864_v2 = vpop.f32.mrb[7].mxu0  ;;  %v2886_v3 = vpop.f32.mrb[7].mxu1 }
 0x2cb   :  { %v2352_v4 = vadd.f32 %v2862_v61, %v2800_v58 }
 0x2cd   :  { %v2392_v0 = vadd.f32 %v2884_v62, %v2352_v4 }
 0x2cf   :  { %v2404_v7 = vmul.f32 %v2833_v5, %v2392_v0 }
 0x2d1   :  { %v2412_v8 = vadd.f32 %v2834_v6, %v2404_v7 }
 0x2d3   :  { %v2413_v10 = vmax.f32 %v2412_v8, 0.0 }
 0x2d5   :  { %v2414_v11 = vpack.c.bf16 %v2413_v10, %v2413_v10 }
 0x2d7   :  { %2914 = vmatmul.mubr.bf16.vlgmr.msra.gmra.mrb[8].mxu0 %v2414_v11 }
 0x3aa   :  { %v2520_v13 = vpop.f32.mrb[8].mxu0 }
 0x3ab   :  { %v2521_v14 = vadd.f32 %v2835_v12, %v2520_v13  ;;  %v2915_v15 = vpop.f32.mrb[9].mxu0 }
 0x3ac   :  { %v2523_v16 = vpop.f32.mrb[10].mxu0 }
 0x3ad   :  { %v2526_v17 = vmax.f32 %v2521_v14, 0.0  ;;  %v2916_v18 = vpop.f32.mrb[11].mxu0 }
 0x3af   :  { %2528 = vst.msk [vmem:[#allocation5] sm:$0x3] %vm2527_vm1, %v2526_v17 }
 0x3b0   :  { %3411 = shalt.err (!%p3408_p12)
}
 0x3b1   :  { %s3412_s19 = scalar_lea.hbm %s3720_s11, 32 }
 0x3b2   :  { %p3413_p13 = scmp.ne.s32.totalorder %s3720_s11, %s3412_s19  ;;  %p3416_p0 = scmp.lt.u32.totalorder %s3412_s19, %s3720_s11 }
 0x3b4   :  { %p3418_p1 = pnand %p3416_p0, %p3413_p13 }
 0x3b6   :  { %3421 = shalt.err (!%p3418_p1)
}
 0x3b7   :  { %2538 = dma.vmem_to_hbm [thread:$0]  %s2536_s18, 32, %s3720_s11, [#allocation4]  }
 0x3b8   :  { %3424 = dma.done.wait [#allocation4], 32  }
 0x3b9   :  { %3425 = vsyncadd [#allocation4], 4294967264 }
 0x3ba   :  { %2542 = vsyncpa [#allocation3], 1 }
 0x3bb   :  { %2543 = vsyncpa [#allocation4], 1 }

</bundles_post_ra>
